<compile_context>
chip_gen: v7x
topology: tpu7x:2x2x1
jax: 0.10.0
libtpu: 0.0.40
codegen_flags: <defaults>
</compile_context>

<pallas_src>
import numpy as np

import jax
import jax.numpy as jnp
from jax.experimental import pallas as pl
from jax.experimental.pallas import tpu as pltpu


# ------------------------- fused forward-pass kernel ------------------------ #

def mnist_fused_kernel(x_ref,               # (TB, 28, 28) f32
                       w1b_ref, b1_ref,     # (5, 28, 240), (1, 240)
                       w2b_ref, b2_ref,     # (5, 120, 160), (1, 160)
                       p1_ref, s1_ref,      # (2, 240, 120), (2, 12, 24)
                       p2_ref, s2_ref,      # (2, 160, 80),  (2, 4, 8)
                       fc1w_ref, fc1b_ref,  # (4, 80, 50), (1, 50)
                       fc2w_ref, fc2b_ref,  # (50, 10), (1, 10)
                       out_ref,             # (TB, 10)
                       h1_s, h2_s):         # VMEM scratch (12, 120), (4, 80)
    f32 = jnp.float32
    tb = x_ref.shape[0]

    for b in range(tb):                      # static unroll over the batch tile
        # ---- Conv2d(1,10,5): banded matmul over W, tap-sum over kernel rows ----
        acc1 = b1_ref[...] + jnp.dot(x_ref[b, 0:24, :], w1b_ref[0],
                                     preferred_element_type=f32)   # (24, 240)
        for ki in range(1, 5):
            acc1 = acc1 + jnp.dot(x_ref[b, ki:ki + 24, :], w1b_ref[ki],
                                  preferred_element_type=f32)

        # ---- Dropout2d (eval: identity); MaxPool2d(2); ReLU ----
        e1 = jnp.dot(acc1, p1_ref[0], preferred_element_type=f32)  # even W cols
        o1 = jnp.dot(acc1, p1_ref[1], preferred_element_type=f32)  # odd  W cols
        h1 = jnp.maximum(
            jnp.maximum(jnp.dot(s1_ref[0], e1, preferred_element_type=f32),
                        jnp.dot(s1_ref[1], e1, preferred_element_type=f32)),
            jnp.maximum(jnp.dot(s1_ref[0], o1, preferred_element_type=f32),
                        jnp.dot(s1_ref[1], o1, preferred_element_type=f32)))
        h1_s[...] = jnp.maximum(h1, 0.0)                           # (12, 120)

        # ---- Conv2d(10,20,5): banded matmul over (W,Cin) lanes ----
        acc2 = b2_ref[...] + jnp.dot(h1_s[0:8, :], w2b_ref[0],
                                     preferred_element_type=f32)   # (8, 160)
        for ki in range(1, 5):
            acc2 = acc2 + jnp.dot(h1_s[ki:ki + 8, :], w2b_ref[ki],
                                  preferred_element_type=f32)

        # ---- Dropout2d (identity); MaxPool2d(2); ReLU ----
        e2 = jnp.dot(acc2, p2_ref[0], preferred_element_type=f32)
        o2 = jnp.dot(acc2, p2_ref[1], preferred_element_type=f32)
        h2 = jnp.maximum(
            jnp.maximum(jnp.dot(s2_ref[0], e2, preferred_element_type=f32),
                        jnp.dot(s2_ref[1], e2, preferred_element_type=f32)),
            jnp.maximum(jnp.dot(s2_ref[0], o2, preferred_element_type=f32),
                        jnp.dot(s2_ref[1], o2, preferred_element_type=f32)))
        h2_s[...] = jnp.maximum(h2, 0.0)                           # (4, 80)

        # ---- Flatten + Linear(320,50) + ReLU (+ Dropout 0.25: identity) ----
        z = fc1b_ref[...]                                          # (1, 50)
        for h in range(4):
            z = z + jnp.dot(h2_s[h:h + 1, :], fc1w_ref[h],
                            preferred_element_type=f32)
        z = jnp.maximum(z, 0.0)

        # ---- Linear(50,10) ----
        logits = jnp.dot(z, fc2w_ref[...],
                         preferred_element_type=f32) + fc2b_ref[...]  # (1, 10)
        out_ref[b:b + 1, :] = logits


# ------------------------------- call wrapper ------------------------------- #

@jax.jit
def mnist_forward(x_nchw, params):
    B = x_nchw.shape[0]
    x = x_nchw[:, 0, :, :]                               # (B, 28, 28), Cin == 1
    TB = 8 if B >= 8 else B                              # batch tile per grid step
    Bp = ((B + TB - 1) // TB) * TB
    if Bp != B:
        x = jnp.pad(x, ((0, Bp - B), (0, 0), (0, 0)))

    const3 = lambda i: (0, 0, 0)
    const2 = lambda i: (0, 0)

    out = pl.pallas_call(
        mnist_fused_kernel,
        out_shape=jax.ShapeDtypeStruct((Bp, 10), jnp.float32),
        grid=(Bp // TB,),
        in_specs=[
            pl.BlockSpec((TB, 28, 28), lambda i: (i, 0, 0)),   # x (per batch tile)
            pl.BlockSpec((5, 28, 240), const3),                # conv1 banded W
            pl.BlockSpec((1, 240), const2),                    # conv1 bias (tiled)
            pl.BlockSpec((5, 120, 160), const3),               # conv2 banded W
            pl.BlockSpec((1, 160), const2),                    # conv2 bias (tiled)
            pl.BlockSpec((2, 240, 120), const3),               # pool1 lane select
            pl.BlockSpec((2, 12, 24), const3),                 # pool1 row select
            pl.BlockSpec((2, 160, 80), const3),                # pool2 lane select
            pl.BlockSpec((2, 4, 8), const3),                   # pool2 row select
            pl.BlockSpec((4, 80, 50), const3),                 # fc1 weight
            pl.BlockSpec((1, 50), const2),                     # fc1 bias
            pl.BlockSpec((50, 10), const2),                    # fc2 weight
            pl.BlockSpec((1, 10), const2),                     # fc2 bias
        ],
        out_specs=pl.BlockSpec((TB, 10), lambda i: (i, 0)),
        scratch_shapes=[pltpu.VMEM((12, 120), jnp.float32),
                        pltpu.VMEM((4, 80), jnp.float32)],
        compiler_params=pltpu.CompilerParams(dimension_semantics=("parallel",)),
    )(x, params["w1b"], params["b1row"], params["w2b"], params["b2row"],
      params["p1"], params["s1"], params["p2"], params["s2"],
      params["fc1w"], params["fc1b"], params["fc2w"], params["fc2b"])
    return out[:B]


# -------------------- one-time structured weight construction --------------- #

def _banded_conv_weight(w, out_w):
    # w: (K, K, Cin, Cout) = (kh, kw, cin, cout).  Returns (K, (out_w+K-1)*Cin,
    # out_w*Cout) so that   out[i, j*Cout+co] = sum_ki (x[i+ki, :] @ band[ki])
    # equals PyTorch's valid cross-correlation (conv output row i, col j).
    K, _, cin, cout = w.shape
    in_w = out_w + K - 1
    band = np.zeros((K, in_w * cin, out_w * cout), np.float32)
    for ki in range(K):
        for kj in range(K):
            for j in range(out_w):
                band[ki, (j + kj) * cin:(j + kj + 1) * cin,
                     j * cout:(j + 1) * cout] = w[ki, kj]
    return band


def _pool_lane_select(out_w, c):
    # (2, 2*out_w*c, out_w*c): [parity, in_lane=(w*c+ch), out_lane=(j*c+ch)]
    sel = np.zeros((2, 2 * out_w * c, out_w * c), np.float32)
    for par in range(2):
        for j in range(out_w):
            for ch in range(c):
                sel[par, (2 * j + par) * c + ch, j * c + ch] = 1.0
    return sel


def _pool_row_select(out_h):
    # (2, out_h, 2*out_h): picks even / odd input rows.
    sel = np.zeros((2, out_h, 2 * out_h), np.float32)
    for par in range(2):
        for i in range(out_h):
            sel[par, i, 2 * i + par] = 1.0
    return sel


def init_params(key):
    ks = jax.random.split(key, 8)

    def rnd(k, shape, scale):
        return np.asarray(jax.random.normal(k, shape, dtype=jnp.float32)) * scale

    # torch-equivalent base weights:
    #   conv1.weight (10,1,5,5)   -> stored here as (5,5,1,10)  (kh,kw,cin,cout)
    #   conv2.weight (20,10,5,5)  -> stored here as (5,5,10,20)
    #   fc1.weight (50,320)       -> stored here as (4,80,50) indexed [h, w*20+c, n]
    #       (row-permuted flatten: torch index c*16+h*4+w  <->  ours h*80+w*20+c)
    #   fc2.weight (10,50)        -> stored here transposed as (50,10)
    w1 = rnd(ks[0], (5, 5, 1, 10), 0.2)
    b1 = rnd(ks[1], (10,), 0.1)
    w2 = rnd(ks[2], (5, 5, 10, 20), 0.06)
    b2 = rnd(ks[3], (20,), 0.1)
    fc1w = rnd(ks[4], (4, 80, 50), 0.05)
    fc1b = rnd(ks[5], (1, 50), 0.1)
    fc2w = rnd(ks[6], (50, 10), 0.1)
    fc2b = rnd(ks[7], (1, 10), 0.1)

    params = {
        "w1b": _banded_conv_weight(w1, 24),      # (5, 28, 240)
        "b1row": np.tile(b1, 24)[None, :],       # (1, 240)
        "w2b": _banded_conv_weight(w2, 8),       # (5, 120, 160)
        "b2row": np.tile(b2, 8)[None, :],        # (1, 160)
        "p1": _pool_lane_select(12, 10),         # (2, 240, 120)
        "s1": _pool_row_select(12),              # (2, 12, 24)
        "p2": _pool_lane_select(4, 20),          # (2, 160, 80)
        "s2": _pool_row_select(4),               # (2, 4, 8)
        "fc1w": fc1w, "fc1b": fc1b, "fc2w": fc2w, "fc2b": fc2b,
    }
    return {k: jnp.asarray(v, dtype=jnp.float32) for k, v in params.items()}


# ----------------------------------- main ----------------------------------- #

if __name__ == "__main__":
    key = jax.random.PRNGKey(0)
    k_x, k_p = jax.random.split(key)

    # MNIST-shaped input (Linear(320, 50) implies 28x28 single-channel images)
    x = jax.random.normal(k_x, (2, 1, 28, 28), dtype=jnp.float32)
    params = init_params(k_p)

    out = mnist_forward(x, params)
    out = jax.block_until_ready(out)

    assert out.shape == (2, 10), out.shape
    assert bool(jnp.all(jnp.isfinite(out)))
    print("KERNEL_OK")
</pallas_src>

<mosaic_0001>
module attributes {stable_mosaic.version = 11 : i64} {
  func.func @mnist_fused_kernel(%arg0: i32, %arg1: memref<2x28x28xf32, #tpu.memory_space<vmem>>, %arg2: memref<5x28x240xf32, #tpu.memory_space<vmem>>, %arg3: memref<1x240xf32, #tpu.memory_space<vmem>>, %arg4: memref<5x120x160xf32, #tpu.memory_space<vmem>>, %arg5: memref<1x160xf32, #tpu.memory_space<vmem>>, %arg6: memref<2x240x120xf32, #tpu.memory_space<vmem>>, %arg7: memref<2x12x24xf32, #tpu.memory_space<vmem>>, %arg8: memref<2x160x80xf32, #tpu.memory_space<vmem>>, %arg9: memref<2x4x8xf32, #tpu.memory_space<vmem>>, %arg10: memref<4x80x50xf32, #tpu.memory_space<vmem>>, %arg11: memref<1x50xf32, #tpu.memory_space<vmem>>, %arg12: memref<50x10xf32, #tpu.memory_space<vmem>>, %arg13: memref<1x10xf32, #tpu.memory_space<vmem>>, %arg14: memref<2x10xf32, #tpu.memory_space<vmem>>, %arg15: memref<12x120xf32, #tpu.memory_space<vmem>>, %arg16: memref<4x80xf32, #tpu.memory_space<vmem>>) attributes {dimension_semantics = [#tpu.dimension_semantics<parallel>], iteration_bounds = array<i64: 1>, scalar_prefetch = 0 : i64, scratch_operands = 2 : i64, tpu.core_type = #tpu.core_type<tc>, window_params = [{transform_indices = @transform_0, window_bounds = array<i64: 2, 28, 28>}, {pipeline_mode = #tpu.pipeline_mode<synchronous>, transform_indices = @transform_1, window_bounds = array<i64: 5, 28, 240>}, {pipeline_mode = #tpu.pipeline_mode<synchronous>, transform_indices = @transform_2, window_bounds = array<i64: 1, 240>}, {pipeline_mode = #tpu.pipeline_mode<synchronous>, transform_indices = @transform_3, window_bounds = array<i64: 5, 120, 160>}, {pipeline_mode = #tpu.pipeline_mode<synchronous>, transform_indices = @transform_4, window_bounds = array<i64: 1, 160>}, {pipeline_mode = #tpu.pipeline_mode<synchronous>, transform_indices = @transform_5, window_bounds = array<i64: 2, 240, 120>}, {pipeline_mode = #tpu.pipeline_mode<synchronous>, transform_indices = @transform_6, window_bounds = array<i64: 2, 12, 24>}, {pipeline_mode = #tpu.pipeline_mode<synchronous>, transform_indices = @transform_7, window_bounds = array<i64: 2, 160, 80>}, {pipeline_mode = #tpu.pipeline_mode<synchronous>, transform_indices = @transform_8, window_bounds = array<i64: 2, 4, 8>}, {pipeline_mode = #tpu.pipeline_mode<synchronous>, transform_indices = @transform_9, window_bounds = array<i64: 4, 80, 50>}, {pipeline_mode = #tpu.pipeline_mode<synchronous>, transform_indices = @transform_10, window_bounds = array<i64: 1, 50>}, {pipeline_mode = #tpu.pipeline_mode<synchronous>, transform_indices = @transform_11, window_bounds = array<i64: 50, 10>}, {pipeline_mode = #tpu.pipeline_mode<synchronous>, transform_indices = @transform_12, window_bounds = array<i64: 1, 10>}, {transform_indices = @transform_13, window_bounds = array<i64: 2, 10>}]} {
    %c0 = arith.constant 0 : index
    %c0_0 = arith.constant 0 : index
    %0 = vector.load %arg3[%c0, %c0_0] : memref<1x240xf32, #tpu.memory_space<vmem>>, vector<1x240xf32>
    %c0_1 = arith.constant 0 : index
    %c0_2 = arith.constant 0 : index
    %c0_3 = arith.constant 0 : index
    %1 = vector.load %arg1[%c0_1, %c0_2, %c0_3] : memref<2x28x28xf32, #tpu.memory_space<vmem>>, vector<1x24x28xf32>
    %2 = vector.shape_cast %1 : vector<1x24x28xf32> to vector<24x28xf32>
    %c0_4 = arith.constant 0 : index
    %c0_5 = arith.constant 0 : index
    %c0_6 = arith.constant 0 : index
    %3 = vector.load %arg2[%c0_4, %c0_5, %c0_6] : memref<5x28x240xf32, #tpu.memory_space<vmem>>, vector<1x28x240xf32>
    %4 = vector.shape_cast %3 : vector<1x28x240xf32> to vector<28x240xf32>
    %cst = arith.constant dense<0.000000e+00> : vector<24x240xf32>
    %5 = tpu.matmul %2, %4, %cst {dimension_numbers = #tpu.dot_dimension_numbers<[1], [0], [0], [1], [0, 0, 1, 1], [], []>} : vector<24x28xf32>, vector<28x240xf32>, vector<24x240xf32> -> vector<24x240xf32>
    %6 = vector.broadcast %0 : vector<1x240xf32> to vector<24x240xf32>
    %7 = arith.addf %6, %5 : vector<24x240xf32>
    %c0_7 = arith.constant 0 : index
    %c1 = arith.constant 1 : index
    %c0_8 = arith.constant 0 : index
    %8 = vector.load %arg1[%c0_7, %c1, %c0_8] : memref<2x28x28xf32, #tpu.memory_space<vmem>>, vector<1x24x28xf32>
    %9 = vector.shape_cast %8 : vector<1x24x28xf32> to vector<24x28xf32>
    %c1_9 = arith.constant 1 : index
    %c0_10 = arith.constant 0 : index
    %c0_11 = arith.constant 0 : index
    %10 = vector.load %arg2[%c1_9, %c0_10, %c0_11] : memref<5x28x240xf32, #tpu.memory_space<vmem>>, vector<1x28x240xf32>
    %11 = vector.shape_cast %10 : vector<1x28x240xf32> to vector<28x240xf32>
    %cst_12 = arith.constant dense<0.000000e+00> : vector<24x240xf32>
    %12 = tpu.matmul %9, %11, %cst_12 {dimension_numbers = #tpu.dot_dimension_numbers<[1], [0], [0], [1], [0, 0, 1, 1], [], []>} : vector<24x28xf32>, vector<28x240xf32>, vector<24x240xf32> -> vector<24x240xf32>
    %13 = arith.addf %7, %12 : vector<24x240xf32>
    %c0_13 = arith.constant 0 : index
    %c2 = arith.constant 2 : index
    %c0_14 = arith.constant 0 : index
    %14 = vector.load %arg1[%c0_13, %c2, %c0_14] : memref<2x28x28xf32, #tpu.memory_space<vmem>>, vector<1x24x28xf32>
    %15 = vector.shape_cast %14 : vector<1x24x28xf32> to vector<24x28xf32>
    %c2_15 = arith.constant 2 : index
    %c0_16 = arith.constant 0 : index
    %c0_17 = arith.constant 0 : index
    %16 = vector.load %arg2[%c2_15, %c0_16, %c0_17] : memref<5x28x240xf32, #tpu.memory_space<vmem>>, vector<1x28x240xf32>
    %17 = vector.shape_cast %16 : vector<1x28x240xf32> to vector<28x240xf32>
    %cst_18 = arith.constant dense<0.000000e+00> : vector<24x240xf32>
    %18 = tpu.matmul %15, %17, %cst_18 {dimension_numbers = #tpu.dot_dimension_numbers<[1], [0], [0], [1], [0, 0, 1, 1], [], []>} : vector<24x28xf32>, vector<28x240xf32>, vector<24x240xf32> -> vector<24x240xf32>
    %19 = arith.addf %13, %18 : vector<24x240xf32>
    %c0_19 = arith.constant 0 : index
    %c3 = arith.constant 3 : index
    %c0_20 = arith.constant 0 : index
    %20 = vector.load %arg1[%c0_19, %c3, %c0_20] : memref<2x28x28xf32, #tpu.memory_space<vmem>>, vector<1x24x28xf32>
    %21 = vector.shape_cast %20 : vector<1x24x28xf32> to vector<24x28xf32>
    %c3_21 = arith.constant 3 : index
    %c0_22 = arith.constant 0 : index
    %c0_23 = arith.constant 0 : index
    %22 = vector.load %arg2[%c3_21, %c0_22, %c0_23] : memref<5x28x240xf32, #tpu.memory_space<vmem>>, vector<1x28x240xf32>
    %23 = vector.shape_cast %22 : vector<1x28x240xf32> to vector<28x240xf32>
    %cst_24 = arith.constant dense<0.000000e+00> : vector<24x240xf32>
    %24 = tpu.matmul %21, %23, %cst_24 {dimension_numbers = #tpu.dot_dimension_numbers<[1], [0], [0], [1], [0, 0, 1, 1], [], []>} : vector<24x28xf32>, vector<28x240xf32>, vector<24x240xf32> -> vector<24x240xf32>
    %25 = arith.addf %19, %24 : vector<24x240xf32>
    %c0_25 = arith.constant 0 : index
    %c4 = arith.constant 4 : index
    %c0_26 = arith.constant 0 : index
    %26 = vector.load %arg1[%c0_25, %c4, %c0_26] : memref<2x28x28xf32, #tpu.memory_space<vmem>>, vector<1x24x28xf32>
    %27 = vector.shape_cast %26 : vector<1x24x28xf32> to vector<24x28xf32>
    %c4_27 = arith.constant 4 : index
    %c0_28 = arith.constant 0 : index
    %c0_29 = arith.constant 0 : index
    %28 = vector.load %arg2[%c4_27, %c0_28, %c0_29] : memref<5x28x240xf32, #tpu.memory_space<vmem>>, vector<1x28x240xf32>
    %29 = vector.shape_cast %28 : vector<1x28x240xf32> to vector<28x240xf32>
    %cst_30 = arith.constant dense<0.000000e+00> : vector<24x240xf32>
    %30 = tpu.matmul %27, %29, %cst_30 {dimension_numbers = #tpu.dot_dimension_numbers<[1], [0], [0], [1], [0, 0, 1, 1], [], []>} : vector<24x28xf32>, vector<28x240xf32>, vector<24x240xf32> -> vector<24x240xf32>
    %31 = arith.addf %25, %30 : vector<24x240xf32>
    %c0_31 = arith.constant 0 : index
    %c0_32 = arith.constant 0 : index
    %c0_33 = arith.constant 0 : index
    %32 = vector.load %arg6[%c0_31, %c0_32, %c0_33] : memref<2x240x120xf32, #tpu.memory_space<vmem>>, vector<1x240x120xf32>
    %33 = vector.shape_cast %32 : vector<1x240x120xf32> to vector<240x120xf32>
    %cst_34 = arith.constant dense<0.000000e+00> : vector<24x120xf32>
    %34 = tpu.matmul %31, %33, %cst_34 {dimension_numbers = #tpu.dot_dimension_numbers<[1], [0], [0], [1], [0, 0, 1, 1], [], []>} : vector<24x240xf32>, vector<240x120xf32>, vector<24x120xf32> -> vector<24x120xf32>
    %c1_35 = arith.constant 1 : index
    %c0_36 = arith.constant 0 : index
    %c0_37 = arith.constant 0 : index
    %35 = vector.load %arg6[%c1_35, %c0_36, %c0_37] : memref<2x240x120xf32, #tpu.memory_space<vmem>>, vector<1x240x120xf32>
    %36 = vector.shape_cast %35 : vector<1x240x120xf32> to vector<240x120xf32>
    %cst_38 = arith.constant dense<0.000000e+00> : vector<24x120xf32>
    %37 = tpu.matmul %31, %36, %cst_38 {dimension_numbers = #tpu.dot_dimension_numbers<[1], [0], [0], [1], [0, 0, 1, 1], [], []>} : vector<24x240xf32>, vector<240x120xf32>, vector<24x120xf32> -> vector<24x120xf32>
    %c0_39 = arith.constant 0 : index
    %c0_40 = arith.constant 0 : index
    %c0_41 = arith.constant 0 : index
    %38 = vector.load %arg7[%c0_39, %c0_40, %c0_41] : memref<2x12x24xf32, #tpu.memory_space<vmem>>, vector<1x12x24xf32>
    %39 = vector.shape_cast %38 : vector<1x12x24xf32> to vector<12x24xf32>
    %cst_42 = arith.constant dense<0.000000e+00> : vector<12x120xf32>
    %40 = tpu.matmul %39, %34, %cst_42 {dimension_numbers = #tpu.dot_dimension_numbers<[1], [0], [0], [1], [0, 0, 1, 1], [], []>} : vector<12x24xf32>, vector<24x120xf32>, vector<12x120xf32> -> vector<12x120xf32>
    %c1_43 = arith.constant 1 : index
    %c0_44 = arith.constant 0 : index
    %c0_45 = arith.constant 0 : index
    %41 = vector.load %arg7[%c1_43, %c0_44, %c0_45] : memref<2x12x24xf32, #tpu.memory_space<vmem>>, vector<1x12x24xf32>
    %42 = vector.shape_cast %41 : vector<1x12x24xf32> to vector<12x24xf32>
    %cst_46 = arith.constant dense<0.000000e+00> : vector<12x120xf32>
    %43 = tpu.matmul %42, %34, %cst_46 {dimension_numbers = #tpu.dot_dimension_numbers<[1], [0], [0], [1], [0, 0, 1, 1], [], []>} : vector<12x24xf32>, vector<24x120xf32>, vector<12x120xf32> -> vector<12x120xf32>
    %44 = arith.maximumf %40, %43 : vector<12x120xf32>
    %c0_47 = arith.constant 0 : index
    %c0_48 = arith.constant 0 : index
    %c0_49 = arith.constant 0 : index
    %45 = vector.load %arg7[%c0_47, %c0_48, %c0_49] : memref<2x12x24xf32, #tpu.memory_space<vmem>>, vector<1x12x24xf32>
    %46 = vector.shape_cast %45 : vector<1x12x24xf32> to vector<12x24xf32>
    %cst_50 = arith.constant dense<0.000000e+00> : vector<12x120xf32>
    %47 = tpu.matmul %46, %37, %cst_50 {dimension_numbers = #tpu.dot_dimension_numbers<[1], [0], [0], [1], [0, 0, 1, 1], [], []>} : vector<12x24xf32>, vector<24x120xf32>, vector<12x120xf32> -> vector<12x120xf32>
    %c1_51 = arith.constant 1 : index
    %c0_52 = arith.constant 0 : index
    %c0_53 = arith.constant 0 : index
    %48 = vector.load %arg7[%c1_51, %c0_52, %c0_53] : memref<2x12x24xf32, #tpu.memory_space<vmem>>, vector<1x12x24xf32>
    %49 = vector.shape_cast %48 : vector<1x12x24xf32> to vector<12x24xf32>
    %cst_54 = arith.constant dense<0.000000e+00> : vector<12x120xf32>
    %50 = tpu.matmul %49, %37, %cst_54 {dimension_numbers = #tpu.dot_dimension_numbers<[1], [0], [0], [1], [0, 0, 1, 1], [], []>} : vector<12x24xf32>, vector<24x120xf32>, vector<12x120xf32> -> vector<12x120xf32>
    %51 = arith.maximumf %47, %50 : vector<12x120xf32>
    %52 = arith.maximumf %44, %51 : vector<12x120xf32>
    %cst_55 = arith.constant 0.000000e+00 : f32
    %53 = vector.broadcast %cst_55 : f32 to vector<12x120xf32>
    %54 = arith.maximumf %52, %53 : vector<12x120xf32>
    %c0_56 = arith.constant 0 : index
    %c0_57 = arith.constant 0 : index
    %55 = vector.load %arg15[%c0_56, %c0_57] : memref<12x120xf32, #tpu.memory_space<vmem>>, vector<12x120xf32>
    tpu.vector_store %arg15[%c0_56, %c0_57], %54 {strides = array<i32>} : memref<12x120xf32, #tpu.memory_space<vmem>>, vector<12x120xf32>,
    %c0_58 = arith.constant 0 : index
    %c0_59 = arith.constant 0 : index
    %56 = vector.load %arg5[%c0_58, %c0_59] : memref<1x160xf32, #tpu.memory_space<vmem>>, vector<1x160xf32>
    %c0_60 = arith.constant 0 : index
    %c0_61 = arith.constant 0 : index
    %57 = vector.load %arg15[%c0_60, %c0_61] : memref<12x120xf32, #tpu.memory_space<vmem>>, vector<8x120xf32>
    %c0_62 = arith.constant 0 : index
    %c0_63 = arith.constant 0 : index
    %c0_64 = arith.constant 0 : index
    %58 = vector.load %arg4[%c0_62, %c0_63, %c0_64] : memref<5x120x160xf32, #tpu.memory_space<vmem>>, vector<1x120x160xf32>
    %59 = vector.shape_cast %58 : vector<1x120x160xf32> to vector<120x160xf32>
    %cst_65 = arith.constant dense<0.000000e+00> : vector<8x160xf32>
    %60 = tpu.matmul %57, %59, %cst_65 {dimension_numbers = #tpu.dot_dimension_numbers<[1], [0], [0], [1], [0, 0, 1, 1], [], []>} : vector<8x120xf32>, vector<120x160xf32>, vector<8x160xf32> -> vector<8x160xf32>
    %61 = vector.broadcast %56 : vector<1x160xf32> to vector<8x160xf32>
    %62 = arith.addf %61, %60 : vector<8x160xf32>
    %c1_66 = arith.constant 1 : index
    %c0_67 = arith.constant 0 : index
    %63 = vector.load %arg15[%c1_66, %c0_67] : memref<12x120xf32, #tpu.memory_space<vmem>>, vector<8x120xf32>
    %c1_68 = arith.constant 1 : index
    %c0_69 = arith.constant 0 : index
    %c0_70 = arith.constant 0 : index
    %64 = vector.load %arg4[%c1_68, %c0_69, %c0_70] : memref<5x120x160xf32, #tpu.memory_space<vmem>>, vector<1x120x160xf32>
    %65 = vector.shape_cast %64 : vector<1x120x160xf32> to vector<120x160xf32>
    %cst_71 = arith.constant dense<0.000000e+00> : vector<8x160xf32>
    %66 = tpu.matmul %63, %65, %cst_71 {dimension_numbers = #tpu.dot_dimension_numbers<[1], [0], [0], [1], [0, 0, 1, 1], [], []>} : vector<8x120xf32>, vector<120x160xf32>, vector<8x160xf32> -> vector<8x160xf32>
    %67 = arith.addf %62, %66 : vector<8x160xf32>
    %c2_72 = arith.constant 2 : index
    %c0_73 = arith.constant 0 : index
    %68 = vector.load %arg15[%c2_72, %c0_73] : memref<12x120xf32, #tpu.memory_space<vmem>>, vector<8x120xf32>
    %c2_74 = arith.constant 2 : index
    %c0_75 = arith.constant 0 : index
    %c0_76 = arith.constant 0 : index
    %69 = vector.load %arg4[%c2_74, %c0_75, %c0_76] : memref<5x120x160xf32, #tpu.memory_space<vmem>>, vector<1x120x160xf32>
    %70 = vector.shape_cast %69 : vector<1x120x160xf32> to vector<120x160xf32>
    %cst_77 = arith.constant dense<0.000000e+00> : vector<8x160xf32>
    %71 = tpu.matmul %68, %70, %cst_77 {dimension_numbers = #tpu.dot_dimension_numbers<[1], [0], [0], [1], [0, 0, 1, 1], [], []>} : vector<8x120xf32>, vector<120x160xf32>, vector<8x160xf32> -> vector<8x160xf32>
    %72 = arith.addf %67, %71 : vector<8x160xf32>
    %c3_78 = arith.constant 3 : index
    %c0_79 = arith.constant 0 : index
    %73 = vector.load %arg15[%c3_78, %c0_79] : memref<12x120xf32, #tpu.memory_space<vmem>>, vector<8x120xf32>
    %c3_80 = arith.constant 3 : index
    %c0_81 = arith.constant 0 : index
    %c0_82 = arith.constant 0 : index
    %74 = vector.load %arg4[%c3_80, %c0_81, %c0_82] : memref<5x120x160xf32, #tpu.memory_space<vmem>>, vector<1x120x160xf32>
    %75 = vector.shape_cast %74 : vector<1x120x160xf32> to vector<120x160xf32>
    %cst_83 = arith.constant dense<0.000000e+00> : vector<8x160xf32>
    %76 = tpu.matmul %73, %75, %cst_83 {dimension_numbers = #tpu.dot_dimension_numbers<[1], [0], [0], [1], [0, 0, 1, 1], [], []>} : vector<8x120xf32>, vector<120x160xf32>, vector<8x160xf32> -> vector<8x160xf32>
    %77 = arith.addf %72, %76 : vector<8x160xf32>
    %c4_84 = arith.constant 4 : index
    %c0_85 = arith.constant 0 : index
    %78 = vector.load %arg15[%c4_84, %c0_85] : memref<12x120xf32, #tpu.memory_space<vmem>>, vector<8x120xf32>
    %c4_86 = arith.constant 4 : index
    %c0_87 = arith.constant 0 : index
    %c0_88 = arith.constant 0 : index
    %79 = vector.load %arg4[%c4_86, %c0_87, %c0_88] : memref<5x120x160xf32, #tpu.memory_space<vmem>>, vector<1x120x160xf32>
    %80 = vector.shape_cast %79 : vector<1x120x160xf32> to vector<120x160xf32>
    %cst_89 = arith.constant dense<0.000000e+00> : vector<8x160xf32>
    %81 = tpu.matmul %78, %80, %cst_89 {dimension_numbers = #tpu.dot_dimension_numbers<[1], [0], [0], [1], [0, 0, 1, 1], [], []>} : vector<8x120xf32>, vector<120x160xf32>, vector<8x160xf32> -> vector<8x160xf32>
    %82 = arith.addf %77, %81 : vector<8x160xf32>
    %c0_90 = arith.constant 0 : index
    %c0_91 = arith.constant 0 : index
    %c0_92 = arith.constant 0 : index
    %83 = vector.load %arg8[%c0_90, %c0_91, %c0_92] : memref<2x160x80xf32, #tpu.memory_space<vmem>>, vector<1x160x80xf32>
    %84 = vector.shape_cast %83 : vector<1x160x80xf32> to vector<160x80xf32>
    %cst_93 = arith.constant dense<0.000000e+00> : vector<8x80xf32>
    %85 = tpu.matmul %82, %84, %cst_93 {dimension_numbers = #tpu.dot_dimension_numbers<[1], [0], [0], [1], [0, 0, 1, 1], [], []>} : vector<8x160xf32>, vector<160x80xf32>, vector<8x80xf32> -> vector<8x80xf32>
    %c1_94 = arith.constant 1 : index
    %c0_95 = arith.constant 0 : index
    %c0_96 = arith.constant 0 : index
    %86 = vector.load %arg8[%c1_94, %c0_95, %c0_96] : memref<2x160x80xf32, #tpu.memory_space<vmem>>, vector<1x160x80xf32>
    %87 = vector.shape_cast %86 : vector<1x160x80xf32> to vector<160x80xf32>
    %cst_97 = arith.constant dense<0.000000e+00> : vector<8x80xf32>
    %88 = tpu.matmul %82, %87, %cst_97 {dimension_numbers = #tpu.dot_dimension_numbers<[1], [0], [0], [1], [0, 0, 1, 1], [], []>} : vector<8x160xf32>, vector<160x80xf32>, vector<8x80xf32> -> vector<8x80xf32>
    %c0_98 = arith.constant 0 : index
    %c0_99 = arith.constant 0 : index
    %c0_100 = arith.constant 0 : index
    %89 = vector.load %arg9[%c0_98, %c0_99, %c0_100] : memref<2x4x8xf32, #tpu.memory_space<vmem>>, vector<1x4x8xf32>
    %90 = vector.shape_cast %89 : vector<1x4x8xf32> to vector<4x8xf32>
    %cst_101 = arith.constant dense<0.000000e+00> : vector<4x80xf32>
    %91 = tpu.matmul %90, %85, %cst_101 {dimension_numbers = #tpu.dot_dimension_numbers<[1], [0], [0], [1], [0, 0, 1, 1], [], []>} : vector<4x8xf32>, vector<8x80xf32>, vector<4x80xf32> -> vector<4x80xf32>
    %c1_102 = arith.constant 1 : index
    %c0_103 = arith.constant 0 : index
    %c0_104 = arith.constant 0 : index
    %92 = vector.load %arg9[%c1_102, %c0_103, %c0_104] : memref<2x4x8xf32, #tpu.memory_space<vmem>>, vector<1x4x8xf32>
    %93 = vector.shape_cast %92 : vector<1x4x8xf32> to vector<4x8xf32>
    %cst_105 = arith.constant dense<0.000000e+00> : vector<4x80xf32>
    %94 = tpu.matmul %93, %85, %cst_105 {dimension_numbers = #tpu.dot_dimension_numbers<[1], [0], [0], [1], [0, 0, 1, 1], [], []>} : vector<4x8xf32>, vector<8x80xf32>, vector<4x80xf32> -> vector<4x80xf32>
    %95 = arith.maximumf %91, %94 : vector<4x80xf32>
    %c0_106 = arith.constant 0 : index
    %c0_107 = arith.constant 0 : index
    %c0_108 = arith.constant 0 : index
    %96 = vector.load %arg9[%c0_106, %c0_107, %c0_108] : memref<2x4x8xf32, #tpu.memory_space<vmem>>, vector<1x4x8xf32>
    %97 = vector.shape_cast %96 : vector<1x4x8xf32> to vector<4x8xf32>
    %cst_109 = arith.constant dense<0.000000e+00> : vector<4x80xf32>
    %98 = tpu.matmul %97, %88, %cst_109 {dimension_numbers = #tpu.dot_dimension_numbers<[1], [0], [0], [1], [0, 0, 1, 1], [], []>} : vector<4x8xf32>, vector<8x80xf32>, vector<4x80xf32> -> vector<4x80xf32>
    %c1_110 = arith.constant 1 : index
    %c0_111 = arith.constant 0 : index
    %c0_112 = arith.constant 0 : index
    %99 = vector.load %arg9[%c1_110, %c0_111, %c0_112] : memref<2x4x8xf32, #tpu.memory_space<vmem>>, vector<1x4x8xf32>
    %100 = vector.shape_cast %99 : vector<1x4x8xf32> to vector<4x8xf32>
    %cst_113 = arith.constant dense<0.000000e+00> : vector<4x80xf32>
    %101 = tpu.matmul %100, %88, %cst_113 {dimension_numbers = #tpu.dot_dimension_numbers<[1], [0], [0], [1], [0, 0, 1, 1], [], []>} : vector<4x8xf32>, vector<8x80xf32>, vector<4x80xf32> -> vector<4x80xf32>
    %102 = arith.maximumf %98, %101 : vector<4x80xf32>
    %103 = arith.maximumf %95, %102 : vector<4x80xf32>
    %cst_114 = arith.constant 0.000000e+00 : f32
    %104 = vector.broadcast %cst_114 : f32 to vector<4x80xf32>
    %105 = arith.maximumf %103, %104 : vector<4x80xf32>
    %c0_115 = arith.constant 0 : index
    %c0_116 = arith.constant 0 : index
    %106 = vector.load %arg16[%c0_115, %c0_116] : memref<4x80xf32, #tpu.memory_space<vmem>>, vector<4x80xf32>
    tpu.vector_store %arg16[%c0_115, %c0_116], %105 {strides = array<i32>} : memref<4x80xf32, #tpu.memory_space<vmem>>, vector<4x80xf32>,
    %c0_117 = arith.constant 0 : index
    %c0_118 = arith.constant 0 : index
    %107 = vector.load %arg11[%c0_117, %c0_118] : memref<1x50xf32, #tpu.memory_space<vmem>>, vector<1x50xf32>
    %c0_119 = arith.constant 0 : index
    %c0_120 = arith.constant 0 : index
    %108 = vector.load %arg16[%c0_119, %c0_120] : memref<4x80xf32, #tpu.memory_space<vmem>>, vector<1x80xf32>
    %c0_121 = arith.constant 0 : index
    %c0_122 = arith.constant 0 : index
    %c0_123 = arith.constant 0 : index
    %109 = vector.load %arg10[%c0_121, %c0_122, %c0_123] : memref<4x80x50xf32, #tpu.memory_space<vmem>>, vector<1x80x50xf32>
    %110 = vector.shape_cast %109 : vector<1x80x50xf32> to vector<80x50xf32>
    %cst_124 = arith.constant dense<0.000000e+00> : vector<1x50xf32>
    %111 = tpu.matmul %108, %110, %cst_124 {dimension_numbers = #tpu.dot_dimension_numbers<[1], [0], [0], [1], [0, 0, 1, 1], [], []>} : vector<1x80xf32>, vector<80x50xf32>, vector<1x50xf32> -> vector<1x50xf32>
    %112 = arith.addf %107, %111 : vector<1x50xf32>
    %c1_125 = arith.constant 1 : index
    %c0_126 = arith.constant 0 : index
    %113 = vector.load %arg16[%c1_125, %c0_126] : memref<4x80xf32, #tpu.memory_space<vmem>>, vector<1x80xf32>
    %c1_127 = arith.constant 1 : index
    %c0_128 = arith.constant 0 : index
    %c0_129 = arith.constant 0 : index
    %114 = vector.load %arg10[%c1_127, %c0_128, %c0_129] : memref<4x80x50xf32, #tpu.memory_space<vmem>>, vector<1x80x50xf32>
    %115 = vector.shape_cast %114 : vector<1x80x50xf32> to vector<80x50xf32>
    %cst_130 = arith.constant dense<0.000000e+00> : vector<1x50xf32>
    %116 = tpu.matmul %113, %115, %cst_130 {dimension_numbers = #tpu.dot_dimension_numbers<[1], [0], [0], [1], [0, 0, 1, 1], [], []>} : vector<1x80xf32>, vector<80x50xf32>, vector<1x50xf32> -> vector<1x50xf32>
    %117 = arith.addf %112, %116 : vector<1x50xf32>
    %c2_131 = arith.constant 2 : index
    %c0_132 = arith.constant 0 : index
    %118 = vector.load %arg16[%c2_131, %c0_132] : memref<4x80xf32, #tpu.memory_space<vmem>>, vector<1x80xf32>
    %c2_133 = arith.constant 2 : index
    %c0_134 = arith.constant 0 : index
    %c0_135 = arith.constant 0 : index
    %119 = vector.load %arg10[%c2_133, %c0_134, %c0_135] : memref<4x80x50xf32, #tpu.memory_space<vmem>>, vector<1x80x50xf32>
    %120 = vector.shape_cast %119 : vector<1x80x50xf32> to vector<80x50xf32>
    %cst_136 = arith.constant dense<0.000000e+00> : vector<1x50xf32>
    %121 = tpu.matmul %118, %120, %cst_136 {dimension_numbers = #tpu.dot_dimension_numbers<[1], [0], [0], [1], [0, 0, 1, 1], [], []>} : vector<1x80xf32>, vector<80x50xf32>, vector<1x50xf32> -> vector<1x50xf32>
    %122 = arith.addf %117, %121 : vector<1x50xf32>
    %c3_137 = arith.constant 3 : index
    %c0_138 = arith.constant 0 : index
    %123 = vector.load %arg16[%c3_137, %c0_138] : memref<4x80xf32, #tpu.memory_space<vmem>>, vector<1x80xf32>
    %c3_139 = arith.constant 3 : index
    %c0_140 = arith.constant 0 : index
    %c0_141 = arith.constant 0 : index
    %124 = vector.load %arg10[%c3_139, %c0_140, %c0_141] : memref<4x80x50xf32, #tpu.memory_space<vmem>>, vector<1x80x50xf32>
    %125 = vector.shape_cast %124 : vector<1x80x50xf32> to vector<80x50xf32>
    %cst_142 = arith.constant dense<0.000000e+00> : vector<1x50xf32>
    %126 = tpu.matmul %123, %125, %cst_142 {dimension_numbers = #tpu.dot_dimension_numbers<[1], [0], [0], [1], [0, 0, 1, 1], [], []>} : vector<1x80xf32>, vector<80x50xf32>, vector<1x50xf32> -> vector<1x50xf32>
    %127 = arith.addf %122, %126 : vector<1x50xf32>
    %cst_143 = arith.constant 0.000000e+00 : f32
    %128 = vector.broadcast %cst_143 : f32 to vector<1x50xf32>
    %129 = arith.maximumf %127, %128 : vector<1x50xf32>
    %c0_144 = arith.constant 0 : index
    %c0_145 = arith.constant 0 : index
    %130 = vector.load %arg12[%c0_144, %c0_145] : memref<50x10xf32, #tpu.memory_space<vmem>>, vector<50x10xf32>
    %cst_146 = arith.constant dense<0.000000e+00> : vector<1x10xf32>
    %131 = tpu.matmul %129, %130, %cst_146 {dimension_numbers = #tpu.dot_dimension_numbers<[1], [0], [0], [1], [0, 0, 1, 1], [], []>} : vector<1x50xf32>, vector<50x10xf32>, vector<1x10xf32> -> vector<1x10xf32>
    %c0_147 = arith.constant 0 : index
    %c0_148 = arith.constant 0 : index
    %132 = vector.load %arg13[%c0_147, %c0_148] : memref<1x10xf32, #tpu.memory_space<vmem>>, vector<1x10xf32>
    %133 = arith.addf %131, %132 : vector<1x10xf32>
    %c0_149 = arith.constant 0 : index
    %c0_150 = arith.constant 0 : index
    %134 = vector.load %arg14[%c0_149, %c0_150] : memref<2x10xf32, #tpu.memory_space<vmem>>, vector<1x10xf32>
    tpu.vector_store %arg14[%c0_149, %c0_150], %133 {strides = array<i32>} : memref<2x10xf32, #tpu.memory_space<vmem>>, vector<1x10xf32>,
    %c0_151 = arith.constant 0 : index
    %c0_152 = arith.constant 0 : index
    %135 = vector.load %arg3[%c0_151, %c0_152] : memref<1x240xf32, #tpu.memory_space<vmem>>, vector<1x240xf32>
    %c1_153 = arith.constant 1 : index
    %c0_154 = arith.constant 0 : index
    %c0_155 = arith.constant 0 : index
    %136 = vector.load %arg1[%c1_153, %c0_154, %c0_155] : memref<2x28x28xf32, #tpu.memory_space<vmem>>, vector<1x24x28xf32>
    %137 = vector.shape_cast %136 : vector<1x24x28xf32> to vector<24x28xf32>
    %c0_156 = arith.constant 0 : index
    %c0_157 = arith.constant 0 : index
    %c0_158 = arith.constant 0 : index
    %138 = vector.load %arg2[%c0_156, %c0_157, %c0_158] : memref<5x28x240xf32, #tpu.memory_space<vmem>>, vector<1x28x240xf32>
    %139 = vector.shape_cast %138 : vector<1x28x240xf32> to vector<28x240xf32>
    %cst_159 = arith.constant dense<0.000000e+00> : vector<24x240xf32>
    %140 = tpu.matmul %137, %139, %cst_159 {dimension_numbers = #tpu.dot_dimension_numbers<[1], [0], [0], [1], [0, 0, 1, 1], [], []>} : vector<24x28xf32>, vector<28x240xf32>, vector<24x240xf32> -> vector<24x240xf32>
    %141 = vector.broadcast %135 : vector<1x240xf32> to vector<24x240xf32>
    %142 = arith.addf %141, %140 : vector<24x240xf32>
    %c1_160 = arith.constant 1 : index
    %c1_161 = arith.constant 1 : index
    %c0_162 = arith.constant 0 : index
    %143 = vector.load %arg1[%c1_160, %c1_161, %c0_162] : memref<2x28x28xf32, #tpu.memory_space<vmem>>, vector<1x24x28xf32>
    %144 = vector.shape_cast %143 : vector<1x24x28xf32> to vector<24x28xf32>
    %c1_163 = arith.constant 1 : index
    %c0_164 = arith.constant 0 : index
    %c0_165 = arith.constant 0 : index
    %145 = vector.load %arg2[%c1_163, %c0_164, %c0_165] : memref<5x28x240xf32, #tpu.memory_space<vmem>>, vector<1x28x240xf32>
    %146 = vector.shape_cast %145 : vector<1x28x240xf32> to vector<28x240xf32>
    %cst_166 = arith.constant dense<0.000000e+00> : vector<24x240xf32>
    %147 = tpu.matmul %144, %146, %cst_166 {dimension_numbers = #tpu.dot_dimension_numbers<[1], [0], [0], [1], [0, 0, 1, 1], [], []>} : vector<24x28xf32>, vector<28x240xf32>, vector<24x240xf32> -> vector<24x240xf32>
    %148 = arith.addf %142, %147 : vector<24x240xf32>
    %c1_167 = arith.constant 1 : index
    %c2_168 = arith.constant 2 : index
    %c0_169 = arith.constant 0 : index
    %149 = vector.load %arg1[%c1_167, %c2_168, %c0_169] : memref<2x28x28xf32, #tpu.memory_space<vmem>>, vector<1x24x28xf32>
    %150 = vector.shape_cast %149 : vector<1x24x28xf32> to vector<24x28xf32>
    %c2_170 = arith.constant 2 : index
    %c0_171 = arith.constant 0 : index
    %c0_172 = arith.constant 0 : index
    %151 = vector.load %arg2[%c2_170, %c0_171, %c0_172] : memref<5x28x240xf32, #tpu.memory_space<vmem>>, vector<1x28x240xf32>
    %152 = vector.shape_cast %151 : vector<1x28x240xf32> to vector<28x240xf32>
    %cst_173 = arith.constant dense<0.000000e+00> : vector<24x240xf32>
    %153 = tpu.matmul %150, %152, %cst_173 {dimension_numbers = #tpu.dot_dimension_numbers<[1], [0], [0], [1], [0, 0, 1, 1], [], []>} : vector<24x28xf32>, vector<28x240xf32>, vector<24x240xf32> -> vector<24x240xf32>
    %154 = arith.addf %148, %153 : vector<24x240xf32>
    %c1_174 = arith.constant 1 : index
    %c3_175 = arith.constant 3 : index
    %c0_176 = arith.constant 0 : index
    %155 = vector.load %arg1[%c1_174, %c3_175, %c0_176] : memref<2x28x28xf32, #tpu.memory_space<vmem>>, vector<1x24x28xf32>
    %156 = vector.shape_cast %155 : vector<1x24x28xf32> to vector<24x28xf32>
    %c3_177 = arith.constant 3 : index
    %c0_178 = arith.constant 0 : index
    %c0_179 = arith.constant 0 : index
    %157 = vector.load %arg2[%c3_177, %c0_178, %c0_179] : memref<5x28x240xf32, #tpu.memory_space<vmem>>, vector<1x28x240xf32>
    %158 = vector.shape_cast %157 : vector<1x28x240xf32> to vector<28x240xf32>
    %cst_180 = arith.constant dense<0.000000e+00> : vector<24x240xf32>
    %159 = tpu.matmul %156, %158, %cst_180 {dimension_numbers = #tpu.dot_dimension_numbers<[1], [0], [0], [1], [0, 0, 1, 1], [], []>} : vector<24x28xf32>, vector<28x240xf32>, vector<24x240xf32> -> vector<24x240xf32>
    %160 = arith.addf %154, %159 : vector<24x240xf32>
    %c1_181 = arith.constant 1 : index
    %c4_182 = arith.constant 4 : index
    %c0_183 = arith.constant 0 : index
    %161 = vector.load %arg1[%c1_181, %c4_182, %c0_183] : memref<2x28x28xf32, #tpu.memory_space<vmem>>, vector<1x24x28xf32>
    %162 = vector.shape_cast %161 : vector<1x24x28xf32> to vector<24x28xf32>
    %c4_184 = arith.constant 4 : index
    %c0_185 = arith.constant 0 : index
    %c0_186 = arith.constant 0 : index
    %163 = vector.load %arg2[%c4_184, %c0_185, %c0_186] : memref<5x28x240xf32, #tpu.memory_space<vmem>>, vector<1x28x240xf32>
    %164 = vector.shape_cast %163 : vector<1x28x240xf32> to vector<28x240xf32>
    %cst_187 = arith.constant dense<0.000000e+00> : vector<24x240xf32>
    %165 = tpu.matmul %162, %164, %cst_187 {dimension_numbers = #tpu.dot_dimension_numbers<[1], [0], [0], [1], [0, 0, 1, 1], [], []>} : vector<24x28xf32>, vector<28x240xf32>, vector<24x240xf32> -> vector<24x240xf32>
    %166 = arith.addf %160, %165 : vector<24x240xf32>
    %c0_188 = arith.constant 0 : index
    %c0_189 = arith.constant 0 : index
    %c0_190 = arith.constant 0 : index
    %167 = vector.load %arg6[%c0_188, %c0_189, %c0_190] : memref<2x240x120xf32, #tpu.memory_space<vmem>>, vector<1x240x120xf32>
    %168 = vector.shape_cast %167 : vector<1x240x120xf32> to vector<240x120xf32>
    %cst_191 = arith.constant dense<0.000000e+00> : vector<24x120xf32>
    %169 = tpu.matmul %166, %168, %cst_191 {dimension_numbers = #tpu.dot_dimension_numbers<[1], [0], [0], [1], [0, 0, 1, 1], [], []>} : vector<24x240xf32>, vector<240x120xf32>, vector<24x120xf32> -> vector<24x120xf32>
    %c1_192 = arith.constant 1 : index
    %c0_193 = arith.constant 0 : index
    %c0_194 = arith.constant 0 : index
    %170 = vector.load %arg6[%c1_192, %c0_193, %c0_194] : memref<2x240x120xf32, #tpu.memory_space<vmem>>, vector<1x240x120xf32>
    %171 = vector.shape_cast %170 : vector<1x240x120xf32> to vector<240x120xf32>
    %cst_195 = arith.constant dense<0.000000e+00> : vector<24x120xf32>
    %172 = tpu.matmul %166, %171, %cst_195 {dimension_numbers = #tpu.dot_dimension_numbers<[1], [0], [0], [1], [0, 0, 1, 1], [], []>} : vector<24x240xf32>, vector<240x120xf32>, vector<24x120xf32> -> vector<24x120xf32>
    %c0_196 = arith.constant 0 : index
    %c0_197 = arith.constant 0 : index
    %c0_198 = arith.constant 0 : index
    %173 = vector.load %arg7[%c0_196, %c0_197, %c0_198] : memref<2x12x24xf32, #tpu.memory_space<vmem>>, vector<1x12x24xf32>
    %174 = vector.shape_cast %173 : vector<1x12x24xf32> to vector<12x24xf32>
    %cst_199 = arith.constant dense<0.000000e+00> : vector<12x120xf32>
    %175 = tpu.matmul %174, %169, %cst_199 {dimension_numbers = #tpu.dot_dimension_numbers<[1], [0], [0], [1], [0, 0, 1, 1], [], []>} : vector<12x24xf32>, vector<24x120xf32>, vector<12x120xf32> -> vector<12x120xf32>
    %c1_200 = arith.constant 1 : index
    %c0_201 = arith.constant 0 : index
    %c0_202 = arith.constant 0 : index
    %176 = vector.load %arg7[%c1_200, %c0_201, %c0_202] : memref<2x12x24xf32, #tpu.memory_space<vmem>>, vector<1x12x24xf32>
    %177 = vector.shape_cast %176 : vector<1x12x24xf32> to vector<12x24xf32>
    %cst_203 = arith.constant dense<0.000000e+00> : vector<12x120xf32>
    %178 = tpu.matmul %177, %169, %cst_203 {dimension_numbers = #tpu.dot_dimension_numbers<[1], [0], [0], [1], [0, 0, 1, 1], [], []>} : vector<12x24xf32>, vector<24x120xf32>, vector<12x120xf32> -> vector<12x120xf32>
    %179 = arith.maximumf %175, %178 : vector<12x120xf32>
    %c0_204 = arith.constant 0 : index
    %c0_205 = arith.constant 0 : index
    %c0_206 = arith.constant 0 : index
    %180 = vector.load %arg7[%c0_204, %c0_205, %c0_206] : memref<2x12x24xf32, #tpu.memory_space<vmem>>, vector<1x12x24xf32>
    %181 = vector.shape_cast %180 : vector<1x12x24xf32> to vector<12x24xf32>
    %cst_207 = arith.constant dense<0.000000e+00> : vector<12x120xf32>
    %182 = tpu.matmul %181, %172, %cst_207 {dimension_numbers = #tpu.dot_dimension_numbers<[1], [0], [0], [1], [0, 0, 1, 1], [], []>} : vector<12x24xf32>, vector<24x120xf32>, vector<12x120xf32> -> vector<12x120xf32>
    %c1_208 = arith.constant 1 : index
    %c0_209 = arith.constant 0 : index
    %c0_210 = arith.constant 0 : index
    %183 = vector.load %arg7[%c1_208, %c0_209, %c0_210] : memref<2x12x24xf32, #tpu.memory_space<vmem>>, vector<1x12x24xf32>
    %184 = vector.shape_cast %183 : vector<1x12x24xf32> to vector<12x24xf32>
    %cst_211 = arith.constant dense<0.000000e+00> : vector<12x120xf32>
    %185 = tpu.matmul %184, %172, %cst_211 {dimension_numbers = #tpu.dot_dimension_numbers<[1], [0], [0], [1], [0, 0, 1, 1], [], []>} : vector<12x24xf32>, vector<24x120xf32>, vector<12x120xf32> -> vector<12x120xf32>
    %186 = arith.maximumf %182, %185 : vector<12x120xf32>
    %187 = arith.maximumf %179, %186 : vector<12x120xf32>
    %cst_212 = arith.constant 0.000000e+00 : f32
    %188 = vector.broadcast %cst_212 : f32 to vector<12x120xf32>
    %189 = arith.maximumf %187, %188 : vector<12x120xf32>
    %c0_213 = arith.constant 0 : index
    %c0_214 = arith.constant 0 : index
    %190 = vector.load %arg15[%c0_213, %c0_214] : memref<12x120xf32, #tpu.memory_space<vmem>>, vector<12x120xf32>
    tpu.vector_store %arg15[%c0_213, %c0_214], %189 {strides = array<i32>} : memref<12x120xf32, #tpu.memory_space<vmem>>, vector<12x120xf32>,
    %c0_215 = arith.constant 0 : index
    %c0_216 = arith.constant 0 : index
    %191 = vector.load %arg5[%c0_215, %c0_216] : memref<1x160xf32, #tpu.memory_space<vmem>>, vector<1x160xf32>
    %c0_217 = arith.constant 0 : index
    %c0_218 = arith.constant 0 : index
    %192 = vector.load %arg15[%c0_217, %c0_218] : memref<12x120xf32, #tpu.memory_space<vmem>>, vector<8x120xf32>
    %c0_219 = arith.constant 0 : index
    %c0_220 = arith.constant 0 : index
    %c0_221 = arith.constant 0 : index
    %193 = vector.load %arg4[%c0_219, %c0_220, %c0_221] : memref<5x120x160xf32, #tpu.memory_space<vmem>>, vector<1x120x160xf32>
    %194 = vector.shape_cast %193 : vector<1x120x160xf32> to vector<120x160xf32>
    %cst_222 = arith.constant dense<0.000000e+00> : vector<8x160xf32>
    %195 = tpu.matmul %192, %194, %cst_222 {dimension_numbers = #tpu.dot_dimension_numbers<[1], [0], [0], [1], [0, 0, 1, 1], [], []>} : vector<8x120xf32>, vector<120x160xf32>, vector<8x160xf32> -> vector<8x160xf32>
    %196 = vector.broadcast %191 : vector<1x160xf32> to vector<8x160xf32>
    %197 = arith.addf %196, %195 : vector<8x160xf32>
    %c1_223 = arith.constant 1 : index
    %c0_224 = arith.constant 0 : index
    %198 = vector.load %arg15[%c1_223, %c0_224] : memref<12x120xf32, #tpu.memory_space<vmem>>, vector<8x120xf32>
    %c1_225 = arith.constant 1 : index
    %c0_226 = arith.constant 0 : index
    %c0_227 = arith.constant 0 : index
    %199 = vector.load %arg4[%c1_225, %c0_226, %c0_227] : memref<5x120x160xf32, #tpu.memory_space<vmem>>, vector<1x120x160xf32>
    %200 = vector.shape_cast %199 : vector<1x120x160xf32> to vector<120x160xf32>
    %cst_228 = arith.constant dense<0.000000e+00> : vector<8x160xf32>
    %201 = tpu.matmul %198, %200, %cst_228 {dimension_numbers = #tpu.dot_dimension_numbers<[1], [0], [0], [1], [0, 0, 1, 1], [], []>} : vector<8x120xf32>, vector<120x160xf32>, vector<8x160xf32> -> vector<8x160xf32>
    %202 = arith.addf %197, %201 : vector<8x160xf32>
    %c2_229 = arith.constant 2 : index
    %c0_230 = arith.constant 0 : index
    %203 = vector.load %arg15[%c2_229, %c0_230] : memref<12x120xf32, #tpu.memory_space<vmem>>, vector<8x120xf32>
    %c2_231 = arith.constant 2 : index
    %c0_232 = arith.constant 0 : index
    %c0_233 = arith.constant 0 : index
    %204 = vector.load %arg4[%c2_231, %c0_232, %c0_233] : memref<5x120x160xf32, #tpu.memory_space<vmem>>, vector<1x120x160xf32>
    %205 = vector.shape_cast %204 : vector<1x120x160xf32> to vector<120x160xf32>
    %cst_234 = arith.constant dense<0.000000e+00> : vector<8x160xf32>
    %206 = tpu.matmul %203, %205, %cst_234 {dimension_numbers = #tpu.dot_dimension_numbers<[1], [0], [0], [1], [0, 0, 1, 1], [], []>} : vector<8x120xf32>, vector<120x160xf32>, vector<8x160xf32> -> vector<8x160xf32>
    %207 = arith.addf %202, %206 : vector<8x160xf32>
    %c3_235 = arith.constant 3 : index
    %c0_236 = arith.constant 0 : index
    %208 = vector.load %arg15[%c3_235, %c0_236] : memref<12x120xf32, #tpu.memory_space<vmem>>, vector<8x120xf32>
    %c3_237 = arith.constant 3 : index
    %c0_238 = arith.constant 0 : index
    %c0_239 = arith.constant 0 : index
    %209 = vector.load %arg4[%c3_237, %c0_238, %c0_239] : memref<5x120x160xf32, #tpu.memory_space<vmem>>, vector<1x120x160xf32>
    %210 = vector.shape_cast %209 : vector<1x120x160xf32> to vector<120x160xf32>
    %cst_240 = arith.constant dense<0.000000e+00> : vector<8x160xf32>
    %211 = tpu.matmul %208, %210, %cst_240 {dimension_numbers = #tpu.dot_dimension_numbers<[1], [0], [0], [1], [0, 0, 1, 1], [], []>} : vector<8x120xf32>, vector<120x160xf32>, vector<8x160xf32> -> vector<8x160xf32>
    %212 = arith.addf %207, %211 : vector<8x160xf32>
    %c4_241 = arith.constant 4 : index
    %c0_242 = arith.constant 0 : index
    %213 = vector.load %arg15[%c4_241, %c0_242] : memref<12x120xf32, #tpu.memory_space<vmem>>, vector<8x120xf32>
    %c4_243 = arith.constant 4 : index
    %c0_244 = arith.constant 0 : index
    %c0_245 = arith.constant 0 : index
    %214 = vector.load %arg4[%c4_243, %c0_244, %c0_245] : memref<5x120x160xf32, #tpu.memory_space<vmem>>, vector<1x120x160xf32>
    %215 = vector.shape_cast %214 : vector<1x120x160xf32> to vector<120x160xf32>
    %cst_246 = arith.constant dense<0.000000e+00> : vector<8x160xf32>
    %216 = tpu.matmul %213, %215, %cst_246 {dimension_numbers = #tpu.dot_dimension_numbers<[1], [0], [0], [1], [0, 0, 1, 1], [], []>} : vector<8x120xf32>, vector<120x160xf32>, vector<8x160xf32> -> vector<8x160xf32>
    %217 = arith.addf %212, %216 : vector<8x160xf32>
    %c0_247 = arith.constant 0 : index
    %c0_248 = arith.constant 0 : index
    %c0_249 = arith.constant 0 : index
    %218 = vector.load %arg8[%c0_247, %c0_248, %c0_249] : memref<2x160x80xf32, #tpu.memory_space<vmem>>, vector<1x160x80xf32>
    %219 = vector.shape_cast %218 : vector<1x160x80xf32> to vector<160x80xf32>
    %cst_250 = arith.constant dense<0.000000e+00> : vector<8x80xf32>
    %220 = tpu.matmul %217, %219, %cst_250 {dimension_numbers = #tpu.dot_dimension_numbers<[1], [0], [0], [1], [0, 0, 1, 1], [], []>} : vector<8x160xf32>, vector<160x80xf32>, vector<8x80xf32> -> vector<8x80xf32>
    %c1_251 = arith.constant 1 : index
    %c0_252 = arith.constant 0 : index
    %c0_253 = arith.constant 0 : index
    %221 = vector.load %arg8[%c1_251, %c0_252, %c0_253] : memref<2x160x80xf32, #tpu.memory_space<vmem>>, vector<1x160x80xf32>
    %222 = vector.shape_cast %221 : vector<1x160x80xf32> to vector<160x80xf32>
    %cst_254 = arith.constant dense<0.000000e+00> : vector<8x80xf32>
    %223 = tpu.matmul %217, %222, %cst_254 {dimension_numbers = #tpu.dot_dimension_numbers<[1], [0], [0], [1], [0, 0, 1, 1], [], []>} : vector<8x160xf32>, vector<160x80xf32>, vector<8x80xf32> -> vector<8x80xf32>
    %c0_255 = arith.constant 0 : index
    %c0_256 = arith.constant 0 : index
    %c0_257 = arith.constant 0 : index
    %224 = vector.load %arg9[%c0_255, %c0_256, %c0_257] : memref<2x4x8xf32, #tpu.memory_space<vmem>>, vector<1x4x8xf32>
    %225 = vector.shape_cast %224 : vector<1x4x8xf32> to vector<4x8xf32>
    %cst_258 = arith.constant dense<0.000000e+00> : vector<4x80xf32>
    %226 = tpu.matmul %225, %220, %cst_258 {dimension_numbers = #tpu.dot_dimension_numbers<[1], [0], [0], [1], [0, 0, 1, 1], [], []>} : vector<4x8xf32>, vector<8x80xf32>, vector<4x80xf32> -> vector<4x80xf32>
    %c1_259 = arith.constant 1 : index
    %c0_260 = arith.constant 0 : index
    %c0_261 = arith.constant 0 : index
    %227 = vector.load %arg9[%c1_259, %c0_260, %c0_261] : memref<2x4x8xf32, #tpu.memory_space<vmem>>, vector<1x4x8xf32>
    %228 = vector.shape_cast %227 : vector<1x4x8xf32> to vector<4x8xf32>
    %cst_262 = arith.constant dense<0.000000e+00> : vector<4x80xf32>
    %229 = tpu.matmul %228, %220, %cst_262 {dimension_numbers = #tpu.dot_dimension_numbers<[1], [0], [0], [1], [0, 0, 1, 1], [], []>} : vector<4x8xf32>, vector<8x80xf32>, vector<4x80xf32> -> vector<4x80xf32>
    %230 = arith.maximumf %226, %229 : vector<4x80xf32>
    %c0_263 = arith.constant 0 : index
    %c0_264 = arith.constant 0 : index
    %c0_265 = arith.constant 0 : index
    %231 = vector.load %arg9[%c0_263, %c0_264, %c0_265] : memref<2x4x8xf32, #tpu.memory_space<vmem>>, vector<1x4x8xf32>
    %232 = vector.shape_cast %231 : vector<1x4x8xf32> to vector<4x8xf32>
    %cst_266 = arith.constant dense<0.000000e+00> : vector<4x80xf32>
    %233 = tpu.matmul %232, %223, %cst_266 {dimension_numbers = #tpu.dot_dimension_numbers<[1], [0], [0], [1], [0, 0, 1, 1], [], []>} : vector<4x8xf32>, vector<8x80xf32>, vector<4x80xf32> -> vector<4x80xf32>
    %c1_267 = arith.constant 1 : index
    %c0_268 = arith.constant 0 : index
    %c0_269 = arith.constant 0 : index
    %234 = vector.load %arg9[%c1_267, %c0_268, %c0_269] : memref<2x4x8xf32, #tpu.memory_space<vmem>>, vector<1x4x8xf32>
    %235 = vector.shape_cast %234 : vector<1x4x8xf32> to vector<4x8xf32>
    %cst_270 = arith.constant dense<0.000000e+00> : vector<4x80xf32>
    %236 = tpu.matmul %235, %223, %cst_270 {dimension_numbers = #tpu.dot_dimension_numbers<[1], [0], [0], [1], [0, 0, 1, 1], [], []>} : vector<4x8xf32>, vector<8x80xf32>, vector<4x80xf32> -> vector<4x80xf32>
    %237 = arith.maximumf %233, %236 : vector<4x80xf32>
    %238 = arith.maximumf %230, %237 : vector<4x80xf32>
    %cst_271 = arith.constant 0.000000e+00 : f32
    %239 = vector.broadcast %cst_271 : f32 to vector<4x80xf32>
    %240 = arith.maximumf %238, %239 : vector<4x80xf32>
    %c0_272 = arith.constant 0 : index
    %c0_273 = arith.constant 0 : index
    %241 = vector.load %arg16[%c0_272, %c0_273] : memref<4x80xf32, #tpu.memory_space<vmem>>, vector<4x80xf32>
    tpu.vector_store %arg16[%c0_272, %c0_273], %240 {strides = array<i32>} : memref<4x80xf32, #tpu.memory_space<vmem>>, vector<4x80xf32>,
    %c0_274 = arith.constant 0 : index
    %c0_275 = arith.constant 0 : index
    %242 = vector.load %arg11[%c0_274, %c0_275] : memref<1x50xf32, #tpu.memory_space<vmem>>, vector<1x50xf32>
    %c0_276 = arith.constant 0 : index
    %c0_277 = arith.constant 0 : index
    %243 = vector.load %arg16[%c0_276, %c0_277] : memref<4x80xf32, #tpu.memory_space<vmem>>, vector<1x80xf32>
    %c0_278 = arith.constant 0 : index
    %c0_279 = arith.constant 0 : index
    %c0_280 = arith.constant 0 : index
    %244 = vector.load %arg10[%c0_278, %c0_279, %c0_280] : memref<4x80x50xf32, #tpu.memory_space<vmem>>, vector<1x80x50xf32>
    %245 = vector.shape_cast %244 : vector<1x80x50xf32> to vector<80x50xf32>
    %cst_281 = arith.constant dense<0.000000e+00> : vector<1x50xf32>
    %246 = tpu.matmul %243, %245, %cst_281 {dimension_numbers = #tpu.dot_dimension_numbers<[1], [0], [0], [1], [0, 0, 1, 1], [], []>} : vector<1x80xf32>, vector<80x50xf32>, vector<1x50xf32> -> vector<1x50xf32>
    %247 = arith.addf %242, %246 : vector<1x50xf32>
    %c1_282 = arith.constant 1 : index
    %c0_283 = arith.constant 0 : index
    %248 = vector.load %arg16[%c1_282, %c0_283] : memref<4x80xf32, #tpu.memory_space<vmem>>, vector<1x80xf32>
    %c1_284 = arith.constant 1 : index
    %c0_285 = arith.constant 0 : index
    %c0_286 = arith.constant 0 : index
    %249 = vector.load %arg10[%c1_284, %c0_285, %c0_286] : memref<4x80x50xf32, #tpu.memory_space<vmem>>, vector<1x80x50xf32>
    %250 = vector.shape_cast %249 : vector<1x80x50xf32> to vector<80x50xf32>
    %cst_287 = arith.constant dense<0.000000e+00> : vector<1x50xf32>
    %251 = tpu.matmul %248, %250, %cst_287 {dimension_numbers = #tpu.dot_dimension_numbers<[1], [0], [0], [1], [0, 0, 1, 1], [], []>} : vector<1x80xf32>, vector<80x50xf32>, vector<1x50xf32> -> vector<1x50xf32>
    %252 = arith.addf %247, %251 : vector<1x50xf32>
    %c2_288 = arith.constant 2 : index
    %c0_289 = arith.constant 0 : index
    %253 = vector.load %arg16[%c2_288, %c0_289] : memref<4x80xf32, #tpu.memory_space<vmem>>, vector<1x80xf32>
    %c2_290 = arith.constant 2 : index
    %c0_291 = arith.constant 0 : index
    %c0_292 = arith.constant 0 : index
    %254 = vector.load %arg10[%c2_290, %c0_291, %c0_292] : memref<4x80x50xf32, #tpu.memory_space<vmem>>, vector<1x80x50xf32>
    %255 = vector.shape_cast %254 : vector<1x80x50xf32> to vector<80x50xf32>
    %cst_293 = arith.constant dense<0.000000e+00> : vector<1x50xf32>
    %256 = tpu.matmul %253, %255, %cst_293 {dimension_numbers = #tpu.dot_dimension_numbers<[1], [0], [0], [1], [0, 0, 1, 1], [], []>} : vector<1x80xf32>, vector<80x50xf32>, vector<1x50xf32> -> vector<1x50xf32>
    %257 = arith.addf %252, %256 : vector<1x50xf32>
    %c3_294 = arith.constant 3 : index
    %c0_295 = arith.constant 0 : index
    %258 = vector.load %arg16[%c3_294, %c0_295] : memref<4x80xf32, #tpu.memory_space<vmem>>, vector<1x80xf32>
    %c3_296 = arith.constant 3 : index
    %c0_297 = arith.constant 0 : index
    %c0_298 = arith.constant 0 : index
    %259 = vector.load %arg10[%c3_296, %c0_297, %c0_298] : memref<4x80x50xf32, #tpu.memory_space<vmem>>, vector<1x80x50xf32>
    %260 = vector.shape_cast %259 : vector<1x80x50xf32> to vector<80x50xf32>
    %cst_299 = arith.constant dense<0.000000e+00> : vector<1x50xf32>
    %261 = tpu.matmul %258, %260, %cst_299 {dimension_numbers = #tpu.dot_dimension_numbers<[1], [0], [0], [1], [0, 0, 1, 1], [], []>} : vector<1x80xf32>, vector<80x50xf32>, vector<1x50xf32> -> vector<1x50xf32>
    %262 = arith.addf %257, %261 : vector<1x50xf32>
    %cst_300 = arith.constant 0.000000e+00 : f32
    %263 = vector.broadcast %cst_300 : f32 to vector<1x50xf32>
    %264 = arith.maximumf %262, %263 : vector<1x50xf32>
    %c0_301 = arith.constant 0 : index
    %c0_302 = arith.constant 0 : index
    %265 = vector.load %arg12[%c0_301, %c0_302] : memref<50x10xf32, #tpu.memory_space<vmem>>, vector<50x10xf32>
    %cst_303 = arith.constant dense<0.000000e+00> : vector<1x10xf32>
    %266 = tpu.matmul %264, %265, %cst_303 {dimension_numbers = #tpu.dot_dimension_numbers<[1], [0], [0], [1], [0, 0, 1, 1], [], []>} : vector<1x50xf32>, vector<50x10xf32>, vector<1x10xf32> -> vector<1x10xf32>
    %c0_304 = arith.constant 0 : index
    %c0_305 = arith.constant 0 : index
    %267 = vector.load %arg13[%c0_304, %c0_305] : memref<1x10xf32, #tpu.memory_space<vmem>>, vector<1x10xf32>
    %268 = arith.addf %266, %267 : vector<1x10xf32>
    %c1_306 = arith.constant 1 : index
    %c0_307 = arith.constant 0 : index
    %269 = vector.load %arg14[%c1_306, %c0_307] : memref<2x10xf32, #tpu.memory_space<vmem>>, vector<1x10xf32>
    tpu.vector_store %arg14[%c1_306, %c0_307], %268 {strides = array<i32>} : memref<2x10xf32, #tpu.memory_space<vmem>>, vector<1x10xf32>,
    return
  }
  func.func @transform_0(%arg0: i32) -> (i32, i32, i32) {
    %c0_i32 = arith.constant 0 : i32
    %c0_i32_0 = arith.constant 0 : i32
    %c0_i32_1 = arith.constant 0 : i32
    return %arg0, %c0_i32, %c0_i32_0 : i32, i32, i32
  }
  func.func @transform_1(%arg0: i32) -> (i32, i32, i32) {
    %c0_i32 = arith.constant 0 : i32
    %c0_i32_0 = arith.constant 0 : i32
    %c0_i32_1 = arith.constant 0 : i32
    %c0_i32_2 = arith.constant 0 : i32
    return %c0_i32, %c0_i32_0, %c0_i32_1 : i32, i32, i32
  }
  func.func @transform_2(%arg0: i32) -> (i32, i32) {
    %c0_i32 = arith.constant 0 : i32
    %c0_i32_0 = arith.constant 0 : i32
    %c0_i32_1 = arith.constant 0 : i32
    return %c0_i32, %c0_i32_0 : i32, i32
  }
  func.func @transform_3(%arg0: i32) -> (i32, i32, i32) {
    %c0_i32 = arith.constant 0 : i32
    %c0_i32_0 = arith.constant 0 : i32
    %c0_i32_1 = arith.constant 0 : i32
    %c0_i32_2 = arith.constant 0 : i32
    return %c0_i32, %c0_i32_0, %c0_i32_1 : i32, i32, i32
  }
  func.func @transform_4(%arg0: i32) -> (i32, i32) {
    %c0_i32 = arith.constant 0 : i32
    %c0_i32_0 = arith.constant 0 : i32
    %c0_i32_1 = arith.constant 0 : i32
    return %c0_i32, %c0_i32_0 : i32, i32
  }
  func.func @transform_5(%arg0: i32) -> (i32, i32, i32) {
    %c0_i32 = arith.constant 0 : i32
    %c0_i32_0 = arith.constant 0 : i32
    %c0_i32_1 = arith.constant 0 : i32
    %c0_i32_2 = arith.constant 0 : i32
    return %c0_i32, %c0_i32_0, %c0_i32_1 : i32, i32, i32
  }
  func.func @transform_6(%arg0: i32) -> (i32, i32, i32) {
    %c0_i32 = arith.constant 0 : i32
    %c0_i32_0 = arith.constant 0 : i32
    %c0_i32_1 = arith.constant 0 : i32
    %c0_i32_2 = arith.constant 0 : i32
    return %c0_i32, %c0_i32_0, %c0_i32_1 : i32, i32, i32
  }
  func.func @transform_7(%arg0: i32) -> (i32, i32, i32) {
    %c0_i32 = arith.constant 0 : i32
    %c0_i32_0 = arith.constant 0 : i32
    %c0_i32_1 = arith.constant 0 : i32
    %c0_i32_2 = arith.constant 0 : i32
    return %c0_i32, %c0_i32_0, %c0_i32_1 : i32, i32, i32
  }
  func.func @transform_8(%arg0: i32) -> (i32, i32, i32) {
    %c0_i32 = arith.constant 0 : i32
    %c0_i32_0 = arith.constant 0 : i32
    %c0_i32_1 = arith.constant 0 : i32
    %c0_i32_2 = arith.constant 0 : i32
    return %c0_i32, %c0_i32_0, %c0_i32_1 : i32, i32, i32
  }
  func.func @transform_9(%arg0: i32) -> (i32, i32, i32) {
    %c0_i32 = arith.constant 0 : i32
    %c0_i32_0 = arith.constant 0 : i32
    %c0_i32_1 = arith.constant 0 : i32
    %c0_i32_2 = arith.constant 0 : i32
    return %c0_i32, %c0_i32_0, %c0_i32_1 : i32, i32, i32
  }
  func.func @transform_10(%arg0: i32) -> (i32, i32) {
    %c0_i32 = arith.constant 0 : i32
    %c0_i32_0 = arith.constant 0 : i32
    %c0_i32_1 = arith.constant 0 : i32
    return %c0_i32, %c0_i32_0 : i32, i32
  }
  func.func @transform_11(%arg0: i32) -> (i32, i32) {
    %c0_i32 = arith.constant 0 : i32
    %c0_i32_0 = arith.constant 0 : i32
    %c0_i32_1 = arith.constant 0 : i32
    return %c0_i32, %c0_i32_0 : i32, i32
  }
  func.func @transform_12(%arg0: i32) -> (i32, i32) {
    %c0_i32 = arith.constant 0 : i32
    %c0_i32_0 = arith.constant 0 : i32
    %c0_i32_1 = arith.constant 0 : i32
    return %c0_i32, %c0_i32_0 : i32, i32
  }
  func.func @transform_13(%arg0: i32) -> (i32, i32) {
    %c0_i32 = arith.constant 0 : i32
    %c0_i32_0 = arith.constant 0 : i32
    return %arg0, %c0_i32 : i32, i32
  }
}

</mosaic_0001>

<bundles_post_ra>
// kernel: mnist_forward.1
= control target key start
LH: loop header
LB: loop body
LE: loop exit
PB: predicated region body
PF: predicated region fallthrough
CT: control target
= control target key end

     0   :  { %vm67_vm0 = vcmask 1043456   ;;  %vm7332_vm1 = vmmov 1   ;;  %v7333_v7 = vmov 0.0   ;;  %vm57_vm3 = vcmask 228352   ;;  %s9979_s0 = inlined_call_operand.vmem [shape: f32[2,28,28], index: 0, kind: input, shape index: {}]   ;;  %s9980_s1 = inlined_call_operand.vmem [shape: f32[5,28,240], index: 1, kind: input, shape index: {}]   ;;  %s9981_s2 = inlined_call_operand.vmem [shape: f32[1,240], index: 2, kind: input, shape index: {}]   ;;  %s9982_s3 = inlined_call_operand.vmem [shape: f32[5,120,160], index: 3, kind: input, shape index: {}]   ;;  %s9983_s4 = inlined_call_operand.vmem [shape: f32[1,160], index: 4, kind: input, shape index: {}]   ;;  %s9984_s5 = inlined_call_operand.vmem [shape: f32[2,240,120], index: 5, kind: input, shape index: {}]   ;;  %s9985_s6 = inlined_call_operand.vmem [shape: f32[2,12,24], index: 6, kind: input, shape index: {}]   ;;  %s9986_s7 = inlined_call_operand.vmem [shape: f32[2,160,80], index: 7, kind: input, shape index: {}]   ;;  %s9987_s8 = inlined_call_operand.vmem [shape: f32[2,4,8], index: 8, kind: input, shape index: {}]   ;;  %s9988_s9 = inlined_call_operand.vmem [shape: f32[4,80,50], index: 9, kind: input, shape index: {}]   ;;  %s9989_s10 = inlined_call_operand.vmem [shape: f32[1,50], index: 10, kind: input, shape index: {}]   ;;  %s9990_s11 = inlined_call_operand.vmem [shape: f32[50,10], index: 11, kind: input, shape index: {}]   ;;  %s9991_s12 = inlined_call_operand.vmem [shape: f32[1,10], index: 12, kind: input, shape index: {}]   ;;  %s9992_s13 = inlined_call_operand.hbm [shape: f32[2,10], index: 13, kind: output, shape index: {}]  }
   0x1   :  { %v5278_v0 = vld [vmem:[%s9980_s1 + $0x48] sm:$0xff]  ;;  %v5280_v1 = vld [vmem:[%s9980_s1 + $0x58] sm:$0xff]  ;;  %v5277_v2 = vld [vmem:[%s9980_s1 + $0x40] sm:$0xff]  ;;  %265 = vmatprep.mubr.f32.mxu0 %v7333_v7  ;;  %138 = vmatprep.mubr.f32.mxu1 %v7333_v7  ;;  %v7334_v53 = vmov 0.0|0.0  }
   0x2   :  { %v6369_v3 = vpack.c.bf16 %v5280_v1, %v5278_v0  ;;  %v5279_v4 = vld [vmem:[%s9980_s1 + $0x50] sm:$0xff]  ;;  %vm7419_vm2 = vmpackc.low %vm67_vm0, %vm7332_vm1  ;;  %v5282_v6 = vld [vmem:[%s9980_s1 + $0x68] sm:$0xff] }
   0x3   :  { %v6371_v8 = vpack.c.bf16 %v5279_v4, %v5277_v2  ;;  %v5284_v9 = vld [vmem:[%s9980_s1 + $0x78] sm:$0xf]  ;;  %v5281_v10 = vld [vmem:[%s9980_s1 + $0x60] sm:$0xff]  ;;  %v5283_v11 = vld [vmem:[%s9980_s1 + $0x70] sm:$0xf] }
   0x4   :  { %6370 = vmatprep.subr.bf16.mxu0 %v6369_v3  ;;  %v6373_v12 = vpack.c.bf16 %v5284_v9, %v5282_v6  ;;  %v5291_v13 = vld [vmem:[%s9980_s1 + $0x88] sm:$0xff]  ;;  %v6376_v14 = vpack.c.bf16 %v5283_v11, %v5281_v10  ;;  %v5293_v15 = vld [vmem:[%s9980_s1 + $0x98] sm:$0xff]  ;;  %v5290_v17 = vld [vmem:[%s9980_s1 + $0x80] sm:$0xff] }
   0x5   :  { %6372 = vmatpush1.bf16.msra.mxu0 %v6371_v8  ;;  %v6379_v16 = vpack.c.bf16 %v5293_v15, %v5291_v13  ;;  %v5292_v18 = vld [vmem:[%s9980_s1 + $0x90] sm:$0xff]  ;;  %v5295_v19 = vld [vmem:[%s9980_s1 + $0xa8] sm:$0xff]  ;;  %v5297_v20 = vld [vmem:[%s9980_s1 + $0xb8] sm:$0xf] }
   0x6   :  { %6375 = vmatprep.subr.msk.bf16.mxu0 %vm7419_vm2, %v6373_v12  ;;  %v174_v21 = vld [vmem:[%s9979_s0 + $0x1] sm:$0xff]  ;;  %v6381_v22 = vpack.c.bf16 %v5292_v18, %v5290_v17  ;;  %v6383_v23 = vpack.c.bf16 %v5297_v20, %v5295_v19  ;;  %v5296_v25 = vld [vmem:[%s9980_s1 + $0xb0] sm:$0xf]  ;;  %v5306_v27 = vld [vmem:[%s9980_s1 + $0xd8] sm:$0xff] }
   0x7   :  { %v5294_v24 = vld [vmem:[%s9980_s1 + $0xa0] sm:$0xff]  ;;  %v5304_v26 = vld [vmem:[%s9980_s1 + $0xc8] sm:$0xff]  ;;  %v52_v29 = vld [vmem:[%s9980_s1 + $0x18] sm:$0xff] }
   0x8   :  { %v50_v28 = vld [vmem:[%s9980_s1 + $0x8] sm:$0xff]  ;;  %v49_v30 = vld [vmem:[%s9980_s1] sm:$0xff]  ;;  %v51_v31 = vld [vmem:[%s9980_s1 + $0x10] sm:$0xff]  ;;  %v6386_v33 = vpack.c.bf16 %v5296_v25, %v5294_v24  ;;  %v6389_v36 = vpack.c.bf16 %v5306_v27, %v5304_v26 }
   0x9   :  { %6378 = vmatpush1.bf16.msk.msra.mxu0 %vm7419_vm2, %v6376_v14  ;;  %v175_v32 = vld [vmem:[%s9979_s0 + $0x9] sm:$0xff]  ;;  %v6359_v34 = vpack.c.bf16 %v52_v29, %v50_v28  ;;  %v6361_v35 = vpack.c.bf16 %v51_v31, %v49_v30  ;;  %v56_v38 = vld [vmem:[%s9980_s1 + $0x38] sm:$0xf]  ;;  %v53_v40 = vld [vmem:[%s9980_s1 + $0x20] sm:$0xff] }
   0xa   :  { %6380 = vmatprep.subr.bf16.mxu0 %v6379_v16  ;;  %v54_v37 = vld [vmem:[%s9980_s1 + $0x28] sm:$0xff]  ;;  %v55_v41 = vld [vmem:[%s9980_s1 + $0x30] sm:$0xf]  ;;  %v5303_v44 = vld [vmem:[%s9980_s1 + $0xc0] sm:$0xff] }
   0xb   :  { %6360 = vmatprep.subr.bf16.mxu1 %v6359_v34  ;;  %v6363_v39 = vpack.c.bf16 %v56_v38, %v54_v37  ;;  %v6366_v42 = vpack.c.bf16 %v55_v41, %v53_v40  ;;  %v176_v43 = vld [vmem:[%s9979_s0 + $0x11] sm:$0xff]  ;;  %v5308_v46 = vld [vmem:[%s9980_s1 + $0xe8] sm:$0xff]  ;;  %v638_v48 = vld [vmem:[%s9984_s5] sm:$0xff] }
   0xc   :  { %5287 = vmatmul.mubr.msk.f32.vlgmr.msra.gmra.mrb[0].mxu0 %vm57_vm3, %v174_v21  ;;  %6362 = vmatpush1.bf16.msra.mxu1 %v6361_v35  ;;  %v5305_v45 = vld [vmem:[%s9980_s1 + $0xd0] sm:$0xff]  ;;  %v5310_v47 = vld [vmem:[%s9980_s1 + $0xf8] sm:$0xf]  ;;  %v46_v49 = vld [vmem:[%s9979_s0] sm:$0xff] }
   0xd   :  { %271 = vmatprep.mubr.f32.mxu0 %v7333_v7  ;;  %6382 = vmatpush1.bf16.msra.mxu0 %v6381_v22  ;;  %v639_v50 = vld [vmem:[%s9984_s5 + $0x8] sm:$0xff]  ;;  %v6391_v52 = vpack.c.bf16 %v5305_v45, %v5303_v44  ;;  %v6393_v54 = vpack.c.bf16 %v5310_v47, %v5308_v46  ;;  %v5307_v55 = vld [vmem:[%s9980_s1 + $0xe0] sm:$0xff]  ;;  %v5309_v56 = vld [vmem:[%s9980_s1 + $0xf0] sm:$0xf] }
   0xe   :  { %6385 = vmatprep.subr.msk.bf16.mxu0 %vm7419_vm2, %v6383_v23  ;;  %6365 = vmatprep.subr.msk.bf16.mxu1 %vm7419_vm2, %v6363_v39  ;;  %v290_v51 = vld [vmem:[%s9979_s0 + $0x2] sm:$0xff]  ;;  %v6410_v58 = vpack.c.bf16 %v639_v50, %v638_v48  ;;  %v5319_v59 = vld [vmem:[%s9980_s1 + $0x118] sm:$0xff]  ;;  %v640_v60 = vld [vmem:[%s9984_s5 + $0x10] sm:$0xff]  ;;  %v6396_v0 = vpack.c.bf16 %v5309_v56, %v5307_v55 }
   0xf   :  { %v5317_v57 = vld [vmem:[%s9980_s1 + $0x108] sm:$0xff]  ;;  %v641_v61 = vld [vmem:[%s9984_s5 + $0x18] sm:$0xff]  ;;  %v642_v3 = vld [vmem:[%s9984_s5 + $0x20] sm:$0xff] }
  0x10   :  { %5288 = vmatmul.mubr.msk.f32.gmra.mrb[2].mxu0 %vm57_vm3, %v175_v32  ;;  %6368 = vmatpush1.bf16.msk.msra.mxu1 %vm7419_vm2, %v6366_v42  ;;  %v47_v62 = vld [vmem:[%s9979_s0 + $0x8] sm:$0xff]  ;;  %v6399_v1 = vpack.c.bf16 %v5319_v59, %v5317_v57  ;;  %v6413_v2 = vpack.c.bf16 %v641_v61, %v640_v60  ;;  %v48_v6 = vld [vmem:[%s9979_s0 + $0x10] sm:$0xff]  ;;  %v5316_v9 = vld [vmem:[%s9980_s1 + $0x100] sm:$0xff] }
  0x11   :  { %277 = vmatprep.mubr.f32.mxu0 %v7333_v7  ;;  %6388 = vmatpush1.bf16.msk.msra.mxu0 %vm7419_vm2, %v6386_v33  ;;  %v291_v63 = vld [vmem:[%s9979_s0 + $0xa] sm:$0xff]  ;;  %v292_v8 = vld [vmem:[%s9979_s0 + $0x12] sm:$0xff]  ;;  %v5320_v19 = vld [vmem:[%s9980_s1 + $0x120] sm:$0xff] }
  0x12   :  { %6390 = vmatprep.subr.bf16.mxu0 %v6389_v36  ;;  %6409 = vmatprep.subr.bf16.mxu1 %v7334_v53  ;;  %v643_v4 = vld [vmem:[%s9984_s5 + $0x28] sm:$0xff]  ;;  %v5318_v10 = vld [vmem:[%s9980_s1 + $0x110] sm:$0xff]  ;;  %v5323_v13 = vld [vmem:[%s9980_s1 + $0x138] sm:$0xf] }
  0x13   :  { %5274 = vmatmul.mubr.msk.f32.vlgmr.msra.gmra.mrb[0].mxu1 %vm57_vm3, %v46_v49  ;;  %v5321_v11 = vld [vmem:[%s9980_s1 + $0x128] sm:$0xff]  ;;  %v6416_v12 = vpack.c.bf16 %v643_v4, %v642_v3  ;;  %v644_v14 = vld [vmem:[%s9984_s5 + $0x30] sm:$0xff]  ;;  %v645_v15 = vld [vmem:[%s9984_s5 + $0x38] sm:$0xff]  ;;  %v6401_v17 = vpack.c.bf16 %v5318_v10, %v5316_v9 }
  0x14   :  { %5289 = vmatmul.mubr.msk.f32.gmra.mrb[4].mxu0 %vm57_vm3, %v176_v43  ;;  %144 = vmatprep.mubr.f32.mxu1 %v7333_v7  ;;  %v406_v16 = vld [vmem:[%s9979_s0 + $0x3] sm:$0xff]  ;;  %v6403_v18 = vpack.c.bf16 %v5323_v13, %v5321_v11  ;;  %v5322_v20 = vld [vmem:[%s9980_s1 + $0x130] sm:$0xf]  ;;  %v6419_v21 = vpack.c.bf16 %v645_v15, %v644_v14 }
  0x15   :  { %381 = vmatprep.mubr.f32.mxu0 %v7333_v7  ;;  %6411 = vmatpush1.bf16.msra.mxu1 %v6410_v58  ;;  %v646_v22 = vld [vmem:[%s9984_s5 + $0x40] sm:$0xff]  ;;  %v647_v23 = vld [vmem:[%s9984_s5 + $0x48] sm:$0xff]  ;;  %v6406_v25 = vpack.c.bf16 %v5322_v20, %v5320_v19 }
  0x16   :  { %6412 = vmatprep.subr.bf16.mxu1 %v7334_v53  ;;  %v407_v24 = vld [vmem:[%s9979_s0 + $0xb] sm:$0xff] }
  0x17   :  { %5275 = vmatmul.mubr.msk.f32.gmra.mrb[2].mxu1 %vm57_vm3, %v47_v62 }
  0x18   :  { %5300 = vmatmul.mubr.msk.f32.vlgmr.msra.gmra.mrb[0].mxu0 %vm57_vm3, %v290_v51  ;;  %150 = vmatprep.mubr.f32.mxu1 %v7333_v7 }
  0x19   :  { %387 = vmatprep.mubr.f32.mxu0 %v7333_v7  ;;  %6392 = vmatpush1.bf16.msra.mxu0 %v6391_v52 }
  0x1a   :  { %6395 = vmatprep.subr.msk.bf16.mxu0 %vm7419_vm2, %v6393_v54  ;;  %6414 = vmatpush1.bf16.msra.mxu1 %v6413_v2 }
  0x1b   :  { %5276 = vmatmul.mubr.msk.f32.gmra.mrb[4].mxu1 %vm57_vm3, %v48_v6  ;;  %6415 = vmatprep.subr.bf16.mxu1 %v7334_v53 }
  0x1c   :  { %5301 = vmatmul.mubr.msk.f32.gmra.mrb[2].mxu0 %vm57_vm3, %v291_v63 }
  0x1d   :  { %393 = vmatprep.mubr.f32.mxu0 %v7333_v7  ;;  %6398 = vmatpush1.bf16.msk.msra.mxu0 %vm7419_vm2, %v6396_v0 }
  0x1e   :  { %6400 = vmatprep.subr.bf16.mxu0 %v6399_v1  ;;  %6417 = vmatpush1.bf16.msra.mxu1 %v6416_v12 }
  0x1f   :  { %6418 = vmatprep.subr.bf16.mxu1 %v7334_v53 }
  0x20   :  { %5302 = vmatmul.mubr.msk.f32.gmra.mrb[4].mxu0 %vm57_vm3, %v292_v8 }
  0x21   :  { %497 = vmatprep.mubr.f32.mxu0 %v7333_v7 }
  0x24   :  { %5313 = vmatmul.mubr.msk.f32.vlgmr.msra.gmra.mrb[0].mxu0 %vm57_vm3, %v406_v16 }
  0x25   :  { %503 = vmatprep.mubr.f32.mxu0 %v7333_v7  ;;  %6402 = vmatpush1.bf16.msra.mxu0 %v6401_v17 }
  0x26   :  { %18 = vsyncpa [#allocation5], 0  ;;  %6405 = vmatprep.subr.msk.bf16.mxu0 %vm7419_vm2, %v6403_v18  ;;  %6420 = vmatpush1.bf16.msra.mxu1 %v6419_v21  ;;  %v6422_v26 = vpack.c.bf16 %v647_v23, %v646_v22  ;;  %v648_v27 = vld [vmem:[%s9984_s5 + $0x50] sm:$0xff]  ;;  %v649_v28 = vld [vmem:[%s9984_s5 + $0x58] sm:$0xff]  ;;  %vm668_vm4 = vcmask 916480   ;;  %vm871_vm5 = vcmask 195584  }
  0x27   :  { %6421 = vmatprep.subr.bf16.mxu1 %v7334_v53  ;;  %v408_v29 = vld [vmem:[%s9979_s0 + $0x13] sm:$0xff]  ;;  %v6425_v32 = vpack.c.bf16 %v649_v28, %v648_v27  ;;  %v650_v33 = vld [vmem:[%s9984_s5 + $0x60] sm:$0xff]  ;;  %v651_v34 = vld [vmem:[%s9984_s5 + $0x68] sm:$0xff]  ;;  %vm1197_vm6 = vcmask 977920   ;;  %vm1195_vm7 = vcmask 982016   ;;  %vm1770_vm8 = vcmask 261120  }
  0x28   :  { %5314 = vmatmul.mubr.msk.f32.gmra.mrb[2].mxu0 %vm57_vm3, %v407_v24  ;;  %v5332_v30 = vld [vmem:[%s9984_s5 + $0xf0] sm:$0xff]  ;;  %v5333_v31 = vld [vmem:[%s9984_s5 + $0xf8] sm:$0xff]  ;;  %v522_v35 = vld [vmem:[%s9979_s0 + $0x4] sm:$0xff]  ;;  %v6428_v39 = vpack.c.bf16 %v651_v34, %v650_v33  ;;  %vm7335_vm9 = vmmov 0   ;;  %vm1936_vm10 = vcmask 64512   ;;  %vm2229_vm11 = vcmask 650240  }
  0x29   :  { %509 = vmatprep.mubr.f32.mxu0 %v7333_v7  ;;  %6408 = vmatpush1.bf16.msk.msra.mxu0 %vm7419_vm2, %v6406_v25  ;;  %v6455_v36 = vpack.c.bf16 %v5333_v31, %v5332_v30  ;;  %v5334_v37 = vld [vmem:[%s9984_s5 + $0x100] sm:$0xff]  ;;  %v5335_v38 = vld [vmem:[%s9984_s5 + $0x108] sm:$0xff]  ;;  %v652_v40 = vld [vmem:[%s9984_s5 + $0x70] sm:$0xff]  ;;  %vm2243_vm12 = vcmask 654336   ;;  %vm2589_vm13 = vcmask 1041408   ;;  %vm2585_vm14 = vcmask 408576  }
  0x2a   :  { %6454 = vmatprep.subr.bf16.mxu0 %v7334_v53  ;;  %6423 = vmatpush1.bf16.msra.mxu1 %v6422_v26  ;;  %v653_v41 = vld [vmem:[%s9984_s5 + $0x78] sm:$0xff]  ;;  %v523_v42 = vld [vmem:[%s9979_s0 + $0xc] sm:$0xff]  ;;  %v6458_v43 = vpack.c.bf16 %v5335_v38, %v5334_v37  ;;  %v654_v47 = vld [vmem:[%s9984_s5 + $0x80] sm:$0xff]  ;;  %vm2663_vm15 = vcmask 73728   ;;  %s7336_s20 = smov [#allocation4]  }
  0x2b   :  { %6424 = vmatprep.subr.bf16.mxu1 %v7334_v53  ;;  %v5336_v44 = vld [vmem:[%s9984_s5 + $0x110] sm:$0xff]  ;;  %v5337_v45 = vld [vmem:[%s9984_s5 + $0x118] sm:$0xff]  ;;  %v6431_v46 = vpack.c.bf16 %v653_v41, %v652_v40  ;;  %v655_v48 = vld [vmem:[%s9984_s5 + $0x88] sm:$0xff]  ;;  %s5264_s21 = sshll.u32 %s7336_s20, 4  ;;  %s5265_s21 = int_to_ptr.vmem [resolvable:$true] %s5264_s21 }
  0x2c   :  { %5315 = vmatmul.mubr.msk.f32.gmra.mrb[4].mxu0 %vm57_vm3, %v408_v29  ;;  %v524_v49 = vld [vmem:[%s9979_s0 + $0x14] sm:$0xff]  ;;  %v6461_v50 = vpack.c.bf16 %v5337_v45, %v5336_v44  ;;  %v5338_v51 = vld [vmem:[%s9984_s5 + $0x120] sm:$0xff]  ;;  %v5339_v52 = vld [vmem:[%s9984_s5 + $0x128] sm:$0xff]  ;;  %v6434_v54 = vpack.c.bf16 %v655_v48, %v654_v47  ;;  %p7313_p1 = scmp.lt.s32.totalorder %s5265_s21, %s5265_s21 }
  0x2d   :  { %613 = vmatprep.mubr.f32.mxu0 %v7333_v7  ;;  %v656_v55 = vld [vmem:[%s9984_s5 + $0x90] sm:$0xff]  ;;  %v657_v56 = vld [vmem:[%s9984_s5 + $0x98] sm:$0xff]  ;;  %v6464_v57 = vpack.c.bf16 %v5339_v52, %v5338_v51  ;;  %v658_v61 = vld [vmem:[%s9984_s5 + $0xa0] sm:$0xff] }
  0x2e   :  { %6426 = vmatpush1.bf16.msra.mxu1 %v6425_v32  ;;  %v5340_v58 = vld [vmem:[%s9984_s5 + $0x130] sm:$0xff]  ;;  %v5341_v59 = vld [vmem:[%s9984_s5 + $0x138] sm:$0xff]  ;;  %v6437_v60 = vpack.c.bf16 %v657_v56, %v656_v55  ;;  %v659_v62 = vld [vmem:[%s9984_s5 + $0xa8] sm:$0xff] }
  0x2f   :  { %6427 = vmatprep.subr.bf16.mxu1 %v7334_v53  ;;  %v6467_v63 = vpack.c.bf16 %v5341_v59, %v5340_v58  ;;  %v5342_v0 = vld [vmem:[%s9984_s5 + $0x140] sm:$0xff]  ;;  %v5343_v1 = vld [vmem:[%s9984_s5 + $0x148] sm:$0xff]  ;;  %v6440_v2 = vpack.c.bf16 %v659_v62, %v658_v61  ;;  %v660_v3 = vld [vmem:[%s9984_s5 + $0xb0] sm:$0xff] }
  0x30   :  { %5326 = vmatmul.mubr.msk.f32.vlgmr.msra.gmra.mrb[0].mxu0 %vm57_vm3, %v522_v35  ;;  %v661_v4 = vld [vmem:[%s9984_s5 + $0xb8] sm:$0xff]  ;;  %v6470_v6 = vpack.c.bf16 %v5343_v1, %v5342_v0  ;;  %v5344_v8 = vld [vmem:[%s9984_s5 + $0x150] sm:$0xff]  ;;  %v662_v11 = vld [vmem:[%s9984_s5 + $0xc0] sm:$0xff] }
  0x31   :  { %619 = vmatprep.mubr.f32.mxu0 %v7333_v7  ;;  %6456 = vmatpush1.bf16.msra.mxu0 %v6455_v36  ;;  %v5345_v9 = vld [vmem:[%s9984_s5 + $0x158] sm:$0xff]  ;;  %v6443_v10 = vpack.c.bf16 %v661_v4, %v660_v3  ;;  %v663_v12 = vld [vmem:[%s9984_s5 + $0xc8] sm:$0xff]  ;;  %v5346_v14 = vld [vmem:[%s9984_s5 + $0x160] sm:$0xff] }
  0x32   :  { %6457 = vmatprep.subr.bf16.mxu0 %v7334_v53  ;;  %6429 = vmatpush1.bf16.msra.mxu1 %v6428_v39  ;;  %v6473_v13 = vpack.c.bf16 %v5345_v9, %v5344_v8  ;;  %v5347_v15 = vld [vmem:[%s9984_s5 + $0x168] sm:$0xff]  ;;  %v6446_v16 = vpack.c.bf16 %v663_v12, %v662_v11  ;;  %v5348_v18 = vld [vmem:[%s9984_s5 + $0x170] sm:$0xff]  ;;  %v5349_v19 = vld [vmem:[%s9984_s5 + $0x178] sm:$0xff] }
  0x33   :  { %6430 = vmatprep.subr.bf16.mxu1 %v7334_v53  ;;  %v6476_v17 = vpack.c.bf16 %v5347_v15, %v5346_v14  ;;  %v6479_v20 = vpack.c.bf16 %v5349_v19, %v5348_v18  ;;  %v5350_v21 = vld [vmem:[%s9984_s5 + $0x180] sm:$0xff]  ;;  %v5351_v22 = vld [vmem:[%s9984_s5 + $0x188] sm:$0xff]  ;;  %v5352_v24 = vld [vmem:[%s9984_s5 + $0x190] sm:$0xff] }
  0x34   :  { %5327 = vmatmul.mubr.msk.f32.gmra.mrb[2].mxu0 %vm57_vm3, %v523_v42  ;;  %v6482_v23 = vpack.c.bf16 %v5351_v22, %v5350_v21  ;;  %v5353_v25 = vld [vmem:[%s9984_s5 + $0x198] sm:$0xff]  ;;  %v5354_v27 = vld [vmem:[%s9984_s5 + $0x1a0] sm:$0xff]  ;;  %v5355_v28 = vld [vmem:[%s9984_s5 + $0x1a8] sm:$0xff] }
  0x35   :  { %625 = vmatprep.mubr.f32.mxu0 %v7333_v7  ;;  %6459 = vmatpush1.bf16.msra.mxu0 %v6458_v43  ;;  %v6485_v26 = vpack.c.bf16 %v5353_v25, %v5352_v24  ;;  %v6488_v29 = vpack.c.bf16 %v5355_v28, %v5354_v27  ;;  %v5356_v30 = vld [vmem:[%s9984_s5 + $0x1b0] sm:$0xff]  ;;  %v5357_v31 = vld [vmem:[%s9984_s5 + $0x1b8] sm:$0xff]  ;;  %v5358_v35 = vld [vmem:[%s9984_s5 + $0x1c0] sm:$0xff] }
  0x36   :  { %6460 = vmatprep.subr.bf16.mxu0 %v7334_v53  ;;  %6432 = vmatpush1.bf16.msra.mxu1 %v6431_v46  ;;  %v6491_v32 = vpack.c.bf16 %v5357_v31, %v5356_v30  ;;  %v664_v33 = vld [vmem:[%s9984_s5 + $0xd0] sm:$0xff]  ;;  %v665_v34 = vld [vmem:[%s9984_s5 + $0xd8] sm:$0xff]  ;;  %v5359_v37 = vld [vmem:[%s9984_s5 + $0x1c8] sm:$0xff] }
  0x37   :  { %6433 = vmatprep.subr.bf16.mxu1 %v7334_v53  ;;  %v6449_v36 = vpack.c.bf16 %v665_v34, %v664_v33  ;;  %v6494_v38 = vpack.c.bf16 %v5359_v37, %v5358_v35  ;;  %v666_v39 = vld [vmem:[%s9984_s5 + $0xe0] sm:$0xff]  ;;  %v667_v40 = vld [vmem:[%s9984_s5 + $0xe8] sm:$0xff]  ;;  %v5360_v41 = vld [vmem:[%s9984_s5 + $0x1d0] sm:$0xff] }
  0x38   :  { %5328 = vmatmul.mubr.msk.f32.gmra.mrb[4].mxu0 %vm57_vm3, %v524_v49  ;;  %v6452_v42 = vpack.c.bf16 %v667_v40, %v666_v39  ;;  %v5361_v43 = vld [vmem:[%s9984_s5 + $0x1d8] sm:$0xff]  ;;  %v158_v49 = vlaneseq  ;;  %v45_v55 = vld [vmem:[%s9981_s2] sm:$0x3]  ;;  %v870_v30 = vld [vmem:[%s9985_s6 + $0x8] sm:$0xf] }
  0x39   :  { %6462 = vmatpush1.bf16.msra.mxu0 %v6461_v50  ;;  %v6497_v44 = vpack.c.bf16 %v5361_v43, %v5360_v41  ;;  %v869_v15 = vld [vmem:[%s9985_s6] sm:$0xff]  ;;  %v5367_v31 = vld [vmem:[%s9985_s6 + $0x10] sm:$0xff]  ;;  %v1202_v33 = vld [vmem:[%s9982_s3 + $0x8] sm:$0xff] }
  0x3a   :  { %6463 = vmatprep.subr.bf16.mxu0 %v7334_v53  ;;  %6435 = vmatpush1.bf16.msra.mxu1 %v6434_v54  ;;  %v159_v52 = vshrl.u32 %v158_v49, 7  ;;  %v1204_v34 = vld [vmem:[%s9982_s3 + $0x18] sm:$0xff]  ;;  %v1203_v37 = vld [vmem:[%s9982_s3 + $0x10] sm:$0xff]  ;;  %v1206_v39 = vld [vmem:[%s9982_s3 + $0x28] sm:$0xff] }
  0x3b   :  { %6436 = vmatprep.subr.bf16.mxu1 %v7334_v53  ;;  %v6515_v35 = vpack.c.bf16 %v1204_v34, %v1202_v33  ;;  %v1208_v40 = vld [vmem:[%s9982_s3 + $0x38] sm:$0xff]  ;;  %v1207_v43 = vld [vmem:[%s9982_s3 + $0x30] sm:$0xff] }
  0x3c   :  { %v7837_v54 = vsub.s32 0, %v159_v52  ;;  %v7842_v56 = vsub.s32 1, %v159_v52  ;;  %v6519_v41 = vpack.c.bf16 %v1208_v40, %v1206_v39  ;;  %v1211_v49 = vld [vmem:[%s9982_s3 + $0x50] sm:$0xff]  ;;  %v1216_v52 = vld [vmem:[%s9982_s3 + $0x78] sm:$0xff] }
  0x3d   :  { %6465 = vmatpush1.bf16.msra.mxu0 %v6464_v57  ;;  %v1752_v39 = vld [vmem:[%s9986_s7 + $0x10] sm:$0xff] }
  0x3e   :  { %6466 = vmatprep.subr.bf16.mxu0 %v7334_v53  ;;  %6438 = vmatpush1.bf16.msra.mxu1 %v6437_v60  ;;  %v161_v57 = vrot.slane %v45_v55, %v7837_v54  ;;  %v165_v58 = vrot.slane %v45_v55, %v7842_v56  ;;  %v5621_v5 = vld [vmem:[%s9979_s0 + $0x34] sm:$0xff] }
  0x3f   :  { %6439 = vmatprep.subr.bf16.mxu1 %v7334_v53 }
  0x41   :  { %6468 = vmatpush1.bf16.msra.mxu0 %v6467_v63 }
  0x42   :  { %6469 = vmatprep.subr.bf16.mxu0 %v7334_v53  ;;  %6441 = vmatpush1.bf16.msra.mxu1 %v6440_v2 }
  0x43   :  { %6442 = vmatprep.subr.bf16.mxu1 %v7334_v53 }
  0x45   :  { %6471 = vmatpush1.bf16.msra.mxu0 %v6470_v6 }
  0x46   :  { %6472 = vmatprep.subr.bf16.mxu0 %v7334_v53  ;;  %6444 = vmatpush1.bf16.msra.mxu1 %v6443_v10 }
  0x47   :  { %6445 = vmatprep.subr.bf16.mxu1 %v7334_v53 }
  0x49   :  { %6474 = vmatpush1.bf16.msra.mxu0 %v6473_v13 }
  0x4a   :  { %6475 = vmatprep.subr.bf16.mxu0 %v7334_v53  ;;  %6447 = vmatpush1.bf16.msra.mxu1 %v6446_v16 }
  0x4b   :  { %6448 = vmatprep.subr.bf16.mxu1 %v7334_v53 }
  0x4d   :  { %6477 = vmatpush1.bf16.msra.mxu0 %v6476_v17 }
  0x4e   :  { %6478 = vmatprep.subr.bf16.mxu0 %v7334_v53  ;;  %6450 = vmatpush1.bf16.msra.mxu1 %v6449_v36  ;;  %v1201_v36 = vld [vmem:[%s9982_s3] sm:$0xff] }
  0x4f   :  { %6451 = vmatprep.subr.bf16.mxu1 %v7334_v53 }
  0x51   :  { %6480 = vmatpush1.bf16.msra.mxu0 %v6479_v20 }
  0x52   :  { %6481 = vmatprep.subr.bf16.mxu0 %v7334_v53  ;;  %6453 = vmatpush1.bf16.msra.mxu1 %v6452_v42  ;;  %v1205_v42 = vld [vmem:[%s9982_s3 + $0x20] sm:$0xff] }
  0x55   :  { %6483 = vmatpush1.bf16.msra.mxu0 %v6482_v23 }
  0x56   :  { %6484 = vmatprep.subr.bf16.mxu0 %v7334_v53 }
  0x59   :  { %6486 = vmatpush1.bf16.msra.mxu0 %v6485_v26 }
  0x5a   :  { %6487 = vmatprep.subr.bf16.mxu0 %v7334_v53 }
  0x5d   :  { %6489 = vmatpush1.bf16.msra.mxu0 %v6488_v29 }
  0x5e   :  { %6490 = vmatprep.subr.bf16.mxu0 %v7334_v53 }
  0x61   :  { %6492 = vmatpush1.bf16.msra.mxu0 %v6491_v32  ;;  %v5368_v32 = vld [vmem:[%s9985_s6 + $0x18] sm:$0xf] }
  0x62   :  { %6493 = vmatprep.subr.bf16.mxu0 %v7334_v53 }
  0x65   :  { %6495 = vmatpush1.bf16.msra.mxu0 %v6494_v38  ;;  %v6517_v38 = vpack.c.bf16 %v1203_v37, %v1201_v36  ;;  %v1750_v37 = vld [vmem:[%s9986_s7] sm:$0xff] }
  0x66   :  { %6496 = vmatprep.subr.bf16.mxu0 %v7334_v53 }
  0x69   :  { %6498 = vmatpush1.bf16.msra.mxu0 %v6497_v44  ;;  %v6521_v44 = vpack.c.bf16 %v1207_v43, %v1205_v42  ;;  %v5376_v42 = vld [vmem:[%s9982_s3 + $0xf0] sm:$0xff]  ;;  %v5378_v43 = vld [vmem:[%s9982_s3 + $0x100] sm:$0xff] }
  0x6a   :  { %6655 = vmatprep.subr.bf16.mxu0 %v7334_v53 }
  0xe6   :  { %v140_v45 = vpop.f32.mrb[0].mxu1 }
  0xe7   :  { %v142_v46 = vpop.f32.mrb[1].mxu1  ;;  %v168_v59 = vadd.f32 %v161_v57, %v140_v45  ;;  %v1210_v45 = vld [vmem:[%s9982_s3 + $0x48] sm:$0xff] }
  0xe8   :  { %v169_v60 = vadd.f32 %v165_v58, %v142_v46  ;;  %v1212_v46 = vld [vmem:[%s9982_s3 + $0x58] sm:$0xff] }
  0xea   :  { %v146_v47 = vpop.f32.mrb[2].mxu1 }
  0xeb   :  { %v148_v48 = vpop.f32.mrb[3].mxu1  ;;  %v170_v63 = vadd.f32 %v161_v57, %v146_v47  ;;  %v6523_v47 = vpack.c.bf16 %v1212_v46, %v1210_v45  ;;  %v5383_v45 = vld [vmem:[%s9982_s3 + $0x128] sm:$0xff] }
  0xec   :  { %v171_v2 = vadd.f32 %v165_v58, %v148_v48  ;;  %v1209_v48 = vld [vmem:[%s9982_s3 + $0x40] sm:$0xff] }
  0xee   :  { %v152_v50 = vpop.f32.mrb[4].mxu1 }
  0xef   :  { %v154_v51 = vpop.f32.mrb[5].mxu1  ;;  %v172_v8 = vadd.f32 %v161_v57, %v152_v50  ;;  %v6525_v50 = vpack.c.bf16 %v1211_v49, %v1209_v48  ;;  %v1213_v57 = vld [vmem:[%s9982_s3 + $0x60] sm:$0xff]  ;;  %v1755_v48 = vld [vmem:[%s9986_s7 + $0x28] sm:$0xff]  ;;  %v6545_v49 = vpack.c.bf16 %v5378_v43, %v5376_v42 }
  0xf0   :  { %v173_v10 = vadd.f32 %v165_v58, %v154_v51  ;;  %v1214_v51 = vld [vmem:[%s9982_s3 + $0x68] sm:$0xff]  ;;  %v1215_v58 = vld [vmem:[%s9982_s3 + $0x70] sm:$0xff] }
  0xf1   :  { %v6527_v55 = vpack.c.bf16 %v1216_v52, %v1214_v51  ;;  %v5380_v51 = vld [vmem:[%s9982_s3 + $0x110] sm:$0xff]  ;;  %v5382_v52 = vld [vmem:[%s9982_s3 + $0x120] sm:$0xff]  ;;  %v1767_v42 = vld [vmem:[%s9986_s7 + $0x88] sm:$0xff] }
 0x103   :  { %v615_v61 = vpop.f32.mrb[0].mxu0 }
 0x104   :  { %v7210_v62 = vadd.f32 %v615_v61, %v168_v59  ;;  %v617_v0 = vpop.f32.mrb[1].mxu0  ;;  %v6529_v59 = vpack.c.bf16 %v1215_v58, %v1213_v57  ;;  %v1220_v61 = vld [vmem:[%s9982_s3 + $0x98] sm:$0xff]  ;;  %v5387_v58 = vld [vmem:[%s9982_s3 + $0x148] sm:$0xff] }
 0x105   :  { %v7212_v1 = vadd.f32 %v617_v0, %v169_v60  ;;  %v1218_v60 = vld [vmem:[%s9982_s3 + $0x88] sm:$0xff]  ;;  %v1219_v0 = vld [vmem:[%s9982_s3 + $0x90] sm:$0xff]  ;;  %v5385_v57 = vld [vmem:[%s9982_s3 + $0x138] sm:$0xff] }
 0x107   :  { %v621_v3 = vpop.f32.mrb[2].mxu0  ;;  %5329 = vmatprep.mubr.msk.f32.mxu1 %vm668_vm4, %v7212_v1  ;;  %5362 = vmatprep.mubr.msk.f32.mxu0 %vm668_vm4, %v7212_v1 }
 0x108   :  { %v7214_v4 = vadd.f32 %v621_v3, %v170_v63  ;;  %v623_v6 = vpop.f32.mrb[3].mxu0  ;;  %743 = vmatmul.mubr.f32.vlgmr.msra.gmra.mrb[6].mxu1 %v7210_v62  ;;  %854 = vmatmul.mubr.f32.vlgmr.msra.gmra.mrb[6].mxu0 %v7210_v62  ;;  %v6531_v62 = vpack.c.bf16 %v1220_v61, %v1218_v60  ;;  %v1217_v63 = vld [vmem:[%s9982_s3 + $0x80] sm:$0xff]  ;;  %v1224_v3 = vld [vmem:[%s9982_s3 + $0xb8] sm:$0xff]  ;;  %v1756_v60 = vld [vmem:[%s9986_s7 + $0x30] sm:$0xff] }
 0x109   :  { %v7216_v9 = vadd.f32 %v623_v6, %v171_v2  ;;  %v6533_v1 = vpack.c.bf16 %v1219_v0, %v1217_v63  ;;  %v1222_v2 = vld [vmem:[%s9982_s3 + $0xa8] sm:$0xff]  ;;  %v1221_v6 = vld [vmem:[%s9982_s3 + $0xa0] sm:$0xff]  ;;  %v1757_v61 = vld [vmem:[%s9986_s7 + $0x38] sm:$0xff]  ;;  %v6551_v63 = vpack.c.bf16 %v5387_v58, %v5385_v57 }
 0x10a   :  { %v5384_v0 = vld [vmem:[%s9982_s3 + $0x130] sm:$0xff] }
 0x10b   :  { %v627_v11 = vpop.f32.mrb[4].mxu0  ;;  %5330 = vmatprep.mubr.msk.f32.mxu1 %vm668_vm4, %v7216_v9  ;;  %5363 = vmatprep.mubr.msk.f32.mxu0 %vm668_vm4, %v7216_v9 }
 0x10c   :  { %v7218_v12 = vadd.f32 %v627_v11, %v172_v8  ;;  %v629_v13 = vpop.f32.mrb[5].mxu0  ;;  %748 = vmatmul.mubr.f32.gmra.mrb[8].mxu1 %v7214_v4  ;;  %859 = vmatmul.mubr.f32.gmra.mrb[8].mxu0 %v7214_v4  ;;  %v6535_v4 = vpack.c.bf16 %v1224_v3, %v1222_v2  ;;  %v1223_v8 = vld [vmem:[%s9982_s3 + $0xb0] sm:$0xff]  ;;  %v1228_v11 = vld [vmem:[%s9982_s3 + $0xd8] sm:$0xff]  ;;  %v5391_v3 = vld [vmem:[%s9982_s3 + $0x168] sm:$0xff] }
 0x10d   :  { %v7220_v14 = vadd.f32 %v629_v13, %v173_v10  ;;  %v6537_v9 = vpack.c.bf16 %v1223_v8, %v1221_v6  ;;  %v1226_v10 = vld [vmem:[%s9982_s3 + $0xc8] sm:$0xff]  ;;  %v1225_v13 = vld [vmem:[%s9982_s3 + $0xc0] sm:$0xff]  ;;  %v5389_v2 = vld [vmem:[%s9982_s3 + $0x158] sm:$0xff] }
 0x10e   :  { %v1758_v6 = vld [vmem:[%s9986_s7 + $0x40] sm:$0xff]  ;;  %v1759_v8 = vld [vmem:[%s9986_s7 + $0x48] sm:$0xff] }
 0x10f   :  { %5331 = vmatprep.mubr.msk.f32.mxu1 %vm668_vm4, %v7220_v14  ;;  %5364 = vmatprep.mubr.msk.f32.mxu0 %vm668_vm4, %v7220_v14  ;;  %v1227_v14 = vld [vmem:[%s9982_s3 + $0xd0] sm:$0xff] }
 0x110   :  { %753 = vmatmul.mubr.f32.gmra.mrb[10].mxu1 %v7218_v12  ;;  %864 = vmatmul.mubr.f32.gmra.mrb[10].mxu0 %v7218_v12  ;;  %v6539_v12 = vpack.c.bf16 %v1228_v11, %v1226_v10  ;;  %v6555_v10 = vpack.c.bf16 %v5391_v3, %v5389_v2  ;;  %v5388_v11 = vld [vmem:[%s9982_s3 + $0x150] sm:$0xff]  ;;  %v5415_v2 = vld [vmem:[%s9982_s3 + $0x220] sm:$0xff] }
 0x111   :  { %6035 = vmatprep.mubr.msk.f32.mxu1 %vm871_vm5, %v869_v15  ;;  %v5417_v3 = vld [vmem:[%s9982_s3 + $0x230] sm:$0xff] }
 0x1db   :  { %v744_v16 = vpop.f32.mrb[6].mxu1  ;;  %v855_v17 = vpop.f32.mrb[6].mxu0 }
 0x1dc   :  { %v746_v18 = vpop.f32.mrb[7].mxu1  ;;  %v857_v19 = vpop.f32.mrb[7].mxu0 }
 0x1dd   :  { %v5379_v18 = vld [vmem:[%s9982_s3 + $0x108] sm:$0xff]  ;;  %v1229_v19 = vld [vmem:[%s9982_s3 + $0xe0] sm:$0xff] }
 0x1df   :  { %v749_v20 = vpop.f32.mrb[8].mxu1  ;;  %v860_v21 = vpop.f32.mrb[8].mxu0 }
 0x1e0   :  { %v6499_v22 = vpack.c.bf16 %v749_v20, %v744_v16  ;;  %v6507_v23 = vpack.c.bf16 %v860_v21, %v855_v17  ;;  %v751_v24 = vpop.f32.mrb[9].mxu1  ;;  %v862_v25 = vpop.f32.mrb[9].mxu0  ;;  %v1230_v16 = vld [vmem:[%s9982_s3 + $0xe8] sm:$0xff]  ;;  %v5377_v17 = vld [vmem:[%s9982_s3 + $0xf8] sm:$0xff] }
 0x1e1   :  { %v6543_v20 = vpack.c.bf16 %v5379_v18, %v5377_v17  ;;  %v1761_v17 = vld [vmem:[%s9986_s7 + $0x58] sm:$0xff] }
 0x1e2   :  { %6500 = vmatprep.subr.bf16.mxu1 %v6499_v22 }
 0x1e3   :  { %v754_v26 = vpop.f32.mrb[10].mxu1  ;;  %v865_v27 = vpop.f32.mrb[10].mxu0  ;;  %6502 = vmatpush3.bf16.msra.mxu1 %v6499_v22 }
 0x1e4   :  { %v756_v28 = vpop.f32.mrb[11].mxu1  ;;  %v867_v29 = vpop.f32.mrb[11].mxu0  ;;  %6033 = vmatprep.subr.mxu1 %v754_v26 }
 0x1e7   :  { %6034 = vmatpush3.msra.mxu1 %v754_v26 }
 0x1e8   :  { %6036 = vmatmul.mubr.msk.f32.vlgmr.msra.gmra.mrb[12].mxu1 %vm871_vm5, %v870_v30  ;;  %6504 = vmatprep.subr.bf16.mxu1 %v6499_v22 }
 0x1e9   :  { %6506 = vmatpush3.bf16.msra.mxu1 %v6499_v22  ;;  %6044 = vmatprep.mubr.msk.f32.mxu1 %vm871_vm5, %v5367_v31 }
 0x1ea   :  { %6042 = vmatprep.subr.mxu1 %v754_v26 }
 0x1ed   :  { %6043 = vmatpush3.msra.mxu1 %v754_v26 }
 0x1ee   :  { %6045 = vmatmul.mubr.msk.f32.vlgmr.msra.gmra.mrb[14].mxu1 %vm871_vm5, %v5368_v32  ;;  %6508 = vmatprep.subr.bf16.mxu1 %v6507_v23 }
 0x1ef   :  { %6510 = vmatpush3.bf16.msra.mxu1 %v6507_v23  ;;  %6053 = vmatprep.mubr.msk.f32.mxu1 %vm871_vm5, %v869_v15  ;;  %v6541_v15 = vpack.c.bf16 %v1227_v14, %v1225_v13  ;;  %v5393_v13 = vld [vmem:[%s9982_s3 + $0x178] sm:$0xff]  ;;  %v5395_v14 = vld [vmem:[%s9982_s3 + $0x188] sm:$0xff] }
 0x1f0   :  { %6051 = vmatprep.subr.mxu1 %v865_v27 }
 0x1f3   :  { %6052 = vmatpush3.msra.mxu1 %v865_v27 }
 0x1f4   :  { %6054 = vmatmul.mubr.msk.f32.vlgmr.msra.gmra.mrb[16].mxu1 %vm871_vm5, %v870_v30  ;;  %6512 = vmatprep.subr.bf16.mxu1 %v6507_v23 }
 0x1f5   :  { %6514 = vmatpush3.bf16.msra.mxu1 %v6507_v23  ;;  %6062 = vmatprep.mubr.msk.f32.mxu1 %vm871_vm5, %v5367_v31 }
 0x1f6   :  { %6060 = vmatprep.subr.mxu1 %v865_v27 }
 0x1f9   :  { %6061 = vmatpush3.msra.mxu1 %v865_v27 }
 0x1fa   :  { %6063 = vmatmul.mubr.msk.f32.vlgmr.msra.gmra.mrb[18].mxu1 %vm871_vm5, %v5368_v32  ;;  %6516 = vmatprep.subr.bf16.mxu1 %v6515_v35 }
 0x1fb   :  { %1298 = vmatprep.mubr.f32.mxu1 %v7333_v7  ;;  %6518 = vmatpush1.bf16.msra.mxu1 %v6517_v38  ;;  %v1751_v38 = vld [vmem:[%s9986_s7 + $0x8] sm:$0xff] }
 0x1fc   :  { %6520 = vmatprep.subr.bf16.mxu1 %v6519_v41  ;;  %v6656_v40 = vpack.c.bf16 %v1751_v38, %v1750_v37  ;;  %v1753_v41 = vld [vmem:[%s9986_s7 + $0x18] sm:$0xff]  ;;  %v5400_v38 = vld [vmem:[%s9982_s3 + $0x1b0] sm:$0xff] }
 0x1fd   :  { %v6659_v46 = vpack.c.bf16 %v1753_v41, %v1752_v39  ;;  %v5402_v39 = vld [vmem:[%s9982_s3 + $0x1c0] sm:$0xff] }
 0x1fe   :  { %6657 = vmatpush1.bf16.msra.mxu0 %v6656_v40  ;;  %v1766_v41 = vld [vmem:[%s9986_s7 + $0x80] sm:$0xff]  ;;  %v6569_v43 = vpack.c.bf16 %v5402_v39, %v5400_v38 }
 0x1ff   :  { %6522 = vmatpush1.bf16.msra.mxu1 %v6521_v44  ;;  %v5381_v44 = vld [vmem:[%s9982_s3 + $0x118] sm:$0xff]  ;;  %6658 = vmatprep.subr.bf16.mxu0 %v7334_v53  ;;  %v5435_v38 = vld [vmem:[%s9982_s3 + $0x2c0] sm:$0xff] }
 0x200   :  { %6524 = vmatprep.subr.bf16.mxu1 %v6523_v47  ;;  %v1754_v47 = vld [vmem:[%s9986_s7 + $0x20] sm:$0xff] }
 0x202   :  { %6660 = vmatpush1.bf16.msra.mxu0 %v6659_v46  ;;  %v5410_v46 = vld [vmem:[%s9982_s3 + $0x1f8] sm:$0xff] }
 0x203   :  { %6526 = vmatpush1.bf16.msra.mxu1 %v6525_v50  ;;  %v6547_v50 = vpack.c.bf16 %v5383_v45, %v5381_v44  ;;  %6661 = vmatprep.subr.bf16.mxu0 %v7334_v53  ;;  %v5405_v44 = vld [vmem:[%s9982_s3 + $0x1d8] sm:$0xff]  ;;  %v5408_v45 = vld [vmem:[%s9982_s3 + $0x1e8] sm:$0xff] }
 0x204   :  { %6528 = vmatprep.subr.bf16.mxu1 %v6527_v55 }
 0x207   :  { %6530 = vmatpush1.bf16.msra.mxu1 %v6529_v59  ;;  %v6662_v59 = vpack.c.bf16 %v1755_v48, %v1754_v47  ;;  %v6680_v47 = vpack.c.bf16 %v1767_v42, %v1766_v41  ;;  %v5407_v48 = vld [vmem:[%s9982_s3 + $0x1e0] sm:$0xff]  ;;  %v5442_v42 = vld [vmem:[%s9982_s3 + $0x2f0] sm:$0xff] }
 0x208   :  { %6532 = vmatprep.subr.bf16.mxu1 %v6531_v62  ;;  %v6549_v62 = vpack.c.bf16 %v5382_v52, %v5380_v51  ;;  %v5414_v51 = vld [vmem:[%s9982_s3 + $0x218] sm:$0xff]  ;;  %v5404_v52 = vld [vmem:[%s9982_s3 + $0x1d0] sm:$0xff] }
 0x209   :  { %6663 = vmatpush1.bf16.msra.mxu0 %v6662_v59  ;;  %v5411_v59 = vld [vmem:[%s9982_s3 + $0x200] sm:$0xff] }
 0x20a   :  { %6664 = vmatprep.subr.bf16.mxu0 %v7334_v53 }
 0x20b   :  { %6534 = vmatpush1.bf16.msra.mxu1 %v6533_v1  ;;  %v5386_v1 = vld [vmem:[%s9982_s3 + $0x140] sm:$0xff] }
 0x20c   :  { %6536 = vmatprep.subr.bf16.mxu1 %v6535_v4  ;;  %v6665_v4 = vpack.c.bf16 %v1757_v61, %v1756_v60  ;;  %v5413_v60 = vld [vmem:[%s9982_s3 + $0x210] sm:$0xff] }
 0x20e   :  { %6666 = vmatpush1.bf16.msra.mxu0 %v6665_v4  ;;  %v5420_v4 = vld [vmem:[%s9982_s3 + $0x248] sm:$0xff] }
 0x20f   :  { %6538 = vmatpush1.bf16.msra.mxu1 %v6537_v9  ;;  %v6553_v9 = vpack.c.bf16 %v5386_v1, %v5384_v0  ;;  %6667 = vmatprep.subr.bf16.mxu0 %v7334_v53  ;;  %v6577_v0 = vpack.c.bf16 %v5413_v60, %v5411_v59  ;;  %v5452_v59 = vld [vmem:[%s9982_s3 + $0x340] sm:$0xff]  ;;  %v5455_v60 = vld [vmem:[%s9982_s3 + $0x358] sm:$0xff] }
 0x210   :  { %6540 = vmatprep.subr.bf16.mxu1 %v6539_v12  ;;  %v5390_v12 = vld [vmem:[%s9982_s3 + $0x160] sm:$0xff] }
 0x211   :  { %v6557_v18 = vpack.c.bf16 %v5390_v12, %v5388_v11  ;;  %v5421_v11 = vld [vmem:[%s9982_s3 + $0x250] sm:$0xff]  ;;  %v5424_v12 = vld [vmem:[%s9982_s3 + $0x268] sm:$0xff] }
 0x213   :  { %6542 = vmatpush1.bf16.msra.mxu1 %v6541_v15  ;;  %v6668_v15 = vpack.c.bf16 %v1759_v8, %v1758_v6  ;;  %v5422_v6 = vld [vmem:[%s9982_s3 + $0x258] sm:$0xff]  ;;  %v6581_v8 = vpack.c.bf16 %v5417_v3, %v5415_v2  ;;  %v5461_v3 = vld [vmem:[%s9982_s3 + $0x388] sm:$0xff] }
 0x214   :  { %1262 = vmatprep.subr.mxu1 %v1230_v16  ;;  %v1760_v16 = vld [vmem:[%s9986_s7 + $0x50] sm:$0xff]  ;;  %v5459_v2 = vld [vmem:[%s9982_s3 + $0x378] sm:$0xff] }
 0x215   :  { %6669 = vmatpush1.bf16.msra.mxu0 %v6668_v15 }
 0x216   :  { %6670 = vmatprep.subr.bf16.mxu0 %v7334_v53 }
 0x217   :  { %1263 = vmatpush1.msra.mxu1 %v1229_v19  ;;  %v6559_v19 = vpack.c.bf16 %v5395_v14, %v5393_v13  ;;  %v5426_v13 = vld [vmem:[%s9982_s3 + $0x278] sm:$0xff] }
 0x218   :  { %6544 = vmatprep.subr.bf16.mxu1 %v6543_v20  ;;  %v5392_v20 = vld [vmem:[%s9982_s3 + $0x170] sm:$0xff]  ;;  %v6587_v15 = vpack.c.bf16 %v5426_v13, %v5424_v12 }
 0x2bb   :  { %v6037_v21 = vpop.f32.mrb[12].mxu1 }
 0x2bc   :  { %v944_v22 = vpop.f32.mrb[13].mxu1 }
 0x2c1   :  { %v6046_v23 = vpop.f32.mrb[14].mxu1 }
 0x2c2   :  { %v1038_v24 = vmax.f32 %v6037_v21, %v6046_v23  ;;  %v1028_v25 = vpop.f32.mrb[15].mxu1  ;;  %v5394_v21 = vld [vmem:[%s9982_s3 + $0x180] sm:$0xff]  ;;  %v5399_v23 = vld [vmem:[%s9982_s3 + $0x1a8] sm:$0xff] }
 0x2c3   :  { %v1037_v26 = vmax.f32 %v944_v22, %v1028_v25  ;;  %v5397_v22 = vld [vmem:[%s9982_s3 + $0x198] sm:$0xff]  ;;  %v1762_v25 = vld [vmem:[%s9986_s7 + $0x60] sm:$0xff] }
 0x2c7   :  { %v6055_v27 = vpop.f32.mrb[16].mxu1 }
 0x2c8   :  { %v1105_v28 = vpop.f32.mrb[17].mxu1 }
 0x2cd   :  { %v6064_v29 = vpop.f32.mrb[18].mxu1 }
 0x2ce   :  { %v1190_v30 = vmax.f32 %v6055_v27, %v6064_v29  ;;  %v1180_v31 = vpop.f32.mrb[19].mxu1  ;;  %v6561_v27 = vpack.c.bf16 %v5394_v21, %v5392_v20  ;;  %v5396_v29 = vld [vmem:[%s9982_s3 + $0x190] sm:$0xff] }
 0x2cf   :  { %v1189_v32 = vmax.f32 %v1105_v28, %v1180_v31  ;;  %v6563_v28 = vpack.c.bf16 %v5399_v23, %v5397_v22  ;;  %v5401_v31 = vld [vmem:[%s9982_s3 + $0x1b8] sm:$0xff]  ;;  %v5427_v22 = vld [vmem:[%s9982_s3 + $0x280] sm:$0xff]  ;;  %v5429_v23 = vld [vmem:[%s9982_s3 + $0x290] sm:$0xff] }
 0x2d0   :  { %v1192_v33 = vmax.f32 %v1038_v24, %v1190_v30  ;;  %v6671_v24 = vpack.c.bf16 %v1761_v17, %v1760_v16  ;;  %v5398_v30 = vld [vmem:[%s9982_s3 + $0x1a0] sm:$0xff]  ;;  %v5425_v17 = vld [vmem:[%s9982_s3 + $0x270] sm:$0xff] }
 0x2d1   :  { %v1191_v34 = vmax.f32 %v1037_v26, %v1189_v32  ;;  %v1763_v26 = vld [vmem:[%s9986_s7 + $0x68] sm:$0xff]  ;;  %v5423_v16 = vld [vmem:[%s9982_s3 + $0x260] sm:$0xff] }
 0x2d2   :  { %v1194_v35 = vmax.f32 %v1192_v33, 0.0  ;;  %v5403_v32 = vld [vmem:[%s9982_s3 + $0x1c8] sm:$0xff]  ;;  %6672 = vmatpush1.bf16.msra.mxu0 %v6671_v24  ;;  %v6674_v33 = vpack.c.bf16 %v1763_v26, %v1762_v25  ;;  %v6589_v20 = vpack.c.bf16 %v5425_v17, %v5423_v16  ;;  %v5434_v25 = vld [vmem:[%s9982_s3 + $0x2b8] sm:$0xff]  ;;  %v6593_v26 = vpack.c.bf16 %v5429_v23, %v5427_v22 }
 0x2d3   :  { %v1193_v36 = vmax.f32 %v1191_v34, 0.0  ;;  %6673 = vmatprep.subr.bf16.mxu0 %v7334_v53  ;;  %v1764_v34 = vld [vmem:[%s9986_s7 + $0x70] sm:$0xff]  ;;  %v6567_v37 = vpack.c.bf16 %v5403_v32, %v5401_v31  ;;  %v5432_v24 = vld [vmem:[%s9982_s3 + $0x2a8] sm:$0xff]  ;;  %v5439_v32 = vld [vmem:[%s9982_s3 + $0x2d8] sm:$0xff] }
 0x2d4   :  { %1198 = vst.msk [vmem:[#allocation2 + $0x8] sm:$0xf] %vm1197_vm6, %v1194_v35  ;;  %v1765_v35 = vld [vmem:[%s9986_s7 + $0x78] sm:$0xff]  ;;  %v5436_v31 = vld [vmem:[%s9982_s3 + $0x2c8] sm:$0xff] }
 0x2d5   :  { %1196 = vst.msk [vmem:[#allocation2] sm:$0xff] %vm1195_vm7, %v1193_v36  ;;  %v6565_v36 = vpack.c.bf16 %v5398_v30, %v5396_v29  ;;  %v6677_v40 = vpack.c.bf16 %v1765_v35, %v1764_v34  ;;  %v5433_v29 = vld [vmem:[%s9982_s3 + $0x2b0] sm:$0xff]  ;;  %v5440_v35 = vld [vmem:[%s9982_s3 + $0x2e0] sm:$0xff]  ;;  %v5467_v17 = vld [vmem:[%s9982_s3 + $0x3b8] sm:$0xff] }
 0x2d6   :  { %6675 = vmatpush1.bf16.msra.mxu0 %v6674_v33  ;;  %v5441_v33 = vld [vmem:[%s9982_s3 + $0x2e8] sm:$0xff]  ;;  %v5438_v34 = vld [vmem:[%s9982_s3 + $0x2d0] sm:$0xff]  ;;  %v5476_v23 = vld [vmem:[%s9982_s3 + $0x3f8] sm:$0xff] }
 0x2d7   :  { %6676 = vmatprep.subr.bf16.mxu0 %v7334_v53  ;;  %v6599_v39 = vpack.c.bf16 %v5441_v33, %v5439_v32  ;;  %v5474_v22 = vld [vmem:[%s9982_s3 + $0x3e8] sm:$0xff]  ;;  %v5480_v32 = vld [vmem:[%s9982_s3 + $0x418] sm:$0xff] }
 0x2da   :  { %6678 = vmatpush1.bf16.msra.mxu0 %v6677_v40  ;;  %v6601_v40 = vpack.c.bf16 %v5440_v35, %v5438_v34  ;;  %v5477_v35 = vld [vmem:[%s9982_s3 + $0x400] sm:$0xff] }
 0x2db   :  { %6679 = vmatprep.subr.bf16.mxu0 %v7334_v53 }
 0x2dc   :  { %v1200_v55 = vld [vmem:[#allocation2] sm:$0xff] }
 0x2dd   :  { %5375 = vmatmul.mubr.msk.f32.vlgmr.msra.gmra.mrb[20].mxu1 %vm1195_vm7, %v1200_v55  ;;  %v6571_v55 = vpack.c.bf16 %v5410_v46, %v5408_v45  ;;  %v1318_v61 = vld [vmem:[#allocation2 + $0x1] sm:$0xff]  ;;  %v5447_v45 = vld [vmem:[%s9982_s3 + $0x318] sm:$0xff] }
 0x2de   :  { %6546 = vmatpush1.bf16.msra.mxu1 %v6545_v49  ;;  %1417 = vmatprep.mubr.f32.mxu1 %v7333_v7  ;;  %v5409_v49 = vld [vmem:[%s9982_s3 + $0x1f0] sm:$0xff]  ;;  %v5449_v46 = vld [vmem:[%s9982_s3 + $0x328] sm:$0xff] }
 0x2df   :  { %6548 = vmatprep.subr.bf16.mxu1 %v6547_v50  ;;  %v5412_v50 = vld [vmem:[%s9982_s3 + $0x208] sm:$0xff]  ;;  %v6573_v57 = vpack.c.bf16 %v5409_v49, %v5407_v48  ;;  %6681 = vmatpush1.bf16.msra.mxu0 %v6680_v47  ;;  %v6607_v48 = vpack.c.bf16 %v5449_v46, %v5447_v45  ;;  %v5446_v49 = vld [vmem:[%s9982_s3 + $0x310] sm:$0xff] }
 0x2e0   :  { %v6575_v58 = vpack.c.bf16 %v5414_v51, %v5412_v50  ;;  %6682 = vmatprep.subr.bf16.mxu0 %v7334_v53  ;;  %v5448_v50 = vld [vmem:[%s9982_s3 + $0x320] sm:$0xff]  ;;  %v5451_v51 = vld [vmem:[%s9982_s3 + $0x338] sm:$0xff] }
 0x2e2   :  { %6550 = vmatpush1.bf16.msra.mxu1 %v6549_v62  ;;  %v5416_v62 = vld [vmem:[%s9982_s3 + $0x228] sm:$0xff] }
 0x2e3   :  { %6552 = vmatprep.subr.bf16.mxu1 %v6551_v63  ;;  %v5418_v63 = vld [vmem:[%s9982_s3 + $0x238] sm:$0xff] }
 0x2e4   :  { %v6579_v1 = vpack.c.bf16 %v5418_v63, %v5416_v62 }
 0x2e6   :  { %6554 = vmatpush1.bf16.msra.mxu1 %v6553_v9  ;;  %v6583_v9 = vpack.c.bf16 %v5422_v6, %v5420_v4  ;;  %v6619_v6 = vpack.c.bf16 %v5461_v3, %v5459_v2  ;;  %v5497_v2 = vld [vmem:[%s9982_s3 + $0x4a0] sm:$0xff] }
 0x2e7   :  { %6556 = vmatprep.subr.bf16.mxu1 %v6555_v10  ;;  %v5419_v10 = vld [vmem:[%s9982_s3 + $0x240] sm:$0xff] }
 0x2e8   :  { %v6585_v14 = vpack.c.bf16 %v5421_v11, %v5419_v10  ;;  %v5463_v10 = vld [vmem:[%s9982_s3 + $0x398] sm:$0xff]  ;;  %v5465_v11 = vld [vmem:[%s9982_s3 + $0x3a8] sm:$0xff] }
 0x2e9   :  { %v6623_v13 = vpack.c.bf16 %v5465_v11, %v5463_v10  ;;  %v1642_v3 = vld [vmem:[#allocation2 + $0x4] sm:$0xff] }
 0x2ea   :  { %6558 = vmatpush1.bf16.msra.mxu1 %v6557_v18  ;;  %v5428_v18 = vld [vmem:[%s9982_s3 + $0x288] sm:$0xff] }
 0x2eb   :  { %6560 = vmatprep.subr.bf16.mxu1 %v6559_v19  ;;  %v5430_v19 = vld [vmem:[%s9982_s3 + $0x298] sm:$0xff] }
 0x2ec   :  { %v6591_v21 = vpack.c.bf16 %v5430_v19, %v5428_v18  ;;  %v5470_v18 = vld [vmem:[%s9982_s3 + $0x3c8] sm:$0xff]  ;;  %v5472_v19 = vld [vmem:[%s9982_s3 + $0x3d8] sm:$0xff] }
 0x2ee   :  { %6562 = vmatpush1.bf16.msra.mxu1 %v6561_v27  ;;  %v6595_v27 = vpack.c.bf16 %v5434_v25, %v5432_v24  ;;  %v5466_v24 = vld [vmem:[%s9982_s3 + $0x3b0] sm:$0xff]  ;;  %v6627_v25 = vpack.c.bf16 %v5472_v19, %v5470_v18 }
 0x2ef   :  { %6564 = vmatprep.subr.bf16.mxu1 %v6563_v28  ;;  %v5431_v28 = vld [vmem:[%s9982_s3 + $0x2a0] sm:$0xff]  ;;  %v5503_v19 = vld [vmem:[%s9986_s7 + $0xb0] sm:$0xff] }
 0x2f0   :  { %v6597_v30 = vpack.c.bf16 %v5433_v29, %v5431_v28  ;;  %v5473_v28 = vld [vmem:[%s9982_s3 + $0x3e0] sm:$0xff]  ;;  %v5475_v29 = vld [vmem:[%s9982_s3 + $0x3f0] sm:$0xff] }
 0x2f1   :  { %v6633_v33 = vpack.c.bf16 %v5475_v29, %v5473_v28  ;;  %v5509_v28 = vld [vmem:[%s9986_s7 + $0xe0] sm:$0xff]  ;;  %v5510_v29 = vld [vmem:[%s9986_s7 + $0xe8] sm:$0xff] }
 0x2f2   :  { %6566 = vmatpush1.bf16.msra.mxu1 %v6565_v36  ;;  %v5443_v36 = vld [vmem:[%s9982_s3 + $0x2f8] sm:$0xff] }
 0x2f3   :  { %6568 = vmatprep.subr.bf16.mxu1 %v6567_v37  ;;  %v5445_v37 = vld [vmem:[%s9982_s3 + $0x308] sm:$0xff] }
 0x2f4   :  { %v6603_v41 = vpack.c.bf16 %v5445_v37, %v5443_v36  ;;  %v5479_v36 = vld [vmem:[%s9982_s3 + $0x410] sm:$0xff]  ;;  %v5482_v37 = vld [vmem:[%s9982_s3 + $0x428] sm:$0xff] }
 0x2f6   :  { %6570 = vmatpush1.bf16.msra.mxu1 %v6569_v43  ;;  %v5444_v43 = vld [vmem:[%s9982_s3 + $0x300] sm:$0xff] }
 0x2f7   :  { %1381 = vmatprep.subr.mxu1 %v5405_v44  ;;  %v1426_v44 = vld [vmem:[#allocation2 + $0x2] sm:$0xff]  ;;  %v6605_v47 = vpack.c.bf16 %v5444_v43, %v5442_v42  ;;  %v5483_v42 = vld [vmem:[%s9982_s3 + $0x430] sm:$0xff] }
 0x2f8   :  { %v5486_v43 = vld [vmem:[%s9982_s3 + $0x448] sm:$0xff] }
 0x2fa   :  { %1382 = vmatpush1.msra.mxu1 %v5404_v52  ;;  %v5453_v52 = vld [vmem:[%s9982_s3 + $0x348] sm:$0xff] }
 0x2fb   :  { %5406 = vmatmul.mubr.msk.f32.vlgmr.msra.gmra.mrb[20].mxu1 %vm1195_vm7, %v1318_v61  ;;  %6572 = vmatprep.subr.bf16.mxu1 %v6571_v55  ;;  %v6609_v55 = vpack.c.bf16 %v5448_v50, %v5446_v49  ;;  %v5457_v61 = vld [vmem:[%s9982_s3 + $0x368] sm:$0xff]  ;;  %v5492_v50 = vld [vmem:[%s9982_s3 + $0x478] sm:$0xff] }
 0x2fc   :  { %6574 = vmatpush1.bf16.msra.mxu1 %v6573_v57  ;;  %1525 = vmatprep.mubr.f32.mxu1 %v7333_v7  ;;  %v6611_v57 = vpack.c.bf16 %v5453_v52, %v5451_v51  ;;  %v6615_v63 = vpack.c.bf16 %v5457_v61, %v5455_v60  ;;  %v5490_v49 = vld [vmem:[%s9982_s3 + $0x468] sm:$0xff] }
 0x2fd   :  { %6576 = vmatprep.subr.bf16.mxu1 %v6575_v58  ;;  %v5450_v58 = vld [vmem:[%s9982_s3 + $0x330] sm:$0xff]  ;;  %v6647_v52 = vpack.c.bf16 %v5492_v50, %v5490_v49  ;;  %v5523_v49 = vld [vmem:[%s9987_s8 + $0x4] sm:$0xf] }
 0x2fe   :  { %v6613_v62 = vpack.c.bf16 %v5452_v59, %v5450_v58  ;;  %v5494_v58 = vld [vmem:[%s9982_s3 + $0x488] sm:$0xff]  ;;  %v5496_v59 = vld [vmem:[%s9982_s3 + $0x498] sm:$0xff] }
 0x2ff   :  { %v6651_v61 = vpack.c.bf16 %v5496_v59, %v5494_v58  ;;  %v2235_v58 = vld [vmem:[%s9988_s9 + $0x10] sm:$0xff]  ;;  %v2236_v59 = vld [vmem:[%s9988_s9 + $0x18] sm:$0xff] }
 0x300   :  { %6578 = vmatpush1.bf16.msra.mxu1 %v6577_v0  ;;  %v5454_v0 = vld [vmem:[%s9982_s3 + $0x350] sm:$0xff] }
 0x301   :  { %6580 = vmatprep.subr.bf16.mxu1 %v6579_v1  ;;  %v5456_v1 = vld [vmem:[%s9982_s3 + $0x360] sm:$0xff] }
 0x302   :  { %v6617_v4 = vpack.c.bf16 %v5456_v1, %v5454_v0  ;;  %v5498_v1 = vld [vmem:[%s9982_s3 + $0x4a8] sm:$0xff] }
 0x304   :  { %6582 = vmatpush1.bf16.msra.mxu1 %v6581_v8  ;;  %v5458_v8 = vld [vmem:[%s9982_s3 + $0x370] sm:$0xff] }
 0x305   :  { %6584 = vmatprep.subr.bf16.mxu1 %v6583_v9  ;;  %v5460_v9 = vld [vmem:[%s9982_s3 + $0x380] sm:$0xff] }
 0x306   :  { %v6621_v12 = vpack.c.bf16 %v5460_v9, %v5458_v8  ;;  %v1199_v9 = vld [vmem:[%s9983_s4] sm:$0x3] }
 0x307   :  { %v1313_v10 = vrot.slane %v1199_v9, %v7842_v56  ;;  %v1309_v11 = vrot.slane %v1199_v9, %v7837_v54  ;;  %v2578_v9 = vld [vmem:[%s9990_s11 + $0x8] sm:$0xff] }
 0x308   :  { %6586 = vmatpush1.bf16.msra.mxu1 %v6585_v14  ;;  %v5462_v14 = vld [vmem:[%s9982_s3 + $0x390] sm:$0xff] }
 0x309   :  { %6588 = vmatprep.subr.bf16.mxu1 %v6587_v15  ;;  %v5464_v15 = vld [vmem:[%s9982_s3 + $0x3a0] sm:$0xff] }
 0x30a   :  { %v6625_v16 = vpack.c.bf16 %v5464_v15, %v5462_v14 }
 0x30c   :  { %6590 = vmatpush1.bf16.msra.mxu1 %v6589_v20  ;;  %v5469_v20 = vld [vmem:[%s9982_s3 + $0x3c0] sm:$0xff] }
 0x30d   :  { %6592 = vmatprep.subr.bf16.mxu1 %v6591_v21  ;;  %v5471_v21 = vld [vmem:[%s9982_s3 + $0x3d0] sm:$0xff] }
 0x310   :  { %6594 = vmatpush1.bf16.msra.mxu1 %v6593_v26  ;;  %v6629_v26 = vpack.c.bf16 %v5471_v21, %v5469_v20  ;;  %v5504_v20 = vld [vmem:[%s9986_s7 + $0xb8] sm:$0xff] }
 0x311   :  { %6596 = vmatprep.subr.bf16.mxu1 %v6595_v27  ;;  %v6631_v27 = vpack.c.bf16 %v5476_v23, %v5474_v22  ;;  %v6689_v21 = vpack.c.bf16 %v5504_v20, %v5503_v19  ;;  %v5505_v22 = vld [vmem:[%s9986_s7 + $0xc0] sm:$0xff]  ;;  %v5506_v23 = vld [vmem:[%s9986_s7 + $0xc8] sm:$0xff] }
 0x314   :  { %6598 = vmatpush1.bf16.msra.mxu1 %v6597_v30  ;;  %v1534_v30 = vld [vmem:[#allocation2 + $0x3] sm:$0xff] }
 0x315   :  { %1489 = vmatprep.subr.mxu1 %v5436_v31  ;;  %v5478_v31 = vld [vmem:[%s9982_s3 + $0x408] sm:$0xff] }
 0x316   :  { %v6635_v34 = vpack.c.bf16 %v5480_v32, %v5478_v31  ;;  %v5511_v31 = vld [vmem:[%s9986_s7 + $0xf0] sm:$0xff]  ;;  %v5512_v32 = vld [vmem:[%s9986_s7 + $0xf8] sm:$0xff] }
 0x318   :  { %1490 = vmatpush1.msra.mxu1 %v5435_v38  ;;  %v5484_v38 = vld [vmem:[%s9982_s3 + $0x438] sm:$0xff] }
 0x319   :  { %5437 = vmatmul.mubr.msk.f32.vlgmr.msra.gmra.mrb[20].mxu1 %vm1195_vm7, %v1426_v44  ;;  %6600 = vmatprep.subr.bf16.mxu1 %v6599_v39  ;;  %v6637_v39 = vpack.c.bf16 %v5479_v36, %v5477_v35  ;;  %v5488_v44 = vld [vmem:[%s9982_s3 + $0x458] sm:$0xff]  ;;  %v5514_v35 = vld [vmem:[%s9986_s7 + $0x108] sm:$0xff] }
 0x31a   :  { %6602 = vmatpush1.bf16.msra.mxu1 %v6601_v40  ;;  %1633 = vmatprep.mubr.f32.mxu1 %v7333_v7  ;;  %v6639_v40 = vpack.c.bf16 %v5484_v38, %v5482_v37  ;;  %v6643_v46 = vpack.c.bf16 %v5488_v44, %v5486_v43  ;;  %v5515_v37 = vld [vmem:[%s9986_s7 + $0x110] sm:$0xff]  ;;  %v5516_v38 = vld [vmem:[%s9986_s7 + $0x118] sm:$0xff] }
 0x31b   :  { %6604 = vmatprep.subr.bf16.mxu1 %v6603_v41  ;;  %v5481_v41 = vld [vmem:[%s9982_s3 + $0x420] sm:$0xff]  ;;  %v5519_v43 = vld [vmem:[%s9986_s7 + $0x130] sm:$0xff]  ;;  %v5520_v44 = vld [vmem:[%s9986_s7 + $0x138] sm:$0xff] }
 0x31c   :  { %v6641_v45 = vpack.c.bf16 %v5483_v42, %v5481_v41  ;;  %v5518_v41 = vld [vmem:[%s9986_s7 + $0x128] sm:$0xff] }
 0x31e   :  { %6606 = vmatpush1.bf16.msra.mxu1 %v6605_v47  ;;  %v5485_v47 = vld [vmem:[%s9982_s3 + $0x440] sm:$0xff] }
 0x31f   :  { %6608 = vmatprep.subr.bf16.mxu1 %v6607_v48  ;;  %v5487_v48 = vld [vmem:[%s9982_s3 + $0x450] sm:$0xff] }
 0x320   :  { %v6645_v51 = vpack.c.bf16 %v5487_v48, %v5485_v47 }
 0x322   :  { %6610 = vmatpush1.bf16.msra.mxu1 %v6609_v55  ;;  %v5489_v55 = vld [vmem:[%s9982_s3 + $0x460] sm:$0xff] }
 0x323   :  { %6612 = vmatprep.subr.bf16.mxu1 %v6611_v57  ;;  %v5491_v57 = vld [vmem:[%s9982_s3 + $0x470] sm:$0xff] }
 0x324   :  { %v6649_v60 = vpack.c.bf16 %v5491_v57, %v5489_v55  ;;  %v2234_v55 = vld [vmem:[%s9988_s9 + $0x8] sm:$0xff] }
 0x326   :  { %6614 = vmatpush1.bf16.msra.mxu1 %v6613_v62  ;;  %v5493_v62 = vld [vmem:[%s9982_s3 + $0x480] sm:$0xff] }
 0x327   :  { %6616 = vmatprep.subr.bf16.mxu1 %v6615_v63  ;;  %v5495_v63 = vld [vmem:[%s9982_s3 + $0x490] sm:$0xff] }
 0x328   :  { %v6653_v0 = vpack.c.bf16 %v5495_v63, %v5493_v62  ;;  %v2238_v62 = vld [vmem:[%s9988_s9 + $0x28] sm:$0xff] }
 0x32a   :  { %6618 = vmatpush1.bf16.msra.mxu1 %v6617_v4  ;;  %v1768_v4 = vld [vmem:[%s9986_s7 + $0x90] sm:$0xff] }
 0x32b   :  { %6620 = vmatprep.subr.bf16.mxu1 %v6619_v6  ;;  %v1769_v6 = vld [vmem:[%s9986_s7 + $0x98] sm:$0xff] }
 0x32c   :  { %v6683_v8 = vpack.c.bf16 %v1769_v6, %v1768_v4  ;;  %v2242_v4 = vld [vmem:[%s9988_s9 + $0x48] sm:$0xff] }
 0x32e   :  { %6622 = vmatpush1.bf16.msra.mxu1 %v6621_v12  ;;  %6684 = vmatpush1.bf16.msra.mxu0 %v6683_v8  ;;  %v5501_v12 = vld [vmem:[%s9986_s7 + $0xa0] sm:$0xff] }
 0x32f   :  { %6624 = vmatprep.subr.bf16.mxu1 %v6623_v13  ;;  %6685 = vmatprep.subr.bf16.mxu0 %v7334_v53  ;;  %v5502_v13 = vld [vmem:[%s9986_s7 + $0xa8] sm:$0xff]  ;;  %v2577_v8 = vld [vmem:[%s9990_s11] sm:$0xff] }
 0x332   :  { %6626 = vmatpush1.bf16.msra.mxu1 %v6625_v16 }
 0x333   :  { %1597 = vmatprep.subr.mxu1 %v5467_v17  ;;  %v6686_v17 = vpack.c.bf16 %v5502_v13, %v5501_v12  ;;  %v2580_v12 = vld [vmem:[%s9990_s11 + $0x18] sm:$0xff] }
 0x336   :  { %1598 = vmatpush1.msra.mxu1 %v5466_v24  ;;  %v6692_v24 = vpack.c.bf16 %v5506_v23, %v5505_v22 }
 0x337   :  { %5468 = vmatmul.mubr.msk.f32.vlgmr.msra.gmra.mrb[20].mxu1 %vm1195_vm7, %v1534_v30  ;;  %6628 = vmatprep.subr.bf16.mxu1 %v6627_v25  ;;  %v5507_v25 = vld [vmem:[%s9986_s7 + $0xd0] sm:$0xff]  ;;  %v6698_v30 = vpack.c.bf16 %v5510_v29, %v5509_v28 }
 0x338   :  { %6630 = vmatpush1.bf16.msra.mxu1 %v6629_v26  ;;  %1741 = vmatprep.mubr.f32.mxu1 %v7333_v7  ;;  %v5508_v26 = vld [vmem:[%s9986_s7 + $0xd8] sm:$0xff]  ;;  %v5528_v29 = vld [vmem:[%s9988_s9 + $0x50] sm:$0xff] }
 0x339   :  { %6632 = vmatprep.subr.bf16.mxu1 %v6631_v27  ;;  %v6695_v27 = vpack.c.bf16 %v5508_v26, %v5507_v25 }
 0x33c   :  { %6634 = vmatpush1.bf16.msra.mxu1 %v6633_v33  ;;  %v6701_v33 = vpack.c.bf16 %v5512_v32, %v5511_v31  ;;  %v5530_v32 = vld [vmem:[%s9988_s9 + $0x60] sm:$0xff] }
 0x33d   :  { %6636 = vmatprep.subr.bf16.mxu1 %v6635_v34  ;;  %v5513_v34 = vld [vmem:[%s9986_s7 + $0x100] sm:$0xff] }
 0x33e   :  { %v6704_v36 = vpack.c.bf16 %v5514_v35, %v5513_v34 }
 0x340   :  { %6638 = vmatpush1.bf16.msra.mxu1 %v6637_v39  ;;  %v6707_v39 = vpack.c.bf16 %v5516_v38, %v5515_v37  ;;  %v5533_v37 = vld [vmem:[%s9988_s9 + $0x78] sm:$0xff] }
 0x341   :  { %6640 = vmatprep.subr.bf16.mxu1 %v6639_v40  ;;  %v5517_v40 = vld [vmem:[%s9986_s7 + $0x120] sm:$0xff] }
 0x342   :  { %v6710_v42 = vpack.c.bf16 %v5518_v41, %v5517_v40  ;;  %v5535_v40 = vld [vmem:[%s9988_s9 + $0x88] sm:$0xff] }
 0x344   :  { %6642 = vmatpush1.bf16.msra.mxu1 %v6641_v45  ;;  %v6713_v45 = vpack.c.bf16 %v5520_v44, %v5519_v43  ;;  %v5537_v43 = vld [vmem:[%s9988_s9 + $0x98] sm:$0xff] }
 0x345   :  { %6644 = vmatprep.subr.bf16.mxu1 %v6643_v46  ;;  %v1935_v46 = vld [vmem:[%s9987_s8] sm:$0xf] }
 0x348   :  { %6646 = vmatpush1.bf16.msra.mxu1 %v6645_v51 }
 0x349   :  { %6648 = vmatprep.subr.bf16.mxu1 %v6647_v52  ;;  %v2233_v52 = vld [vmem:[%s9988_s9] sm:$0xff] }
 0x34a   :  { %v6716_v57 = vpack.c.bf16 %v2234_v55, %v2233_v52  ;;  %v5543_v52 = vld [vmem:[%s9988_s9 + $0xc0] sm:$0xff]  ;;  %v5544_v55 = vld [vmem:[%s9988_s9 + $0xc8] sm:$0xff] }
 0x34c   :  { %6650 = vmatpush1.bf16.msra.mxu1 %v6649_v60  ;;  %v6719_v60 = vpack.c.bf16 %v2236_v59, %v2235_v58  ;;  %v5545_v58 = vld [vmem:[%s9988_s9 + $0xd0] sm:$0xff]  ;;  %v5546_v59 = vld [vmem:[%s9988_s9 + $0xd8] sm:$0xff] }
 0x34d   :  { %6652 = vmatprep.subr.bf16.mxu1 %v6651_v61  ;;  %v2237_v61 = vld [vmem:[%s9988_s9 + $0x20] sm:$0xff] }
 0x34e   :  { %v6722_v63 = vpack.c.bf16 %v2238_v62, %v2237_v61  ;;  %v5547_v61 = vld [vmem:[%s9988_s9 + $0xe0] sm:$0xff]  ;;  %v5548_v62 = vld [vmem:[%s9988_s9 + $0xe8] sm:$0xff] }
 0x350   :  { %6654 = vmatpush1.bf16.msra.mxu1 %v6653_v0  ;;  %v2239_v0 = vld [vmem:[%s9988_s9 + $0x30] sm:$0xff] }
 0x351   :  { %1705 = vmatprep.subr.mxu1 %v5498_v1  ;;  %v2240_v1 = vld [vmem:[%s9988_s9 + $0x38] sm:$0xff] }
 0x354   :  { %1706 = vmatpush1.msra.mxu1 %v5497_v2  ;;  %v6725_v2 = vpack.c.bf16 %v2240_v1, %v2239_v0  ;;  %v5550_v0 = vld [vmem:[%s9988_s9 + $0xf0] sm:$0xff]  ;;  %v5551_v1 = vld [vmem:[%s9988_s9 + $0xf8] sm:$0xff] }
 0x355   :  { %5499 = vmatmul.mubr.msk.f32.vlgmr.msra.gmra.mrb[20].mxu1 %vm1195_vm7, %v1642_v3  ;;  %6775 = vmatprep.subr.bf16.mxu1 %v7334_v53  ;;  %v2241_v3 = vld [vmem:[%s9988_s9 + $0x40] sm:$0xff] }
 0x356   :  { %6191 = vmatprep.mubr.msk.f32.mxu1 %vm7335_vm9, %v7333_v7  ;;  %v6728_v6 = vpack.c.bf16 %v2242_v4, %v2241_v3  ;;  %v5552_v3 = vld [vmem:[%s9988_s9 + $0x100] sm:$0xff]  ;;  %v5553_v4 = vld [vmem:[%s9988_s9 + $0x108] sm:$0xff] }
 0x428   :  { %v1743_v14 = vpop.f32.mrb[20].mxu1 }
 0x429   :  { %v1745_v15 = vpop.f32.mrb[21].mxu1  ;;  %v7221_v18 = vadd.f32 %v1743_v14, %v1309_v11  ;;  %v6776_v11 = vpack.c.bf16 %v2578_v9, %v2577_v8  ;;  %v2581_v14 = vld [vmem:[%s9990_s11 + $0x20] sm:$0xff]  ;;  %v6764_v8 = vpack.c.bf16 %v5553_v4, %v5552_v3  ;;  %v5554_v9 = vld [vmem:[%s9988_s9 + $0x110] sm:$0xff]  ;;  %v5607_v3 = vld [vmem:[%s9980_s1 + $0xc8] sm:$0xff] }
 0x42a   :  { %v7222_v16 = vadd.f32 %v1745_v15, %v1313_v10  ;;  %v2579_v10 = vld [vmem:[%s9990_s11 + $0x10] sm:$0xff]  ;;  %v2582_v15 = vld [vmem:[%s9990_s11 + $0x28] sm:$0xff]  ;;  %v5609_v4 = vld [vmem:[%s9980_s1 + $0xd8] sm:$0xff] }
 0x42b   :  { %6777 = vmatpush3.bf16.msra.mxu1 %v6776_v11  ;;  %v6779_v13 = vpack.c.bf16 %v2580_v12, %v2579_v10  ;;  %v5555_v10 = vld [vmem:[%s9988_s9 + $0x118] sm:$0xff]  ;;  %v5556_v12 = vld [vmem:[%s9988_s9 + $0x120] sm:$0xff] }
 0x42c   :  { %5500 = vmatprep.mubr.msk.f32.mxu0 %vm1770_vm8, %v7222_v16  ;;  %6778 = vmatprep.subr.bf16.mxu1 %v7334_v53  ;;  %v6767_v11 = vpack.c.bf16 %v5555_v10, %v5554_v9  ;;  %v6814_v9 = vpack.c.bf16 %v5609_v4, %v5607_v3  ;;  %v5573_v10 = vld [vmem:[%s9979_s0 + $0x31] sm:$0xff]  ;;  %v3261_v3 = vld [vmem:[%s9984_s5 + $0x40] sm:$0xff]  ;;  %v3262_v4 = vld [vmem:[%s9984_s5 + $0x48] sm:$0xff] }
 0x42d   :  { %1839 = vmatmul.mubr.f32.vlgmr.msra.gmra.mrb[12].mxu0 %v7221_v18 }
 0x42e   :  { %6687 = vmatpush1.bf16.msra.mxu0 %v6686_v17  ;;  %5521 = vmatprep.mubr.msk.f32.mxu0 %vm1770_vm8, %v7222_v16  ;;  %v6782_v16 = vpack.c.bf16 %v2582_v15, %v2581_v14  ;;  %v5558_v15 = vld [vmem:[%s9988_s9 + $0x130] sm:$0xff] }
 0x42f   :  { %6688 = vmatprep.subr.bf16.mxu0 %v7334_v53  ;;  %6780 = vmatpush3.bf16.msra.mxu1 %v6779_v13  ;;  %v5557_v13 = vld [vmem:[%s9988_s9 + $0x128] sm:$0xff] }
 0x430   :  { %6781 = vmatprep.subr.bf16.mxu1 %v7334_v53  ;;  %v6770_v14 = vpack.c.bf16 %v5557_v13, %v5556_v12  ;;  %v5608_v12 = vld [vmem:[%s9980_s1 + $0xd0] sm:$0xff]  ;;  %v5611_v13 = vld [vmem:[%s9980_s1 + $0xe8] sm:$0xff] }
 0x432   :  { %6690 = vmatpush1.bf16.msra.mxu0 %v6689_v21 }
 0x433   :  { %6691 = vmatprep.subr.bf16.mxu0 %v7334_v53  ;;  %6783 = vmatpush3.bf16.msra.mxu1 %v6782_v16  ;;  %v5559_v16 = vld [vmem:[%s9988_s9 + $0x138] sm:$0xff] }
 0x434   :  { %6189 = vmatprep.subr.mxu1 %v7333_v7 }
 0x436   :  { %6693 = vmatpush1.bf16.msra.mxu0 %v6692_v24 }
 0x437   :  { %6694 = vmatprep.subr.bf16.mxu0 %v7334_v53 }
 0x43a   :  { %6696 = vmatpush1.bf16.msra.mxu0 %v6695_v27 }
 0x43b   :  { %6697 = vmatprep.subr.bf16.mxu0 %v7334_v53 }
 0x43e   :  { %6699 = vmatpush1.bf16.msra.mxu0 %v6698_v30  ;;  %v5529_v30 = vld [vmem:[%s9988_s9 + $0x58] sm:$0xff] }
 0x43f   :  { %6700 = vmatprep.subr.bf16.mxu0 %v7334_v53  ;;  %v6731_v31 = vpack.c.bf16 %v5529_v30, %v5528_v29 }
 0x442   :  { %6702 = vmatpush1.bf16.msra.mxu0 %v6701_v33  ;;  %v5531_v33 = vld [vmem:[%s9988_s9 + $0x68] sm:$0xff] }
 0x443   :  { %6703 = vmatprep.subr.bf16.mxu0 %v7334_v53  ;;  %v6734_v35 = vpack.c.bf16 %v5531_v33, %v5530_v32 }
 0x446   :  { %6705 = vmatpush1.bf16.msra.mxu0 %v6704_v36  ;;  %v5532_v36 = vld [vmem:[%s9988_s9 + $0x70] sm:$0xff] }
 0x447   :  { %6706 = vmatprep.subr.bf16.mxu0 %v7334_v53  ;;  %v6737_v38 = vpack.c.bf16 %v5533_v37, %v5532_v36  ;;  %v5575_v36 = vld [vmem:[%s9980_s1 + $0x48] sm:$0xff]  ;;  %v5577_v37 = vld [vmem:[%s9980_s1 + $0x58] sm:$0xff] }
 0x44a   :  { %6708 = vmatpush1.bf16.msra.mxu0 %v6707_v39  ;;  %v5534_v39 = vld [vmem:[%s9988_s9 + $0x80] sm:$0xff] }
 0x44b   :  { %6709 = vmatprep.subr.bf16.mxu0 %v7334_v53  ;;  %v6740_v41 = vpack.c.bf16 %v5535_v40, %v5534_v39  ;;  %v6794_v39 = vpack.c.bf16 %v5577_v37, %v5575_v36  ;;  %v5574_v40 = vld [vmem:[%s9980_s1 + $0x40] sm:$0xff]  ;;  %v5605_v37 = vld [vmem:[%s9979_s0 + $0x33] sm:$0xff] }
 0x44e   :  { %6711 = vmatpush1.bf16.msra.mxu0 %v6710_v42  ;;  %v5536_v42 = vld [vmem:[%s9988_s9 + $0x90] sm:$0xff] }
 0x44f   :  { %6712 = vmatprep.subr.bf16.mxu0 %v7334_v53  ;;  %v6743_v44 = vpack.c.bf16 %v5537_v43, %v5536_v42  ;;  %v5579_v42 = vld [vmem:[%s9980_s1 + $0x68] sm:$0xff]  ;;  %v5581_v43 = vld [vmem:[%s9980_s1 + $0x78] sm:$0xf] }
 0x452   :  { %6714 = vmatpush1.bf16.msra.mxu0 %v6713_v45  ;;  %v5539_v45 = vld [vmem:[%s9988_s9 + $0xa0] sm:$0xff] }
 0x453   :  { %6065 = vmatprep.subr.mxu0 %v7333_v7 }
 0x455   :  { %1930 = vmatmul.mubr.f32.vlgmr.msra.gmra.mrb[14].mxu0 %v7221_v18 }
 0x456   :  { %6067 = vmatprep.mubr.msk.f32.mxu0 %vm7335_vm9, %v7333_v7 }
 0x500   :  { %v1840_v47 = vpop.f32.mrb[12].mxu0 }
 0x501   :  { %v1842_v48 = vpop.f32.mrb[13].mxu0  ;;  %6066 = vmatpush3.msra.mxu0 %v1840_v47 }
 0x502   :  { %6070 = vmatprep.subr.mxu0 %v7333_v7  ;;  %6068 = vmatmul.mubr.msk.f32.vlgmr.msra.gmra.mrb[16].mxu0 %vm1936_vm10, %v1935_v46  ;;  %v5541_v48 = vld [vmem:[%s9988_s9 + $0xb0] sm:$0xff] }
 0x503   :  { %6071 = vmatpush3.msra.mxu0 %v1840_v47  ;;  %6072 = vmatprep.mubr.msk.f32.mxu0 %vm7335_vm9, %v7333_v7 }
 0x504   :  { %6075 = vmatprep.subr.mxu0 %v7333_v7 }
 0x506   :  { %6073 = vmatmul.mubr.msk.f32.vlgmr.msra.gmra.mrb[18].mxu0 %vm1936_vm10, %v5523_v49 }
 0x507   :  { %6077 = vmatprep.mubr.msk.f32.mxu0 %vm7335_vm9, %v7333_v7 }
 0x528   :  { %v1931_v50 = vpop.f32.mrb[14].mxu0 }
 0x529   :  { %v1933_v51 = vpop.f32.mrb[15].mxu0  ;;  %6076 = vmatpush3.msra.mxu0 %v1931_v50 }
 0x52a   :  { %6078 = vmatmul.mubr.msk.f32.vlgmr.msra.gmra.mrb[20].mxu0 %vm1936_vm10, %v1935_v46  ;;  %6080 = vmatprep.subr.mxu0 %v7333_v7  ;;  %v5540_v46 = vld [vmem:[%s9988_s9 + $0xa8] sm:$0xff] }
 0x52b   :  { %6081 = vmatpush3.msra.mxu0 %v1931_v50  ;;  %6082 = vmatprep.mubr.msk.f32.mxu0 %vm7335_vm9, %v7333_v7  ;;  %v6746_v47 = vpack.c.bf16 %v5540_v46, %v5539_v45  ;;  %v6798_v46 = vpack.c.bf16 %v5581_v43, %v5579_v42  ;;  %v5638_v42 = vld [vmem:[%s9984_s5 + $0xf0] sm:$0xff] }
 0x52c   :  { %6715 = vmatprep.subr.bf16.mxu0 %v7334_v53 }
 0x52e   :  { %6083 = vmatmul.mubr.msk.f32.vlgmr.msra.gmra.mrb[22].mxu0 %vm1936_vm10, %v5523_v49  ;;  %v5542_v49 = vld [vmem:[%s9988_s9 + $0xb8] sm:$0xff] }
 0x52f   :  { %6105 = vmatprep.mubr.msk.f32.mxu0 %vm7335_vm9, %v7333_v7  ;;  %6717 = vmatpush3.bf16.msra.mxu0 %v6716_v57  ;;  %v6749_v51 = vpack.c.bf16 %v5542_v49, %v5541_v48  ;;  %v6752_v57 = vpack.c.bf16 %v5544_v55, %v5543_v52  ;;  %v5580_v48 = vld [vmem:[%s9980_s1 + $0x70] sm:$0xf]  ;;  %v5591_v49 = vld [vmem:[%s9980_s1 + $0x88] sm:$0xff] }
 0x530   :  { %6718 = vmatprep.subr.bf16.mxu0 %v7334_v53 }
 0x533   :  { %6720 = vmatpush3.bf16.msra.mxu0 %v6719_v60  ;;  %v6755_v60 = vpack.c.bf16 %v5546_v59, %v5545_v58  ;;  %v5590_v58 = vld [vmem:[%s9980_s1 + $0x80] sm:$0xff]  ;;  %v5592_v59 = vld [vmem:[%s9980_s1 + $0x90] sm:$0xff] }
 0x534   :  { %6721 = vmatprep.subr.bf16.mxu0 %v7334_v53 }
 0x537   :  { %6723 = vmatpush3.bf16.msra.mxu0 %v6722_v63  ;;  %v6758_v63 = vpack.c.bf16 %v5548_v62, %v5547_v61  ;;  %v5597_v61 = vld [vmem:[%s9980_s1 + $0xb8] sm:$0xf]  ;;  %v5571_v62 = vld [vmem:[%s9979_s0 + $0x21] sm:$0xff] }
 0x538   :  { %6724 = vmatprep.subr.bf16.mxu0 %v7334_v53 }
 0x53b   :  { %6726 = vmatpush3.bf16.msra.mxu0 %v6725_v2  ;;  %v6761_v2 = vpack.c.bf16 %v5551_v1, %v5550_v0  ;;  %v5594_v1 = vld [vmem:[%s9980_s1 + $0xa0] sm:$0xff] }
 0x53c   :  { %6727 = vmatprep.subr.bf16.mxu0 %v7334_v53 }
 0x53f   :  { %6729 = vmatpush3.bf16.msra.mxu0 %v6728_v6 }
 0x540   :  { %6730 = vmatprep.subr.bf16.mxu0 %v7334_v53 }
 0x5d5   :  { %v2006_v17 = vpop.f32.mrb[16].mxu0 }
 0x5d6   :  { %v6069_v18 = vpop.f32.mrb[17].mxu0 }
 0x5d9   :  { %v2081_v19 = vpop.f32.mrb[18].mxu0 }
 0x5da   :  { %v2085_v20 = vmax.f32 %v2006_v17, %v2081_v19  ;;  %v6074_v21 = vpop.f32.mrb[19].mxu0  ;;  %v6773_v17 = vpack.c.bf16 %v5559_v16, %v5558_v15  ;;  %v2671_v19 = vld [vmem:[%s9980_s1 + $0x8] sm:$0xff] }
 0x5db   :  { %v2583_v21 = vld [vmem:[%s9990_s11 + $0x30] sm:$0x3]  ;;  %v5587_v15 = vld [vmem:[%s9979_s0 + $0x22] sm:$0xff] }
 0x5dc   :  { %6190 = vmatpush3.msk.msra.mxu1 %vm2589_vm13, %v2583_v21  ;;  %v5625_v21 = vld [vmem:[%s9980_s1 + $0x118] sm:$0xff] }
 0x5fd   :  { %v2152_v22 = vpop.f32.mrb[20].mxu0 }
 0x5fe   :  { %v6079_v23 = vpop.f32.mrb[21].mxu0 }
 0x5ff   :  { %v2231_v23 = vld [vmem:[%s9989_s10] sm:$0x1] }
 0x601   :  { %v2222_v24 = vpop.f32.mrb[22].mxu0 }
 0x602   :  { %v2226_v25 = vmax.f32 %v2152_v22, %v2222_v24  ;;  %v6084_v26 = vpop.f32.mrb[23].mxu0  ;;  %v2670_v24 = vld [vmem:[%s9980_s1] sm:$0xff] }
 0x604   :  { %v2227_v27 = vmax.f32 %v2085_v20, %v2226_v25  ;;  %v2673_v20 = vld [vmem:[%s9980_s1 + $0x18] sm:$0xff]  ;;  %v2672_v25 = vld [vmem:[%s9980_s1 + $0x10] sm:$0xff] }
 0x605   :  { %v6784_v22 = vpack.c.bf16 %v2673_v20, %v2671_v19  ;;  %v5612_v19 = vld [vmem:[%s9980_s1 + $0xf0] sm:$0xf]  ;;  %v5623_v20 = vld [vmem:[%s9980_s1 + $0x108] sm:$0xff] }
 0x606   :  { %v2228_v28 = vmax.f32 %v2227_v27, 0.0  ;;  %v2675_v27 = vld [vmem:[%s9980_s1 + $0x28] sm:$0xff] }
 0x607   :  { %6785 = vmatprep.subr.bf16.mxu1 %v6784_v22  ;;  %v5588_v22 = vld [vmem:[%s9979_s0 + $0x2a] sm:$0xff] }
 0x608   :  { %2230 = vst.msk [vmem:[#allocation3] sm:$0xf] %vm2229_vm11, %v2228_v28  ;;  %v2677_v28 = vld [vmem:[%s9980_s1 + $0x38] sm:$0xf] }
 0x609   :  { %v6788_v33 = vpack.c.bf16 %v2677_v28, %v2675_v27  ;;  %v5624_v27 = vld [vmem:[%s9980_s1 + $0x110] sm:$0xff]  ;;  %v5627_v28 = vld [vmem:[%s9980_s1 + $0x128] sm:$0xff] }
 0x60f   :  { %v2232_v34 = vld [vmem:[#allocation3] sm:$0x1]  ;;  %v2318_v50 = vld [vmem:[#allocation3 + $0x1] sm:$0x1]  ;;  %v2404_v6 = vld [vmem:[#allocation3 + $0x2] sm:$0x1] }
 0x610   :  { %6106 = vmatmul.mubr.msk.f32.vlgmr.msra.gmra.mrb[24].mxu0 %vm2243_vm12, %v2232_v34  ;;  %v2490_v18 = vld [vmem:[#allocation3 + $0x3] sm:$0x1]  ;;  %v2674_v34 = vld [vmem:[%s9980_s1 + $0x20] sm:$0xff] }
 0x611   :  { %6732 = vmatpush3.bf16.msra.mxu0 %v6731_v31  ;;  %6128 = vmatprep.mubr.msk.f32.mxu0 %vm7335_vm9, %v7333_v7  ;;  %v6786_v31 = vpack.c.bf16 %v2672_v25, %v2670_v24  ;;  %v6824_v24 = vpack.c.bf16 %v5625_v21, %v5623_v20  ;;  %v5589_v25 = vld [vmem:[%s9979_s0 + $0x32] sm:$0xff] }
 0x612   :  { %6733 = vmatprep.subr.bf16.mxu0 %v7334_v53  ;;  %v5651_v20 = vld [vmem:[%s9984_s5 + $0x158] sm:$0xff] }
 0x615   :  { %6735 = vmatpush3.bf16.msra.mxu0 %v6734_v35  ;;  %v2676_v35 = vld [vmem:[%s9980_s1 + $0x30] sm:$0xf] }
 0x616   :  { %6736 = vmatprep.subr.bf16.mxu0 %v7334_v53 }
 0x619   :  { %6738 = vmatpush3.bf16.msra.mxu0 %v6737_v38  ;;  %v6791_v38 = vpack.c.bf16 %v2676_v35, %v2674_v34  ;;  %v5628_v34 = vld [vmem:[%s9980_s1 + $0x130] sm:$0xf] }
 0x61a   :  { %6739 = vmatprep.subr.bf16.mxu0 %v7334_v53  ;;  %v5604_v35 = vld [vmem:[%s9979_s0 + $0x2b] sm:$0xff] }
 0x61d   :  { %6741 = vmatpush3.bf16.msra.mxu0 %v6740_v41  ;;  %v5576_v41 = vld [vmem:[%s9980_s1 + $0x50] sm:$0xff] }
 0x61e   :  { %6742 = vmatprep.subr.bf16.mxu0 %v7334_v53  ;;  %v6796_v45 = vpack.c.bf16 %v5576_v41, %v5574_v40  ;;  %v3253_v40 = vld [vmem:[%s9984_s5] sm:$0xff]  ;;  %v3254_v41 = vld [vmem:[%s9984_s5 + $0x8] sm:$0xff] }
 0x61f   :  { %v6835_v43 = vpack.c.bf16 %v3254_v41, %v3253_v40  ;;  %v3273_v40 = vld [vmem:[%s9984_s5 + $0xa0] sm:$0xff]  ;;  %v3274_v41 = vld [vmem:[%s9984_s5 + $0xa8] sm:$0xff] }
 0x621   :  { %6744 = vmatpush3.bf16.msra.mxu0 %v6743_v44  ;;  %v5563_v44 = vld [vmem:[%s9979_s0 + $0x20] sm:$0xff] }
 0x622   :  { %6745 = vmatprep.subr.bf16.mxu0 %v7334_v53 }
 0x624   :  { %6129 = vmatmul.mubr.msk.f32.vlgmr.msra.gmra.mrb[24].mxu0 %vm2243_vm12, %v2318_v50  ;;  %v5593_v50 = vld [vmem:[%s9980_s1 + $0x98] sm:$0xff] }
 0x625   :  { %6747 = vmatpush3.bf16.msra.mxu0 %v6746_v47  ;;  %6151 = vmatprep.mubr.msk.f32.mxu0 %vm7335_vm9, %v7333_v7  ;;  %v5578_v47 = vld [vmem:[%s9980_s1 + $0x60] sm:$0xff]  ;;  %v6804_v55 = vpack.c.bf16 %v5593_v50, %v5591_v49  ;;  %v5641_v50 = vld [vmem:[%s9984_s5 + $0x108] sm:$0xff] }
 0x626   :  { %6748 = vmatprep.subr.bf16.mxu0 %v7334_v53  ;;  %v6801_v52 = vpack.c.bf16 %v5580_v48, %v5578_v47  ;;  %v3256_v47 = vld [vmem:[%s9984_s5 + $0x18] sm:$0xff]  ;;  %v5640_v48 = vld [vmem:[%s9984_s5 + $0x100] sm:$0xff] }
 0x629   :  { %6750 = vmatpush3.bf16.msra.mxu0 %v6749_v51  ;;  %v5564_v51 = vld [vmem:[%s9979_s0 + $0x28] sm:$0xff] }
 0x62a   :  { %6751 = vmatprep.subr.bf16.mxu0 %v7334_v53 }
 0x62d   :  { %6753 = vmatpush3.bf16.msra.mxu0 %v6752_v57  ;;  %v5565_v57 = vld [vmem:[%s9979_s0 + $0x30] sm:$0xff] }
 0x62e   :  { %6754 = vmatprep.subr.bf16.mxu0 %v7334_v53 }
 0x631   :  { %6756 = vmatpush3.bf16.msra.mxu0 %v6755_v60  ;;  %v5595_v60 = vld [vmem:[%s9980_s1 + $0xa8] sm:$0xff] }
 0x632   :  { %6757 = vmatprep.subr.bf16.mxu0 %v7334_v53  ;;  %v6808_v0 = vpack.c.bf16 %v5597_v61, %v5595_v60  ;;  %v3259_v61 = vld [vmem:[%s9984_s5 + $0x30] sm:$0xff] }
 0x635   :  { %6759 = vmatpush3.bf16.msra.mxu0 %v6758_v63  ;;  %v6806_v63 = vpack.c.bf16 %v5592_v59, %v5590_v58  ;;  %v5643_v58 = vld [vmem:[%s9984_s5 + $0x118] sm:$0xff] }
 0x636   :  { %6760 = vmatprep.subr.bf16.mxu0 %v7334_v53 }
 0x638   :  { %6152 = vmatmul.mubr.msk.f32.vlgmr.msra.gmra.mrb[24].mxu0 %vm2243_vm12, %v2404_v6  ;;  %v5572_v6 = vld [vmem:[%s9979_s0 + $0x29] sm:$0xff] }
 0x639   :  { %6762 = vmatpush3.bf16.msra.mxu0 %v6761_v2  ;;  %6174 = vmatprep.mubr.msk.f32.mxu0 %vm7335_vm9, %v7333_v7  ;;  %v5596_v2 = vld [vmem:[%s9980_s1 + $0xb0] sm:$0xf] }
 0x63a   :  { %6763 = vmatprep.subr.bf16.mxu0 %v7334_v53 }
 0x63d   :  { %6765 = vmatpush3.bf16.msra.mxu0 %v6764_v8  ;;  %v6811_v8 = vpack.c.bf16 %v5596_v2, %v5594_v1 }
 0x63e   :  { %6766 = vmatprep.subr.bf16.mxu0 %v7334_v53 }
 0x641   :  { %6768 = vmatpush3.bf16.msra.mxu0 %v6767_v11  ;;  %v5606_v11 = vld [vmem:[%s9980_s1 + $0xc0] sm:$0xff] }
 0x642   :  { %6769 = vmatprep.subr.bf16.mxu0 %v7334_v53  ;;  %v6816_v16 = vpack.c.bf16 %v5608_v12, %v5606_v11  ;;  %v3263_v11 = vld [vmem:[%s9984_s5 + $0x50] sm:$0xff]  ;;  %v3264_v12 = vld [vmem:[%s9984_s5 + $0x58] sm:$0xff] }
 0x645   :  { %6771 = vmatpush3.bf16.msra.mxu0 %v6770_v14  ;;  %v5613_v14 = vld [vmem:[%s9980_s1 + $0xf8] sm:$0xf] }
 0x646   :  { %6772 = vmatprep.subr.bf16.mxu0 %v7334_v53 }
 0x649   :  { %6774 = vmatpush3.bf16.msra.mxu0 %v6773_v17  ;;  %v6818_v17 = vpack.c.bf16 %v5613_v14, %v5611_v13  ;;  %v5648_v13 = vld [vmem:[%s9984_s5 + $0x140] sm:$0xff]  ;;  %v5649_v14 = vld [vmem:[%s9984_s5 + $0x148] sm:$0xff] }
 0x64a   :  { %6834 = vmatprep.subr.bf16.mxu0 %v7334_v53 }
 0x64c   :  { %6175 = vmatmul.mubr.msk.f32.vlgmr.msra.gmra.mrb[24].mxu0 %vm2243_vm12, %v2490_v18  ;;  %v5610_v18 = vld [vmem:[%s9980_s1 + $0xe0] sm:$0xff] }
 0x64d   :  { %6836 = vmatpush1.bf16.msra.mxu0 %v6835_v43  ;;  %v5659_v43 = vld [vmem:[%s9984_s5 + $0x198] sm:$0xff] }
 0x64e   :  { %6837 = vmatprep.subr.bf16.mxu0 %v7334_v53 }
 0x71f   :  { %v2571_v26 = vpop.f32.mrb[24].mxu0 }
 0x720   :  { %v7223_v29 = vadd.f32 %v2571_v26, %v2231_v23  ;;  %v6176_v30 = vpop.f32.mrb[25].mxu0  ;;  %v6821_v23 = vpack.c.bf16 %v5612_v19, %v5610_v18  ;;  %v5622_v26 = vld [vmem:[%s9980_s1 + $0x100] sm:$0xff]  ;;  %v3266_v18 = vld [vmem:[%s9984_s5 + $0x68] sm:$0xff]  ;;  %v5650_v19 = vld [vmem:[%s9984_s5 + $0x150] sm:$0xff] }
 0x721   :  { %v5603_v30 = vld [vmem:[%s9979_s0 + $0x23] sm:$0xff] }
 0x722   :  { %v2576_v32 = vmax.f32 %v7223_v29, 0.0  ;;  %v5629_v29 = vld [vmem:[%s9980_s1 + $0x138] sm:$0xf] }
 0x724   :  { %6192 = vmatmul.mubr.msk.f32.vlgmr.msra.gmra.mrb[22].mxu1 %vm2585_vm14, %v2576_v32  ;;  %v6828_v32 = vpack.c.bf16 %v5629_v29, %v5627_v28  ;;  %v3269_v29 = vld [vmem:[%s9984_s5 + $0x80] sm:$0xff] }
 0x725   :  { %6787 = vmatpush1.bf16.msra.mxu1 %v6786_v31  ;;  %2757 = vmatprep.mubr.f32.mxu1 %v7333_v7  ;;  %v6826_v31 = vpack.c.bf16 %v5624_v27, %v5622_v26  ;;  %v5653_v26 = vld [vmem:[%s9984_s5 + $0x168] sm:$0xff] }
 0x726   :  { %6790 = vmatprep.subr.msk.bf16.mxu1 %vm7419_vm2, %v6788_v33  ;;  %v5626_v33 = vld [vmem:[%s9980_s1 + $0x120] sm:$0xff] }
 0x727   :  { %v6831_v36 = vpack.c.bf16 %v5628_v34, %v5626_v33 }
 0x729   :  { %6793 = vmatpush1.bf16.msk.msra.mxu1 %vm7419_vm2, %v6791_v38  ;;  %v5619_v38 = vld [vmem:[%s9979_s0 + $0x24] sm:$0xff] }
 0x72a   :  { %6795 = vmatprep.subr.bf16.mxu1 %v6794_v39  ;;  %v5620_v39 = vld [vmem:[%s9979_s0 + $0x2c] sm:$0xff] }
 0x72c   :  { %5568 = vmatmul.mubr.msk.f32.vlgmr.msra.gmra.mrb[24].mxu1 %vm57_vm3, %v5563_v44  ;;  %v5639_v44 = vld [vmem:[%s9984_s5 + $0xf8] sm:$0xff] }
 0x72d   :  { %2763 = vmatprep.mubr.f32.mxu1 %v7333_v7  ;;  %6797 = vmatpush1.bf16.msra.mxu1 %v6796_v45  ;;  %v6880_v45 = vpack.c.bf16 %v5639_v44, %v5638_v42  ;;  %v5658_v42 = vld [vmem:[%s9984_s5 + $0x190] sm:$0xff]  ;;  %v6865_v44 = vpack.c.bf16 %v3274_v41, %v3273_v40 }
 0x72e   :  { %6800 = vmatprep.subr.msk.bf16.mxu1 %vm7419_vm2, %v6798_v46  ;;  %v3255_v46 = vld [vmem:[%s9984_s5 + $0x10] sm:$0xff] }
 0x72f   :  { %v6838_v49 = vpack.c.bf16 %v3256_v47, %v3255_v46  ;;  %v3275_v46 = vld [vmem:[%s9984_s5 + $0xb0] sm:$0xff]  ;;  %v3276_v47 = vld [vmem:[%s9984_s5 + $0xb8] sm:$0xff] }
 0x730   :  { %5569 = vmatmul.mubr.msk.f32.gmra.mrb[26].mxu1 %vm57_vm3, %v5564_v51  ;;  %v3257_v51 = vld [vmem:[%s9984_s5 + $0x20] sm:$0xff] }
 0x731   :  { %2769 = vmatprep.mubr.f32.mxu1 %v7333_v7  ;;  %6803 = vmatpush1.bf16.msk.msra.mxu1 %vm7419_vm2, %v6801_v52  ;;  %v3258_v52 = vld [vmem:[%s9984_s5 + $0x28] sm:$0xff] }
 0x732   :  { %6805 = vmatprep.subr.bf16.mxu1 %v6804_v55  ;;  %v6883_v55 = vpack.c.bf16 %v5641_v50, %v5640_v48  ;;  %6839 = vmatpush1.bf16.msra.mxu0 %v6838_v49  ;;  %v6841_v59 = vpack.c.bf16 %v3258_v52, %v3257_v51  ;;  %v5660_v48 = vld [vmem:[%s9984_s5 + $0x1a0] sm:$0xff]  ;;  %v5661_v49 = vld [vmem:[%s9984_s5 + $0x1a8] sm:$0xff]  ;;  %v6868_v50 = vpack.c.bf16 %v3276_v47, %v3275_v46  ;;  %v5674_v46 = vld [vmem:[%s9985_s6 + $0x18] sm:$0xf] }
 0x733   :  { %6840 = vmatprep.subr.bf16.mxu0 %v7334_v53  ;;  %v6913_v51 = vpack.c.bf16 %v5661_v49, %v5660_v48  ;;  %v3277_v52 = vld [vmem:[%s9984_s5 + $0xc0] sm:$0xff]  ;;  %v3811_v47 = vld [vmem:[%s9982_s3 + $0x8] sm:$0xff]  ;;  %v3813_v48 = vld [vmem:[%s9982_s3 + $0x18] sm:$0xff] }
 0x734   :  { %5570 = vmatmul.mubr.msk.f32.gmra.mrb[28].mxu1 %vm57_vm3, %v5565_v57  ;;  %v5642_v57 = vld [vmem:[%s9984_s5 + $0x110] sm:$0xff]  ;;  %v6940_v49 = vpack.c.bf16 %v3813_v48, %v3811_v47 }
 0x735   :  { %2883 = vmatprep.mubr.f32.mxu1 %v7333_v7  ;;  %v6886_v60 = vpack.c.bf16 %v5643_v58, %v5642_v57  ;;  %v5662_v57 = vld [vmem:[%s9984_s5 + $0x1b0] sm:$0xff]  ;;  %v5663_v58 = vld [vmem:[%s9984_s5 + $0x1b8] sm:$0xff] }
 0x736   :  { %6842 = vmatpush1.bf16.msra.mxu0 %v6841_v59 }
 0x737   :  { %6843 = vmatprep.subr.bf16.mxu0 %v7334_v53 }
 0x738   :  { %5584 = vmatmul.mubr.msk.f32.vlgmr.msra.gmra.mrb[24].mxu1 %vm57_vm3, %v5571_v62  ;;  %v3260_v62 = vld [vmem:[%s9984_s5 + $0x38] sm:$0xff] }
 0x739   :  { %2889 = vmatprep.mubr.f32.mxu1 %v7333_v7  ;;  %6807 = vmatpush1.bf16.msra.mxu1 %v6806_v63  ;;  %v5644_v63 = vld [vmem:[%s9984_s5 + $0x120] sm:$0xff]  ;;  %v6844_v1 = vpack.c.bf16 %v3260_v62, %v3259_v61  ;;  %v3279_v61 = vld [vmem:[%s9984_s5 + $0xd0] sm:$0xff]  ;;  %v3280_v62 = vld [vmem:[%s9984_s5 + $0xd8] sm:$0xff] }
 0x73a   :  { %6810 = vmatprep.subr.msk.bf16.mxu1 %vm7419_vm2, %v6808_v0  ;;  %v5645_v0 = vld [vmem:[%s9984_s5 + $0x128] sm:$0xff] }
 0x73b   :  { %v6889_v2 = vpack.c.bf16 %v5645_v0, %v5644_v63  ;;  %6845 = vmatpush1.bf16.msra.mxu0 %v6844_v1  ;;  %v5664_v63 = vld [vmem:[%s9984_s5 + $0x1c0] sm:$0xff]  ;;  %v5665_v0 = vld [vmem:[%s9984_s5 + $0x1c8] sm:$0xff]  ;;  %v6874_v1 = vpack.c.bf16 %v3280_v62, %v3279_v61 }
 0x73c   :  { %5585 = vmatmul.mubr.msk.f32.gmra.mrb[26].mxu1 %vm57_vm3, %v5572_v6  ;;  %v5646_v6 = vld [vmem:[%s9984_s5 + $0x130] sm:$0xff]  ;;  %6846 = vmatprep.subr.bf16.mxu0 %v7334_v53  ;;  %v3819_v62 = vld [vmem:[%s9982_s3 + $0x48] sm:$0xff] }
 0x73d   :  { %2895 = vmatprep.mubr.f32.mxu1 %v7333_v7  ;;  %6813 = vmatpush1.bf16.msk.msra.mxu1 %vm7419_vm2, %v6811_v8  ;;  %v5647_v8 = vld [vmem:[%s9984_s5 + $0x138] sm:$0xff] }
 0x73e   :  { %6815 = vmatprep.subr.bf16.mxu1 %v6814_v9  ;;  %v6847_v9 = vpack.c.bf16 %v3262_v4, %v3261_v3  ;;  %v3281_v3 = vld [vmem:[%s9984_s5 + $0xe0] sm:$0xff]  ;;  %v3282_v4 = vld [vmem:[%s9984_s5 + $0xe8] sm:$0xff] }
 0x740   :  { %5586 = vmatmul.mubr.msk.f32.gmra.mrb[28].mxu1 %vm57_vm3, %v5573_v10  ;;  %v6892_v10 = vpack.c.bf16 %v5647_v8, %v5646_v6  ;;  %6848 = vmatpush1.bf16.msra.mxu0 %v6847_v9  ;;  %v5666_v6 = vld [vmem:[%s9984_s5 + $0x1d0] sm:$0xff]  ;;  %v6877_v8 = vpack.c.bf16 %v3282_v4, %v3281_v3  ;;  %v5667_v9 = vld [vmem:[%s9984_s5 + $0x1d8] sm:$0xff]  ;;  %v3823_v4 = vld [vmem:[%s9982_s3 + $0x68] sm:$0xff] }
 0x741   :  { %2998 = vmatprep.mubr.f32.mxu1 %v7333_v7  ;;  %6849 = vmatprep.subr.bf16.mxu0 %v7334_v53 }
 0x744   :  { %5600 = vmatmul.mubr.msk.f32.vlgmr.msra.gmra.mrb[24].mxu1 %vm57_vm3, %v5587_v15  ;;  %v6850_v15 = vpack.c.bf16 %v3264_v12, %v3263_v11  ;;  %v2584_v11 = vld [vmem:[%s9991_s12] sm:$0x1] }
 0x745   :  { %3004 = vmatprep.mubr.f32.mxu1 %v7333_v7  ;;  %6817 = vmatpush1.bf16.msra.mxu1 %v6816_v16  ;;  %v6895_v16 = vpack.c.bf16 %v5649_v14, %v5648_v13 }
 0x746   :  { %6820 = vmatprep.subr.msk.bf16.mxu1 %vm7419_vm2, %v6818_v17  ;;  %v3265_v17 = vld [vmem:[%s9984_s5 + $0x60] sm:$0xff]  ;;  %6851 = vmatpush1.bf16.msra.mxu0 %v6850_v15 }
 0x747   :  { %v6853_v21 = vpack.c.bf16 %v3266_v18, %v3265_v17  ;;  %6852 = vmatprep.subr.bf16.mxu0 %v7334_v53  ;;  %v2665_v15 = vld [vmem:[%s9981_s2] sm:$0x3] }
 0x748   :  { %5601 = vmatmul.mubr.msk.f32.gmra.mrb[26].mxu1 %vm57_vm3, %v5588_v22  ;;  %v6898_v22 = vpack.c.bf16 %v5651_v20, %v5650_v19  ;;  %v2780_v17 = vrot.slane %v2665_v15, %v7837_v54 }
 0x749   :  { %3010 = vmatprep.mubr.f32.mxu1 %v7333_v7  ;;  %6823 = vmatpush1.bf16.msk.msra.mxu1 %vm7419_vm2, %v6821_v23  ;;  %v3267_v23 = vld [vmem:[%s9984_s5 + $0x70] sm:$0xff] }
 0x74a   :  { %6825 = vmatprep.subr.bf16.mxu1 %v6824_v24  ;;  %v3268_v24 = vld [vmem:[%s9984_s5 + $0x78] sm:$0xff]  ;;  %6854 = vmatpush1.bf16.msra.mxu0 %v6853_v21 }
 0x74b   :  { %v6856_v27 = vpack.c.bf16 %v3268_v24, %v3267_v23  ;;  %6855 = vmatprep.subr.bf16.mxu0 %v7334_v53 }
 0x74c   :  { %5602 = vmatmul.mubr.msk.f32.gmra.mrb[28].mxu1 %vm57_vm3, %v5589_v25  ;;  %v5652_v25 = vld [vmem:[%s9984_s5 + $0x160] sm:$0xff] }
 0x74d   :  { %3113 = vmatprep.mubr.f32.mxu1 %v7333_v7  ;;  %v6901_v28 = vpack.c.bf16 %v5653_v26, %v5652_v25 }
 0x74e   :  { %6857 = vmatpush1.bf16.msra.mxu0 %v6856_v27 }
 0x74f   :  { %6858 = vmatprep.subr.bf16.mxu0 %v7334_v53 }
 0x750   :  { %5616 = vmatmul.mubr.msk.f32.vlgmr.msra.gmra.mrb[24].mxu1 %vm57_vm3, %v5603_v30  ;;  %v3270_v30 = vld [vmem:[%s9984_s5 + $0x88] sm:$0xff] }
 0x751   :  { %3119 = vmatprep.mubr.f32.mxu1 %v7333_v7  ;;  %6827 = vmatpush1.bf16.msra.mxu1 %v6826_v31  ;;  %v5654_v31 = vld [vmem:[%s9984_s5 + $0x170] sm:$0xff]  ;;  %v6859_v33 = vpack.c.bf16 %v3270_v30, %v3269_v29  ;;  %v3482_v30 = vld [vmem:[%s9985_s6] sm:$0xff] }
 0x752   :  { %6830 = vmatprep.subr.msk.bf16.mxu1 %vm7419_vm2, %v6828_v32  ;;  %v5655_v32 = vld [vmem:[%s9984_s5 + $0x178] sm:$0xff] }
 0x753   :  { %v6904_v34 = vpack.c.bf16 %v5655_v32, %v5654_v31  ;;  %6860 = vmatpush1.bf16.msra.mxu0 %v6859_v33 }
 0x754   :  { %5617 = vmatmul.mubr.msk.f32.gmra.mrb[26].mxu1 %vm57_vm3, %v5604_v35  ;;  %v3271_v35 = vld [vmem:[%s9984_s5 + $0x90] sm:$0xff]  ;;  %6861 = vmatprep.subr.bf16.mxu0 %v7334_v53 }
 0x755   :  { %3125 = vmatprep.mubr.f32.mxu1 %v7333_v7  ;;  %6833 = vmatpush1.bf16.msk.msra.mxu1 %vm7419_vm2, %v6831_v36  ;;  %v3272_v36 = vld [vmem:[%s9984_s5 + $0x98] sm:$0xff] }
 0x756   :  { %6879 = vmatprep.subr.bf16.mxu1 %v7334_v53 }
 0x758   :  { %5618 = vmatmul.mubr.msk.f32.gmra.mrb[28].mxu1 %vm57_vm3, %v5605_v37  ;;  %v5656_v37 = vld [vmem:[%s9984_s5 + $0x180] sm:$0xff] }
 0x759   :  { %3228 = vmatprep.mubr.f32.mxu1 %v7333_v7 }
 0x75c   :  { %5632 = vmatmul.mubr.msk.f32.vlgmr.msra.gmra.mrb[24].mxu1 %vm57_vm3, %v5619_v38  ;;  %v5657_v38 = vld [vmem:[%s9984_s5 + $0x188] sm:$0xff] }
 0x75d   :  { %3234 = vmatprep.mubr.f32.mxu1 %v7333_v7  ;;  %6881 = vmatpush1.bf16.msra.mxu1 %v6880_v45  ;;  %v6910_v45 = vpack.c.bf16 %v5659_v43, %v5658_v42 }
 0x75e   :  { %6882 = vmatprep.subr.bf16.mxu1 %v7334_v53 }
 0x760   :  { %5633 = vmatmul.mubr.msk.f32.gmra.mrb[26].mxu1 %vm57_vm3, %v5620_v39  ;;  %v6862_v39 = vpack.c.bf16 %v3272_v36, %v3271_v35 }
 0x761   :  { %3240 = vmatprep.mubr.f32.mxu1 %v7333_v7  ;;  %6884 = vmatpush1.bf16.msra.mxu1 %v6883_v55  ;;  %v3278_v55 = vld [vmem:[%s9984_s5 + $0xc8] sm:$0xff] }
 0x762   :  { %6885 = vmatprep.subr.bf16.mxu1 %v7334_v53  ;;  %6863 = vmatpush1.bf16.msra.mxu0 %v6862_v39  ;;  %v6871_v59 = vpack.c.bf16 %v3278_v55, %v3277_v52  ;;  %v3815_v55 = vld [vmem:[%s9982_s3 + $0x28] sm:$0xff] }
 0x763   :  { %6864 = vmatprep.subr.bf16.mxu0 %v7334_v53 }
 0x764   :  { %5634 = vmatmul.mubr.msk.f32.gmra.mrb[28].mxu1 %vm57_vm3, %v5621_v5  ;;  %v6907_v5 = vpack.c.bf16 %v5657_v38, %v5656_v37 }
 0x765   :  { %6887 = vmatpush1.bf16.msra.mxu1 %v6886_v60  ;;  %v6916_v60 = vpack.c.bf16 %v5663_v58, %v5662_v57  ;;  %v3817_v57 = vld [vmem:[%s9982_s3 + $0x38] sm:$0xff] }
 0x766   :  { %6888 = vmatprep.subr.bf16.mxu1 %v7334_v53  ;;  %6866 = vmatpush1.bf16.msra.mxu0 %v6865_v44  ;;  %v3483_v44 = vld [vmem:[%s9985_s6 + $0x8] sm:$0xf]  ;;  %v6944_v58 = vpack.c.bf16 %v3817_v57, %v3815_v55  ;;  %v4358_v57 = vld [vmem:[%s9986_s7 + $0x18] sm:$0xff] }
 0x767   :  { %6867 = vmatprep.subr.bf16.mxu0 %v7334_v53 }
 0x769   :  { %6890 = vmatpush1.bf16.msra.mxu1 %v6889_v2  ;;  %v6919_v2 = vpack.c.bf16 %v5665_v0, %v5664_v63  ;;  %v3821_v63 = vld [vmem:[%s9982_s3 + $0x58] sm:$0xff]  ;;  %v3818_v0 = vld [vmem:[%s9982_s3 + $0x40] sm:$0xff] }
 0x76a   :  { %6891 = vmatprep.subr.bf16.mxu1 %v7334_v53  ;;  %6869 = vmatpush1.bf16.msra.mxu0 %v6868_v50  ;;  %v3810_v50 = vld [vmem:[%s9982_s3] sm:$0xff] }
 0x76b   :  { %6870 = vmatprep.subr.bf16.mxu0 %v7334_v53 }
 0x76d   :  { %6893 = vmatpush1.bf16.msra.mxu1 %v6892_v10  ;;  %v6922_v10 = vpack.c.bf16 %v5667_v9, %v5666_v6  ;;  %v3825_v6 = vld [vmem:[%s9982_s3 + $0x78] sm:$0xff]  ;;  %v3822_v9 = vld [vmem:[%s9982_s3 + $0x60] sm:$0xff] }
 0x76e   :  { %6894 = vmatprep.subr.bf16.mxu1 %v7334_v53  ;;  %6872 = vmatpush1.bf16.msra.mxu0 %v6871_v59  ;;  %v3814_v59 = vld [vmem:[%s9982_s3 + $0x20] sm:$0xff] }
 0x76f   :  { %6873 = vmatprep.subr.bf16.mxu0 %v7334_v53 }
 0x771   :  { %6896 = vmatpush1.bf16.msra.mxu1 %v6895_v16  ;;  %v2784_v16 = vrot.slane %v2665_v15, %v7842_v56  ;;  %v3826_v15 = vld [vmem:[%s9982_s3 + $0x80] sm:$0xff] }
 0x772   :  { %6897 = vmatprep.subr.bf16.mxu1 %v7334_v53  ;;  %6875 = vmatpush1.bf16.msra.mxu0 %v6874_v1  ;;  %v6948_v1 = vpack.c.bf16 %v3821_v63, %v3819_v62  ;;  %v4359_v63 = vld [vmem:[%s9986_s7 + $0x20] sm:$0xff] }
 0x773   :  { %6876 = vmatprep.subr.bf16.mxu0 %v7334_v53 }
 0x775   :  { %6899 = vmatpush1.bf16.msra.mxu1 %v6898_v22 }
 0x776   :  { %6900 = vmatprep.subr.bf16.mxu1 %v7334_v53  ;;  %6878 = vmatpush1.bf16.msra.mxu0 %v6877_v8  ;;  %v6952_v8 = vpack.c.bf16 %v3825_v6, %v3823_v4  ;;  %v5688_v4 = vld [vmem:[%s9982_s3 + $0x120] sm:$0xff] }
 0x779   :  { %6902 = vmatpush1.bf16.msra.mxu1 %v6901_v28 }
 0x77a   :  { %6903 = vmatprep.subr.bf16.mxu1 %v7334_v53 }
 0x77d   :  { %6905 = vmatpush1.bf16.msra.mxu1 %v6904_v34 }
 0x77e   :  { %6906 = vmatprep.subr.bf16.mxu1 %v7334_v53 }
 0x781   :  { %6908 = vmatpush1.bf16.msra.mxu1 %v6907_v5 }
 0x782   :  { %6909 = vmatprep.subr.bf16.mxu1 %v7334_v53 }
 0x785   :  { %6911 = vmatpush1.bf16.msra.mxu1 %v6910_v45  ;;  %v5673_v45 = vld [vmem:[%s9985_s6 + $0x10] sm:$0xff] }
 0x786   :  { %6912 = vmatprep.subr.bf16.mxu1 %v7334_v53 }
 0x789   :  { %6914 = vmatpush1.bf16.msra.mxu1 %v6913_v51  ;;  %v3812_v51 = vld [vmem:[%s9982_s3 + $0x10] sm:$0xff] }
 0x78a   :  { %6915 = vmatprep.subr.bf16.mxu1 %v7334_v53  ;;  %v6942_v52 = vpack.c.bf16 %v3812_v51, %v3810_v50  ;;  %v4355_v50 = vld [vmem:[%s9986_s7] sm:$0xff]  ;;  %v4356_v51 = vld [vmem:[%s9986_s7 + $0x8] sm:$0xff] }
 0x78b   :  { %v7081_v55 = vpack.c.bf16 %v4356_v51, %v4355_v50  ;;  %v5706_v50 = vld [vmem:[%s9982_s3 + $0x1b0] sm:$0xff]  ;;  %v5708_v51 = vld [vmem:[%s9982_s3 + $0x1c0] sm:$0xff] }
 0x78d   :  { %6917 = vmatpush1.bf16.msra.mxu1 %v6916_v60  ;;  %v3816_v60 = vld [vmem:[%s9982_s3 + $0x30] sm:$0xff] }
 0x78e   :  { %6918 = vmatprep.subr.bf16.mxu1 %v7334_v53  ;;  %v6946_v61 = vpack.c.bf16 %v3816_v60, %v3814_v59  ;;  %v5684_v59 = vld [vmem:[%s9982_s3 + $0x100] sm:$0xff]  ;;  %v5687_v60 = vld [vmem:[%s9982_s3 + $0x118] sm:$0xff] }
 0x791   :  { %6920 = vmatpush1.bf16.msra.mxu1 %v6919_v2  ;;  %v3820_v2 = vld [vmem:[%s9982_s3 + $0x50] sm:$0xff] }
 0x792   :  { %6921 = vmatprep.subr.bf16.mxu1 %v7334_v53  ;;  %v6950_v3 = vpack.c.bf16 %v3820_v2, %v3818_v0  ;;  %v4360_v0 = vld [vmem:[%s9986_s7 + $0x28] sm:$0xff] }
 0x795   :  { %6923 = vmatpush1.bf16.msra.mxu1 %v6922_v10  ;;  %v3824_v10 = vld [vmem:[%s9982_s3 + $0x70] sm:$0xff] }
 0x796   :  { %6941 = vmatprep.subr.bf16.mxu1 %v6940_v49 }
 0x7f7   :  { %v2659_v12 = vpop.f32.mrb[22].mxu1 }
 0x7f8   :  { %v2660_v13 = vadd.f32 %v2659_v12, %v2584_v11  ;;  %v6193_v14 = vpop.f32.mrb[23].mxu1  ;;  %v6954_v11 = vpack.c.bf16 %v3824_v10, %v3822_v9  ;;  %v3827_v12 = vld [vmem:[%s9982_s3 + $0x88] sm:$0xff]  ;;  %v7087_v10 = vpack.c.bf16 %v4360_v0, %v4359_v63  ;;  %v5713_v63 = vld [vmem:[%s9982_s3 + $0x1e0] sm:$0xff]  ;;  %v5715_v0 = vld [vmem:[%s9982_s3 + $0x1f0] sm:$0xff] }
 0x7f9   :  { %v5693_v9 = vld [vmem:[%s9982_s3 + $0x148] sm:$0xff] }
 0x7fa   :  { %2664 = vst.msk [vmem:[#allocation4] sm:$0x1] %vm2663_vm15, %v2660_v13  ;;  %v3829_v13 = vld [vmem:[%s9982_s3 + $0x98] sm:$0xff] }
 0x7fb   :  { %v6956_v14 = vpack.c.bf16 %v3829_v13, %v3827_v12  ;;  %v4362_v12 = vld [vmem:[%s9986_s7 + $0x38] sm:$0xff] }
 0x82f   :  { %v3230_v18 = vpop.f32.mrb[24].mxu1 }
 0x830   :  { %v3232_v19 = vpop.f32.mrb[25].mxu1  ;;  %v7224_v21 = vadd.f32 %v3230_v18, %v2780_v17  ;;  %v3831_v18 = vld [vmem:[%s9982_s3 + $0xa8] sm:$0xff] }
 0x831   :  { %v7225_v20 = vadd.f32 %v3232_v19, %v2784_v16  ;;  %v3833_v19 = vld [vmem:[%s9982_s3 + $0xb8] sm:$0xff] }
 0x833   :  { %v3236_v22 = vpop.f32.mrb[26].mxu1  ;;  %5635 = vmatprep.mubr.msk.f32.mxu0 %vm668_vm4, %v7225_v20  ;;  %5668 = vmatprep.mubr.msk.f32.mxu1 %vm668_vm4, %v7225_v20  ;;  %v6960_v20 = vpack.c.bf16 %v3833_v19, %v3831_v18  ;;  %v5697_v18 = vld [vmem:[%s9982_s3 + $0x168] sm:$0xff] }
 0x834   :  { %v3238_v23 = vpop.f32.mrb[27].mxu1  ;;  %3357 = vmatmul.mubr.f32.vlgmr.msra.gmra.mrb[26].mxu0 %v7224_v21  ;;  %3467 = vmatmul.mubr.f32.vlgmr.msra.gmra.mrb[30].mxu1 %v7224_v21  ;;  %v7226_v25 = vadd.f32 %v3236_v22, %v2780_v17  ;;  %v3830_v21 = vld [vmem:[%s9982_s3 + $0xa0] sm:$0xff]  ;;  %v3832_v22 = vld [vmem:[%s9982_s3 + $0xb0] sm:$0xff] }
 0x835   :  { %v7227_v24 = vadd.f32 %v3238_v23, %v2784_v16  ;;  %6943 = vmatpush1.bf16.msra.mxu1 %v6942_v52  ;;  %v6962_v23 = vpack.c.bf16 %v3832_v22, %v3830_v21  ;;  %v4357_v52 = vld [vmem:[%s9986_s7 + $0x10] sm:$0xff]  ;;  %v4364_v21 = vld [vmem:[%s9986_s7 + $0x48] sm:$0xff] }
 0x836   :  { %6945 = vmatprep.subr.bf16.mxu1 %v6944_v58  ;;  %v5682_v58 = vld [vmem:[%s9982_s3 + $0xf0] sm:$0xff]  ;;  %v7084_v62 = vpack.c.bf16 %v4358_v57, %v4357_v52  ;;  %v4372_v57 = vld [vmem:[%s9986_s7 + $0x88] sm:$0xff] }
 0x837   :  { %v3242_v26 = vpop.f32.mrb[28].mxu1  ;;  %5636 = vmatprep.mubr.msk.f32.mxu0 %vm668_vm4, %v7227_v24  ;;  %5669 = vmatprep.mubr.msk.f32.mxu1 %vm668_vm4, %v7227_v24  ;;  %v3835_v24 = vld [vmem:[%s9982_s3 + $0xc8] sm:$0xff] }
 0x838   :  { %v3244_v27 = vpop.f32.mrb[29].mxu1  ;;  %3362 = vmatmul.mubr.f32.gmra.mrb[28].mxu0 %v7226_v25  ;;  %3472 = vmatmul.mubr.f32.gmra.mrb[32].mxu1 %v7226_v25  ;;  %v7228_v29 = vadd.f32 %v3242_v26, %v2780_v17  ;;  %v3837_v25 = vld [vmem:[%s9982_s3 + $0xd8] sm:$0xff] }
 0x839   :  { %v7229_v28 = vadd.f32 %v3244_v27, %v2784_v16  ;;  %6947 = vmatpush1.bf16.msra.mxu1 %v6946_v61  ;;  %v3828_v16 = vld [vmem:[%s9982_s3 + $0x90] sm:$0xff]  ;;  %v6964_v26 = vpack.c.bf16 %v3837_v25, %v3835_v24  ;;  %v3834_v27 = vld [vmem:[%s9982_s3 + $0xc0] sm:$0xff]  ;;  %v5689_v61 = vld [vmem:[%s9982_s3 + $0x128] sm:$0xff] }
 0x83a   :  { %6949 = vmatprep.subr.bf16.mxu1 %v6948_v1  ;;  %v6958_v17 = vpack.c.bf16 %v3828_v16, %v3826_v15  ;;  %v6970_v1 = vpack.c.bf16 %v5684_v59, %v5682_v58  ;;  %v6972_v2 = vpack.c.bf16 %v5689_v61, %v5687_v60  ;;  %v5690_v15 = vld [vmem:[%s9982_s3 + $0x130] sm:$0xff]  ;;  %v5692_v16 = vld [vmem:[%s9982_s3 + $0x140] sm:$0xff]  ;;  %v6994_v58 = vpack.c.bf16 %v5708_v51, %v5706_v50  ;;  %v5711_v59 = vld [vmem:[%s9982_s3 + $0x1d8] sm:$0xff] }
 0x83b   :  { %5637 = vmatprep.mubr.msk.f32.mxu0 %vm668_vm4, %v7229_v28  ;;  %5670 = vmatprep.mubr.msk.f32.mxu1 %vm668_vm4, %v7229_v28  ;;  %v3836_v28 = vld [vmem:[%s9982_s3 + $0xd0] sm:$0xff]  ;;  %v6978_v22 = vpack.c.bf16 %v5692_v16, %v5690_v15  ;;  %v5696_v25 = vld [vmem:[%s9982_s3 + $0x160] sm:$0xff]  ;;  %v5714_v60 = vld [vmem:[%s9982_s3 + $0x1e8] sm:$0xff] }
 0x83c   :  { %3367 = vmatmul.mubr.f32.gmra.mrb[30].mxu0 %v7228_v29  ;;  %3477 = vmatmul.mubr.f32.gmra.mrb[34].mxu1 %v7228_v29  ;;  %v6966_v29 = vpack.c.bf16 %v3836_v28, %v3834_v27  ;;  %v5694_v24 = vld [vmem:[%s9982_s3 + $0x150] sm:$0xff]  ;;  %v5701_v27 = vld [vmem:[%s9982_s3 + $0x188] sm:$0xff]  ;;  %v5716_v61 = vld [vmem:[%s9982_s3 + $0x1f8] sm:$0xff] }
 0x83d   :  { %3907 = vmatprep.mubr.f32.mxu1 %v7333_v7  ;;  %6200 = vmatprep.mubr.msk.f32.mxu0 %vm871_vm5, %v3482_v30  ;;  %v5721_v16 = vld [vmem:[%s9982_s3 + $0x220] sm:$0xff] }
 0x83e   :  { %6951 = vmatpush1.bf16.msra.mxu1 %v6950_v3  ;;  %v5686_v3 = vld [vmem:[%s9982_s3 + $0x110] sm:$0xff] }
 0x83f   :  { %6953 = vmatprep.subr.bf16.mxu1 %v6952_v8  ;;  %v5691_v8 = vld [vmem:[%s9982_s3 + $0x138] sm:$0xff]  ;;  %v6974_v13 = vpack.c.bf16 %v5688_v4, %v5686_v3  ;;  %v5710_v3 = vld [vmem:[%s9982_s3 + $0x1d0] sm:$0xff]  ;;  %v6996_v4 = vpack.c.bf16 %v5716_v61, %v5714_v60  ;;  %v5755_v60 = vld [vmem:[%s9982_s3 + $0x328] sm:$0xff] }
 0x842   :  { %6955 = vmatpush1.bf16.msra.mxu1 %v6954_v11  ;;  %v4361_v11 = vld [vmem:[%s9986_s7 + $0x30] sm:$0xff] }
 0x843   :  { %6957 = vmatprep.subr.bf16.mxu1 %v6956_v14  ;;  %v6976_v14 = vpack.c.bf16 %v5693_v9, %v5691_v8  ;;  %v7090_v19 = vpack.c.bf16 %v4362_v12, %v4361_v11  ;;  %v5717_v9 = vld [vmem:[%s9982_s3 + $0x200] sm:$0xff]  ;;  %v5722_v12 = vld [vmem:[%s9982_s3 + $0x228] sm:$0xff] }
 0x846   :  { %6959 = vmatpush1.bf16.msra.mxu1 %v6958_v17  ;;  %v5695_v17 = vld [vmem:[%s9982_s3 + $0x158] sm:$0xff] }
 0x847   :  { %6961 = vmatprep.subr.bf16.mxu1 %v6960_v20  ;;  %v4363_v20 = vld [vmem:[%s9986_s7 + $0x40] sm:$0xff] }
 0x848   :  { %v7093_v28 = vpack.c.bf16 %v4364_v21, %v4363_v20 }
 0x84a   :  { %6963 = vmatpush1.bf16.msra.mxu1 %v6962_v23  ;;  %v6980_v23 = vpack.c.bf16 %v5697_v18, %v5695_v17  ;;  %v5723_v17 = vld [vmem:[%s9982_s3 + $0x230] sm:$0xff]  ;;  %v5726_v18 = vld [vmem:[%s9982_s3 + $0x248] sm:$0xff] }
 0x84b   :  { %6965 = vmatprep.subr.bf16.mxu1 %v6964_v26  ;;  %v5699_v26 = vld [vmem:[%s9982_s3 + $0x178] sm:$0xff]  ;;  %v7006_v20 = vpack.c.bf16 %v5723_v17, %v5721_v16  ;;  %v5767_v16 = vld [vmem:[%s9982_s3 + $0x388] sm:$0xff] }
 0x84e   :  { %6967 = vmatpush1.bf16.msra.mxu1 %v6966_v29  ;;  %v4365_v29 = vld [vmem:[%s9986_s7 + $0x50] sm:$0xff] }
 0x907   :  { %v3358_v31 = vpop.f32.mrb[26].mxu0  ;;  %v3468_v32 = vpop.f32.mrb[30].mxu1 }
 0x908   :  { %v3360_v33 = vpop.f32.mrb[27].mxu0  ;;  %v3470_v34 = vpop.f32.mrb[31].mxu1 }
 0x909   :  { %v3838_v33 = vld [vmem:[%s9982_s3 + $0xe0] sm:$0xff] }
 0x90b   :  { %v3363_v35 = vpop.f32.mrb[28].mxu0  ;;  %v3473_v36 = vpop.f32.mrb[32].mxu1 }
 0x90c   :  { %v6924_v37 = vpack.c.bf16 %v3363_v35, %v3358_v31  ;;  %v6932_v38 = vpack.c.bf16 %v3473_v36, %v3468_v32  ;;  %v3365_v39 = vpop.f32.mrb[29].mxu0  ;;  %v3475_v5 = vpop.f32.mrb[33].mxu1  ;;  %v5683_v31 = vld [vmem:[%s9982_s3 + $0xf8] sm:$0xff]  ;;  %v5685_v32 = vld [vmem:[%s9982_s3 + $0x108] sm:$0xff] }
 0x90d   :  { %v6968_v34 = vpack.c.bf16 %v5685_v32, %v5683_v31  ;;  %v6982_v31 = vpack.c.bf16 %v5696_v25, %v5694_v24  ;;  %v6984_v32 = vpack.c.bf16 %v5701_v27, %v5699_v26  ;;  %v5730_v24 = vld [vmem:[%s9982_s3 + $0x268] sm:$0xff]  ;;  %v5732_v25 = vld [vmem:[%s9982_s3 + $0x278] sm:$0xff] }
 0x90e   :  { %6925 = vmatprep.subr.bf16.mxu0 %v6924_v37  ;;  %v7012_v27 = vpack.c.bf16 %v5732_v25, %v5730_v24  ;;  %v5768_v25 = vld [vmem:[%s9982_s3 + $0x390] sm:$0xff] }
 0x90f   :  { %v3368_v40 = vpop.f32.mrb[30].mxu0  ;;  %v3478_v41 = vpop.f32.mrb[34].mxu1  ;;  %6927 = vmatpush3.bf16.msra.mxu0 %v6924_v37 }
 0x910   :  { %v3370_v42 = vpop.f32.mrb[31].mxu0  ;;  %v3480_v43 = vpop.f32.mrb[35].mxu1  ;;  %6198 = vmatprep.subr.mxu0 %v3368_v40 }
 0x913   :  { %6199 = vmatpush3.msra.mxu0 %v3368_v40 }
 0x914   :  { %6929 = vmatprep.subr.bf16.mxu0 %v6924_v37  ;;  %6201 = vmatmul.mubr.msk.f32.vlgmr.msra.gmra.mrb[32].mxu0 %vm871_vm5, %v3483_v44 }
 0x915   :  { %6931 = vmatpush3.bf16.msra.mxu0 %v6924_v37  ;;  %6209 = vmatprep.mubr.msk.f32.mxu0 %vm871_vm5, %v5673_v45 }
 0x916   :  { %6207 = vmatprep.subr.mxu0 %v3368_v40 }
 0x919   :  { %6208 = vmatpush3.msra.mxu0 %v3368_v40 }
 0x91a   :  { %6210 = vmatmul.mubr.msk.f32.vlgmr.msra.gmra.mrb[34].mxu0 %vm871_vm5, %v5674_v46  ;;  %6933 = vmatprep.subr.bf16.mxu0 %v6932_v38 }
 0x91b   :  { %6935 = vmatpush3.bf16.msra.mxu0 %v6932_v38  ;;  %6218 = vmatprep.mubr.msk.f32.mxu0 %vm871_vm5, %v3482_v30  ;;  %v3839_v30 = vld [vmem:[%s9982_s3 + $0xe8] sm:$0xff] }
 0x91c   :  { %6216 = vmatprep.subr.mxu0 %v3478_v41  ;;  %3871 = vmatprep.subr.mxu1 %v3839_v30  ;;  %v4366_v30 = vld [vmem:[%s9986_s7 + $0x58] sm:$0xff] }
 0x91d   :  { %3872 = vmatpush1.msra.mxu1 %v3838_v33  ;;  %v5698_v33 = vld [vmem:[%s9982_s3 + $0x170] sm:$0xff] }
 0x91e   :  { %6969 = vmatprep.subr.bf16.mxu1 %v6968_v34  ;;  %v5700_v34 = vld [vmem:[%s9982_s3 + $0x180] sm:$0xff] }
 0x91f   :  { %6217 = vmatpush3.msra.mxu0 %v3478_v41 }
 0x920   :  { %6937 = vmatprep.subr.bf16.mxu0 %v6932_v38  ;;  %6219 = vmatmul.mubr.msk.f32.vlgmr.msra.gmra.mrb[36].mxu0 %vm871_vm5, %v3483_v44 }
 0x921   :  { %6939 = vmatpush3.bf16.msra.mxu0 %v6932_v38  ;;  %6227 = vmatprep.mubr.msk.f32.mxu0 %vm871_vm5, %v5673_v45 }
 0x922   :  { %6225 = vmatprep.subr.mxu0 %v3478_v41 }
 0x925   :  { %6226 = vmatpush3.msra.mxu0 %v3478_v41 }
 0x926   :  { %6228 = vmatmul.mubr.msk.f32.vlgmr.msra.gmra.mrb[38].mxu0 %vm871_vm5, %v5674_v46  ;;  %7080 = vmatprep.subr.bf16.mxu0 %v7334_v53 }
 0x927   :  { %7082 = vmatpush1.bf16.msra.mxu0 %v7081_v55  ;;  %v4371_v55 = vld [vmem:[%s9986_s7 + $0x80] sm:$0xff] }
 0x928   :  { %7083 = vmatprep.subr.bf16.mxu0 %v7334_v53 }
 0x92b   :  { %7085 = vmatpush1.bf16.msra.mxu0 %v7084_v62  ;;  %v7105_v62 = vpack.c.bf16 %v4372_v57, %v4371_v55  ;;  %v5748_v55 = vld [vmem:[%s9982_s3 + $0x2f0] sm:$0xff]  ;;  %v5750_v57 = vld [vmem:[%s9982_s3 + $0x300] sm:$0xff] }
 0x92c   :  { %7086 = vmatprep.subr.bf16.mxu0 %v7334_v53  ;;  %v7030_v61 = vpack.c.bf16 %v5750_v57, %v5748_v55  ;;  %v5792_v55 = vld [vmem:[%s9982_s3 + $0x448] sm:$0xff]  ;;  %v5794_v57 = vld [vmem:[%s9982_s3 + $0x458] sm:$0xff] }
 0x92f   :  { %7088 = vmatpush1.bf16.msra.mxu0 %v7087_v10  ;;  %v5719_v10 = vld [vmem:[%s9982_s3 + $0x210] sm:$0xff] }
 0x930   :  { %7089 = vmatprep.subr.bf16.mxu0 %v7334_v53 }
 0x933   :  { %7091 = vmatpush1.bf16.msra.mxu0 %v7090_v19  ;;  %v5728_v19 = vld [vmem:[%s9982_s3 + $0x258] sm:$0xff] }
 0x934   :  { %7092 = vmatprep.subr.bf16.mxu0 %v7334_v53  ;;  %v7008_v21 = vpack.c.bf16 %v5728_v19, %v5726_v18  ;;  %v5764_v19 = vld [vmem:[%s9982_s3 + $0x370] sm:$0xff] }
 0x937   :  { %7094 = vmatpush1.bf16.msra.mxu0 %v7093_v28  ;;  %v5729_v28 = vld [vmem:[%s9982_s3 + $0x260] sm:$0xff] }
 0x938   :  { %7095 = vmatprep.subr.bf16.mxu0 %v7334_v53 }
 0x9e7   :  { %v6202_v35 = vpop.f32.mrb[32].mxu0 }
 0x9e8   :  { %v3556_v36 = vpop.f32.mrb[33].mxu0 }
 0x9ed   :  { %v6211_v37 = vpop.f32.mrb[34].mxu0 }
 0x9ee   :  { %v3649_v38 = vmax.f32 %v6202_v35, %v6211_v37  ;;  %v3639_v39 = vpop.f32.mrb[35].mxu0  ;;  %v5703_v35 = vld [vmem:[%s9982_s3 + $0x198] sm:$0xff]  ;;  %v7096_v37 = vpack.c.bf16 %v4366_v30, %v4365_v29  ;;  %v5731_v29 = vld [vmem:[%s9982_s3 + $0x270] sm:$0xff]  ;;  %v5734_v30 = vld [vmem:[%s9982_s3 + $0x288] sm:$0xff] }
 0x9ef   :  { %v3648_v5 = vmax.f32 %v3556_v36, %v3639_v39  ;;  %v5705_v36 = vld [vmem:[%s9982_s3 + $0x1a8] sm:$0xff] }
 0x9f0   :  { %v4368_v39 = vld [vmem:[%s9986_s7 + $0x68] sm:$0xff]  ;;  %7097 = vmatpush1.bf16.msra.mxu0 %v7096_v37  ;;  %v5740_v37 = vld [vmem:[%s9982_s3 + $0x2b8] sm:$0xff] }
 0x9f1   :  { %7098 = vmatprep.subr.bf16.mxu0 %v7334_v53 }
 0x9f3   :  { %v6220_v40 = vpop.f32.mrb[36].mxu0 }
 0x9f4   :  { %v3716_v41 = vpop.f32.mrb[37].mxu0 }
 0x9f9   :  { %v6229_v42 = vpop.f32.mrb[38].mxu0 }
 0x9fa   :  { %v3801_v43 = vmax.f32 %v6220_v40, %v6229_v42  ;;  %v3791_v44 = vpop.f32.mrb[39].mxu0  ;;  %v6988_v40 = vpack.c.bf16 %v5705_v36, %v5703_v35  ;;  %v5704_v42 = vld [vmem:[%s9982_s3 + $0x1a0] sm:$0xff]  ;;  %v5735_v35 = vld [vmem:[%s9982_s3 + $0x290] sm:$0xff]  ;;  %v5738_v36 = vld [vmem:[%s9982_s3 + $0x2a8] sm:$0xff] }
 0x9fb   :  { %v3800_v45 = vmax.f32 %v3716_v41, %v3791_v44  ;;  %v5702_v41 = vld [vmem:[%s9982_s3 + $0x190] sm:$0xff]  ;;  %v5709_v44 = vld [vmem:[%s9982_s3 + $0x1c8] sm:$0xff] }
 0x9fc   :  { %v3803_v46 = vmax.f32 %v3649_v38, %v3801_v43  ;;  %v4367_v38 = vld [vmem:[%s9986_s7 + $0x60] sm:$0xff]  ;;  %v5707_v43 = vld [vmem:[%s9982_s3 + $0x1b8] sm:$0xff] }
 0x9fd   :  { %v3802_v47 = vmax.f32 %v3648_v5, %v3800_v45  ;;  %v6986_v5 = vpack.c.bf16 %v5700_v34, %v5698_v33  ;;  %v7099_v45 = vpack.c.bf16 %v4368_v39, %v4367_v38  ;;  %v5733_v34 = vld [vmem:[%s9982_s3 + $0x280] sm:$0xff]  ;;  %v7020_v39 = vpack.c.bf16 %v5740_v37, %v5738_v36 }
 0x9fe   :  { %v3805_v48 = vmax.f32 %v3803_v46, 0.0  ;;  %v4369_v46 = vld [vmem:[%s9986_s7 + $0x70] sm:$0xff]  ;;  %v7018_v38 = vpack.c.bf16 %v5735_v35, %v5733_v34  ;;  %v5782_v34 = vld [vmem:[%s9982_s3 + $0x3f8] sm:$0xff] }
 0x9ff   :  { %v3804_v49 = vmax.f32 %v3802_v47, 0.0  ;;  %v4370_v47 = vld [vmem:[%s9986_s7 + $0x78] sm:$0xff]  ;;  %7100 = vmatpush1.bf16.msra.mxu0 %v7099_v45  ;;  %v5744_v45 = vld [vmem:[%s9982_s3 + $0x2d0] sm:$0xff] }
 0xa00   :  { %3807 = vst.msk [vmem:[#allocation2 + $0x8] sm:$0xf] %vm1197_vm6, %v3805_v48  ;;  %v6990_v48 = vpack.c.bf16 %v5704_v42, %v5702_v41  ;;  %v7102_v52 = vpack.c.bf16 %v4370_v47, %v4369_v46  ;;  %7101 = vmatprep.subr.bf16.mxu0 %v7334_v53  ;;  %v5742_v42 = vld [vmem:[%s9982_s3 + $0x2c8] sm:$0xff]  ;;  %v5746_v46 = vld [vmem:[%s9982_s3 + $0x2e0] sm:$0xff]  ;;  %v5749_v47 = vld [vmem:[%s9982_s3 + $0x2f8] sm:$0xff] }
 0xa01   :  { %3806 = vst.msk [vmem:[#allocation2] sm:$0xff] %vm1195_vm7, %v3804_v49  ;;  %v6992_v49 = vpack.c.bf16 %v5709_v44, %v5707_v43  ;;  %v5745_v43 = vld [vmem:[%s9982_s3 + $0x2d8] sm:$0xff]  ;;  %v5747_v44 = vld [vmem:[%s9982_s3 + $0x2e8] sm:$0xff]  ;;  %v7026_v51 = vpack.c.bf16 %v5746_v46, %v5744_v45  ;;  %v5772_v35 = vld [vmem:[%s9982_s3 + $0x3b0] sm:$0xff] }
 0xa02   :  { %v7024_v50 = vpack.c.bf16 %v5747_v44, %v5745_v43  ;;  %v5783_v45 = vld [vmem:[%s9982_s3 + $0x400] sm:$0xff]  ;;  %v5785_v46 = vld [vmem:[%s9982_s3 + $0x410] sm:$0xff] }
 0xa03   :  { %7103 = vmatpush1.bf16.msra.mxu0 %v7102_v52 }
 0xa04   :  { %7104 = vmatprep.subr.bf16.mxu0 %v7334_v53 }
 0xa07   :  { %7106 = vmatpush1.bf16.msra.mxu0 %v7105_v62 }
 0xa08   :  { %v3809_v6 = vld [vmem:[#allocation2] sm:$0xff]  ;;  %7107 = vmatprep.subr.bf16.mxu0 %v7334_v53 }
 0xa09   :  { %5681 = vmatmul.mubr.msk.f32.vlgmr.msra.gmra.mrb[36].mxu1 %vm1195_vm7, %v3809_v6  ;;  %v6998_v6 = vpack.c.bf16 %v5715_v0, %v5713_v63  ;;  %v3927_v11 = vld [vmem:[#allocation2 + $0x1] sm:$0xff]  ;;  %v5752_v63 = vld [vmem:[%s9982_s3 + $0x310] sm:$0xff] }
 0xa0a   :  { %6971 = vmatpush1.bf16.msra.mxu1 %v6970_v1  ;;  %4025 = vmatprep.mubr.f32.mxu1 %v7333_v7  ;;  %v5718_v1 = vld [vmem:[%s9982_s3 + $0x208] sm:$0xff]  ;;  %v5754_v0 = vld [vmem:[%s9982_s3 + $0x320] sm:$0xff] }
 0xa0b   :  { %6973 = vmatprep.subr.bf16.mxu1 %v6972_v2  ;;  %v5720_v2 = vld [vmem:[%s9982_s3 + $0x218] sm:$0xff] }
 0xa0c   :  { %v7000_v8 = vpack.c.bf16 %v5720_v2, %v5718_v1  ;;  %v5757_v1 = vld [vmem:[%s9982_s3 + $0x338] sm:$0xff]  ;;  %v5759_v2 = vld [vmem:[%s9982_s3 + $0x348] sm:$0xff] }
 0xa0e   :  { %6975 = vmatpush1.bf16.msra.mxu1 %v6974_v13  ;;  %v5724_v13 = vld [vmem:[%s9982_s3 + $0x238] sm:$0xff] }
 0xa0f   :  { %6977 = vmatprep.subr.bf16.mxu1 %v6976_v14  ;;  %v7002_v14 = vpack.c.bf16 %v5719_v10, %v5717_v9  ;;  %v7004_v15 = vpack.c.bf16 %v5724_v13, %v5722_v12  ;;  %v5761_v9 = vld [vmem:[%s9982_s3 + $0x358] sm:$0xff]  ;;  %v5763_v10 = vld [vmem:[%s9982_s3 + $0x368] sm:$0xff]  ;;  %v5760_v13 = vld [vmem:[%s9982_s3 + $0x350] sm:$0xff] }
 0xa10   :  { %v7040_v12 = vpack.c.bf16 %v5763_v10, %v5761_v9  ;;  %v5799_v10 = vld [vmem:[%s9982_s3 + $0x480] sm:$0xff] }
 0xa12   :  { %6979 = vmatpush1.bf16.msra.mxu1 %v6978_v22  ;;  %v5725_v22 = vld [vmem:[%s9982_s3 + $0x240] sm:$0xff] }
 0xa13   :  { %6981 = vmatprep.subr.bf16.mxu1 %v6980_v23  ;;  %v5727_v23 = vld [vmem:[%s9982_s3 + $0x250] sm:$0xff] }
 0xa14   :  { %v7010_v26 = vpack.c.bf16 %v5727_v23, %v5725_v22  ;;  %v5771_v22 = vld [vmem:[%s9982_s3 + $0x3a8] sm:$0xff] }
 0xa16   :  { %6983 = vmatpush1.bf16.msra.mxu1 %v6982_v31  ;;  %v5736_v31 = vld [vmem:[%s9982_s3 + $0x298] sm:$0xff] }
 0xa17   :  { %6985 = vmatprep.subr.bf16.mxu1 %v6984_v32  ;;  %v7014_v32 = vpack.c.bf16 %v5731_v29, %v5729_v28  ;;  %v7016_v33 = vpack.c.bf16 %v5736_v31, %v5734_v30  ;;  %v5773_v28 = vld [vmem:[%s9982_s3 + $0x3b8] sm:$0xff]  ;;  %v5776_v29 = vld [vmem:[%s9982_s3 + $0x3c8] sm:$0xff]  ;;  %v5775_v31 = vld [vmem:[%s9982_s3 + $0x3c0] sm:$0xff] }
 0xa18   :  { %v5778_v30 = vld [vmem:[%s9982_s3 + $0x3d8] sm:$0xff] }
 0xa19   :  { %v7052_v36 = vpack.c.bf16 %v5778_v30, %v5776_v29  ;;  %v5809_v29 = vld [vmem:[%s9986_s7 + $0xb0] sm:$0xff]  ;;  %v5811_v30 = vld [vmem:[%s9986_s7 + $0xc0] sm:$0xff] }
 0xa1a   :  { %6987 = vmatpush1.bf16.msra.mxu1 %v6986_v5  ;;  %v5737_v5 = vld [vmem:[%s9982_s3 + $0x2a0] sm:$0xff] }
 0xa1b   :  { %6989 = vmatprep.subr.bf16.mxu1 %v6988_v40  ;;  %v5739_v40 = vld [vmem:[%s9982_s3 + $0x2b0] sm:$0xff] }
 0xa1c   :  { %v7022_v41 = vpack.c.bf16 %v5739_v40, %v5737_v5  ;;  %v5781_v5 = vld [vmem:[%s9982_s3 + $0x3f0] sm:$0xff]  ;;  %v4141_v40 = vld [vmem:[#allocation2 + $0x3] sm:$0xff] }
 0xa1e   :  { %6991 = vmatpush1.bf16.msra.mxu1 %v6990_v48  ;;  %v5751_v48 = vld [vmem:[%s9982_s3 + $0x308] sm:$0xff] }
 0xa1f   :  { %6993 = vmatprep.subr.bf16.mxu1 %v6992_v49  ;;  %v5741_v49 = vld [vmem:[%s9982_s3 + $0x2c0] sm:$0xff]  ;;  %v7028_v52 = vpack.c.bf16 %v5751_v48, %v5749_v47  ;;  %v5788_v47 = vld [vmem:[%s9982_s3 + $0x428] sm:$0xff]  ;;  %v5790_v48 = vld [vmem:[%s9982_s3 + $0x438] sm:$0xff] }
 0xa22   :  { %6995 = vmatpush1.bf16.msra.mxu1 %v6994_v58  ;;  %v4034_v58 = vld [vmem:[#allocation2 + $0x2] sm:$0xff] }
 0xa23   :  { %3989 = vmatprep.subr.mxu1 %v5711_v59  ;;  %v5753_v59 = vld [vmem:[%s9982_s3 + $0x318] sm:$0xff] }
 0xa24   :  { %v7032_v62 = vpack.c.bf16 %v5755_v60, %v5753_v59  ;;  %v7068_v59 = vpack.c.bf16 %v5794_v57, %v5792_v55  ;;  %v5791_v60 = vld [vmem:[%s9982_s3 + $0x440] sm:$0xff] }
 0xa25   :  { %v4538_v55 = vld [vmem:[%s9987_s8] sm:$0xf] }
 0xa26   :  { %3990 = vmatpush1.msra.mxu1 %v5710_v3  ;;  %v7034_v3 = vpack.c.bf16 %v5754_v0, %v5752_v63  ;;  %v5798_v63 = vld [vmem:[%s9982_s3 + $0x478] sm:$0xff] }
 0xa27   :  { %5712 = vmatmul.mubr.msk.f32.vlgmr.msra.gmra.mrb[36].mxu1 %vm1195_vm7, %v3927_v11  ;;  %6997 = vmatprep.subr.bf16.mxu1 %v6996_v4  ;;  %v7036_v4 = vpack.c.bf16 %v5759_v2, %v5757_v1  ;;  %v5795_v2 = vld [vmem:[%s9982_s3 + $0x460] sm:$0xff] }
 0xa28   :  { %6999 = vmatpush1.bf16.msra.mxu1 %v6998_v6  ;;  %4132 = vmatprep.mubr.f32.mxu1 %v7333_v7  ;;  %v5756_v6 = vld [vmem:[%s9982_s3 + $0x330] sm:$0xff] }
 0xa29   :  { %7001 = vmatprep.subr.bf16.mxu1 %v7000_v8  ;;  %v5758_v8 = vld [vmem:[%s9982_s3 + $0x340] sm:$0xff] }
 0xa2a   :  { %v7038_v11 = vpack.c.bf16 %v5758_v8, %v5756_v6  ;;  %v5802_v6 = vld [vmem:[%s9982_s3 + $0x498] sm:$0xff] }
 0xa2c   :  { %7003 = vmatpush1.bf16.msra.mxu1 %v7002_v14  ;;  %v5762_v14 = vld [vmem:[%s9982_s3 + $0x360] sm:$0xff] }
 0xa2d   :  { %7005 = vmatprep.subr.bf16.mxu1 %v7004_v15  ;;  %v5765_v15 = vld [vmem:[%s9982_s3 + $0x378] sm:$0xff]  ;;  %v7042_v17 = vpack.c.bf16 %v5762_v14, %v5760_v13  ;;  %v5804_v13 = vld [vmem:[%s9982_s3 + $0x4a8] sm:$0xff]  ;;  %v5803_v14 = vld [vmem:[%s9982_s3 + $0x4a0] sm:$0xff] }
 0xa2e   :  { %v7044_v18 = vpack.c.bf16 %v5767_v16, %v5765_v15  ;;  %v4248_v15 = vld [vmem:[#allocation2 + $0x4] sm:$0xff]  ;;  %v4373_v16 = vld [vmem:[%s9986_s7 + $0x90] sm:$0xff] }
 0xa30   :  { %7007 = vmatpush1.bf16.msra.mxu1 %v7006_v20  ;;  %v5766_v20 = vld [vmem:[%s9982_s3 + $0x380] sm:$0xff] }
 0xa31   :  { %7009 = vmatprep.subr.bf16.mxu1 %v7008_v21  ;;  %v5769_v21 = vld [vmem:[%s9982_s3 + $0x398] sm:$0xff]  ;;  %v7046_v23 = vpack.c.bf16 %v5766_v20, %v5764_v19  ;;  %v3808_v19 = vld [vmem:[%s9983_s4] sm:$0x3] }
 0xa32   :  { %v7048_v24 = vpack.c.bf16 %v5771_v22, %v5769_v21  ;;  %v3922_v20 = vrot.slane %v3808_v19, %v7842_v56  ;;  %v3918_v21 = vrot.slane %v3808_v19, %v7837_v54  ;;  %v5807_v22 = vld [vmem:[%s9986_s7 + $0xa0] sm:$0xff]  ;;  %v5810_v54 = vld [vmem:[%s9986_s7 + $0xb8] sm:$0xff] }
 0xa33   :  { %v7114_v56 = vpack.c.bf16 %v5810_v54, %v5809_v29  ;;  %v5176_v19 = vld [vmem:[%s9990_s11 + $0x18] sm:$0xff] }
 0xa34   :  { %7011 = vmatpush1.bf16.msra.mxu1 %v7010_v26  ;;  %v5770_v26 = vld [vmem:[%s9982_s3 + $0x3a0] sm:$0xff] }
 0xa35   :  { %7013 = vmatprep.subr.bf16.mxu1 %v7012_v27  ;;  %v7050_v27 = vpack.c.bf16 %v5770_v26, %v5768_v25 }
 0xa38   :  { %7015 = vmatpush1.bf16.msra.mxu1 %v7014_v32  ;;  %v5777_v32 = vld [vmem:[%s9982_s3 + $0x3d0] sm:$0xff] }
 0xa39   :  { %7017 = vmatprep.subr.bf16.mxu1 %v7016_v33  ;;  %v5780_v33 = vld [vmem:[%s9982_s3 + $0x3e8] sm:$0xff]  ;;  %v7054_v37 = vpack.c.bf16 %v5777_v32, %v5775_v31 }
 0xa3a   :  { %v5812_v31 = vld [vmem:[%s9986_s7 + $0xc8] sm:$0xff] }
 0xa3b   :  { %v7117_v32 = vpack.c.bf16 %v5812_v31, %v5811_v30  ;;  %v5834_v31 = vld [vmem:[%s9988_s9 + $0x50] sm:$0xff] }
 0xa3c   :  { %7019 = vmatpush1.bf16.msra.mxu1 %v7018_v38  ;;  %v7056_v38 = vpack.c.bf16 %v5782_v34, %v5780_v33  ;;  %v5813_v33 = vld [vmem:[%s9986_s7 + $0xd0] sm:$0xff]  ;;  %v5814_v34 = vld [vmem:[%s9986_s7 + $0xd8] sm:$0xff] }
 0xa3d   :  { %7021 = vmatprep.subr.bf16.mxu1 %v7020_v39  ;;  %v5779_v39 = vld [vmem:[%s9982_s3 + $0x3e0] sm:$0xff] }
 0xa3e   :  { %v7058_v43 = vpack.c.bf16 %v5781_v5, %v5779_v39  ;;  %v5817_v39 = vld [vmem:[%s9986_s7 + $0xf0] sm:$0xff]  ;;  %v5818_v5 = vld [vmem:[%s9986_s7 + $0xf8] sm:$0xff] }
 0xa40   :  { %7023 = vmatpush1.bf16.msra.mxu1 %v7022_v41  ;;  %v5784_v41 = vld [vmem:[%s9982_s3 + $0x408] sm:$0xff] }
 0xa41   :  { %4096 = vmatprep.subr.mxu1 %v5742_v42  ;;  %v5786_v42 = vld [vmem:[%s9982_s3 + $0x418] sm:$0xff] }
 0xa42   :  { %v7060_v44 = vpack.c.bf16 %v5786_v42, %v5784_v41  ;;  %v5819_v41 = vld [vmem:[%s9986_s7 + $0x100] sm:$0xff]  ;;  %v5820_v42 = vld [vmem:[%s9986_s7 + $0x108] sm:$0xff] }
 0xa44   :  { %4097 = vmatpush1.msra.mxu1 %v5741_v49  ;;  %v7062_v49 = vpack.c.bf16 %v5785_v46, %v5783_v45  ;;  %v5822_v45 = vld [vmem:[%s9986_s7 + $0x118] sm:$0xff] }
 0xa45   :  { %5743 = vmatmul.mubr.msk.f32.vlgmr.msra.gmra.mrb[36].mxu1 %vm1195_vm7, %v4034_v58  ;;  %7025 = vmatprep.subr.bf16.mxu1 %v7024_v50  ;;  %v7064_v50 = vpack.c.bf16 %v5790_v48, %v5788_v47  ;;  %v5823_v47 = vld [vmem:[%s9986_s7 + $0x120] sm:$0xff]  ;;  %v5824_v48 = vld [vmem:[%s9986_s7 + $0x128] sm:$0xff] }
 0xa46   :  { %7027 = vmatpush1.bf16.msra.mxu1 %v7026_v51  ;;  %4239 = vmatprep.mubr.f32.mxu1 %v7333_v7  ;;  %v5787_v51 = vld [vmem:[%s9982_s3 + $0x420] sm:$0xff] }
 0xa47   :  { %7029 = vmatprep.subr.bf16.mxu1 %v7028_v52  ;;  %v5789_v52 = vld [vmem:[%s9982_s3 + $0x430] sm:$0xff] }
 0xa48   :  { %v7066_v58 = vpack.c.bf16 %v5789_v52, %v5787_v51  ;;  %v5826_v51 = vld [vmem:[%s9986_s7 + $0x138] sm:$0xff] }
 0xa4a   :  { %7031 = vmatpush1.bf16.msra.mxu1 %v7030_v61  ;;  %v5793_v61 = vld [vmem:[%s9982_s3 + $0x450] sm:$0xff] }
 0xa4b   :  { %7033 = vmatprep.subr.bf16.mxu1 %v7032_v62  ;;  %v5796_v62 = vld [vmem:[%s9982_s3 + $0x468] sm:$0xff]  ;;  %v7070_v0 = vpack.c.bf16 %v5793_v61, %v5791_v60 }
 0xa4c   :  { %v7072_v1 = vpack.c.bf16 %v5798_v63, %v5796_v62  ;;  %v4833_v62 = vld [vmem:[%s9988_s9] sm:$0xff]  ;;  %v4834_v63 = vld [vmem:[%s9988_s9 + $0x8] sm:$0xff] }
 0xa4e   :  { %7035 = vmatpush1.bf16.msra.mxu1 %v7034_v3  ;;  %v5797_v3 = vld [vmem:[%s9982_s3 + $0x470] sm:$0xff] }
 0xa4f   :  { %7037 = vmatprep.subr.bf16.mxu1 %v7036_v4  ;;  %v5800_v4 = vld [vmem:[%s9982_s3 + $0x488] sm:$0xff]  ;;  %v7074_v8 = vpack.c.bf16 %v5797_v3, %v5795_v2  ;;  %v4836_v2 = vld [vmem:[%s9988_s9 + $0x18] sm:$0xff] }
 0xa50   :  { %v7076_v9 = vpack.c.bf16 %v5802_v6, %v5800_v4  ;;  %v4837_v4 = vld [vmem:[%s9988_s9 + $0x20] sm:$0xff]  ;;  %v4838_v6 = vld [vmem:[%s9988_s9 + $0x28] sm:$0xff] }
 0xa52   :  { %7039 = vmatpush1.bf16.msra.mxu1 %v7038_v11  ;;  %v5801_v11 = vld [vmem:[%s9982_s3 + $0x490] sm:$0xff] }
 0xa53   :  { %7041 = vmatprep.subr.bf16.mxu1 %v7040_v12  ;;  %v7078_v12 = vpack.c.bf16 %v5801_v11, %v5799_v10  ;;  %v4840_v10 = vld [vmem:[%s9988_s9 + $0x38] sm:$0xff] }
 0xa56   :  { %7043 = vmatpush1.bf16.msra.mxu1 %v7042_v17  ;;  %v4374_v17 = vld [vmem:[%s9986_s7 + $0x98] sm:$0xff] }
 0xa57   :  { %7045 = vmatprep.subr.bf16.mxu1 %v7044_v18  ;;  %v7108_v18 = vpack.c.bf16 %v4374_v17, %v4373_v16  ;;  %v5174_v16 = vld [vmem:[%s9990_s11 + $0x8] sm:$0xff]  ;;  %v5175_v17 = vld [vmem:[%s9990_s11 + $0x10] sm:$0xff] }
 0xa59   :  { %7109 = vmatpush1.bf16.msra.mxu0 %v7108_v18 }
 0xa5a   :  { %7047 = vmatpush1.bf16.msra.mxu1 %v7046_v23  ;;  %7110 = vmatprep.subr.bf16.mxu0 %v7334_v53  ;;  %v5808_v23 = vld [vmem:[%s9986_s7 + $0xa8] sm:$0xff] }
 0xa5b   :  { %7049 = vmatprep.subr.bf16.mxu1 %v7048_v24 }
 0xa5e   :  { %7051 = vmatpush1.bf16.msra.mxu1 %v7050_v27  ;;  %v7111_v27 = vpack.c.bf16 %v5808_v23, %v5807_v22 }
 0xa5f   :  { %4203 = vmatprep.subr.mxu1 %v5773_v28 }
 0xa62   :  { %4204 = vmatpush1.msra.mxu1 %v5772_v35  ;;  %v7120_v35 = vpack.c.bf16 %v5814_v34, %v5813_v33  ;;  %v5836_v34 = vld [vmem:[%s9988_s9 + $0x60] sm:$0xff] }
 0xa63   :  { %5774 = vmatmul.mubr.msk.f32.vlgmr.msra.gmra.mrb[36].mxu1 %vm1195_vm7, %v4141_v40  ;;  %7053 = vmatprep.subr.bf16.mxu1 %v7052_v36  ;;  %v5815_v36 = vld [vmem:[%s9986_s7 + $0xe0] sm:$0xff]  ;;  %v7126_v40 = vpack.c.bf16 %v5818_v5, %v5817_v39  ;;  %v5839_v39 = vld [vmem:[%s9988_s9 + $0x78] sm:$0xff] }
 0xa64   :  { %7055 = vmatpush1.bf16.msra.mxu1 %v7054_v37  ;;  %4346 = vmatprep.mubr.f32.mxu1 %v7333_v7  ;;  %v5816_v37 = vld [vmem:[%s9986_s7 + $0xe8] sm:$0xff] }
 0xa65   :  { %7057 = vmatprep.subr.bf16.mxu1 %v7056_v38  ;;  %v7123_v38 = vpack.c.bf16 %v5816_v37, %v5815_v36 }
 0xa68   :  { %7059 = vmatpush1.bf16.msra.mxu1 %v7058_v43  ;;  %v7129_v43 = vpack.c.bf16 %v5820_v42, %v5819_v41  ;;  %v5841_v41 = vld [vmem:[%s9988_s9 + $0x88] sm:$0xff] }
 0xa69   :  { %7061 = vmatprep.subr.bf16.mxu1 %v7060_v44  ;;  %v5821_v44 = vld [vmem:[%s9986_s7 + $0x110] sm:$0xff] }
 0xa6a   :  { %v7132_v46 = vpack.c.bf16 %v5822_v45, %v5821_v44  ;;  %v5843_v44 = vld [vmem:[%s9988_s9 + $0x98] sm:$0xff] }
 0xa6c   :  { %7063 = vmatpush1.bf16.msra.mxu1 %v7062_v49  ;;  %v7135_v49 = vpack.c.bf16 %v5824_v48, %v5823_v47  ;;  %v5846_v47 = vld [vmem:[%s9988_s9 + $0xa8] sm:$0xff] }
 0xa6d   :  { %7065 = vmatprep.subr.bf16.mxu1 %v7064_v50  ;;  %v5825_v50 = vld [vmem:[%s9986_s7 + $0x130] sm:$0xff] }
 0xa6e   :  { %v7138_v52 = vpack.c.bf16 %v5826_v51, %v5825_v50  ;;  %v5848_v50 = vld [vmem:[%s9988_s9 + $0xb8] sm:$0xff] }
 0xa70   :  { %7067 = vmatpush1.bf16.msra.mxu1 %v7066_v58 }
 0xa71   :  { %7069 = vmatprep.subr.bf16.mxu1 %v7068_v59  ;;  %v5829_v59 = vld [vmem:[%s9987_s8 + $0x4] sm:$0xf] }
 0xa74   :  { %7071 = vmatpush1.bf16.msra.mxu1 %v7070_v0  ;;  %v7141_v0 = vpack.c.bf16 %v4834_v63, %v4833_v62  ;;  %v5853_v62 = vld [vmem:[%s9988_s9 + $0xe0] sm:$0xff]  ;;  %v5854_v63 = vld [vmem:[%s9988_s9 + $0xe8] sm:$0xff] }
 0xa75   :  { %7073 = vmatprep.subr.bf16.mxu1 %v7072_v1  ;;  %v4835_v1 = vld [vmem:[%s9988_s9 + $0x10] sm:$0xff] }
 0xa76   :  { %v7144_v3 = vpack.c.bf16 %v4836_v2, %v4835_v1  ;;  %v5856_v1 = vld [vmem:[%s9988_s9 + $0xf0] sm:$0xff]  ;;  %v5857_v2 = vld [vmem:[%s9988_s9 + $0xf8] sm:$0xff] }
 0xa78   :  { %7075 = vmatpush1.bf16.msra.mxu1 %v7074_v8  ;;  %v7147_v8 = vpack.c.bf16 %v4838_v6, %v4837_v4  ;;  %v5858_v4 = vld [vmem:[%s9988_s9 + $0x100] sm:$0xff]  ;;  %v5859_v6 = vld [vmem:[%s9988_s9 + $0x108] sm:$0xff] }
 0xa79   :  { %7077 = vmatprep.subr.bf16.mxu1 %v7076_v9  ;;  %v4839_v9 = vld [vmem:[%s9988_s9 + $0x30] sm:$0xff] }
 0xa7a   :  { %v7150_v11 = vpack.c.bf16 %v4840_v10, %v4839_v9  ;;  %v7189_v9 = vpack.c.bf16 %v5859_v6, %v5858_v4  ;;  %v5860_v10 = vld [vmem:[%s9988_s9 + $0x110] sm:$0xff] }
 0xa7c   :  { %7079 = vmatpush1.bf16.msra.mxu1 %v7078_v12  ;;  %v4841_v12 = vld [vmem:[%s9988_s9 + $0x40] sm:$0xff] }
 0xa7d   :  { %4310 = vmatprep.subr.mxu1 %v5804_v13  ;;  %v4842_v13 = vld [vmem:[%s9988_s9 + $0x48] sm:$0xff] }
 0xa80   :  { %4311 = vmatpush1.msra.mxu1 %v5803_v14  ;;  %v7153_v14 = vpack.c.bf16 %v4842_v13, %v4841_v12  ;;  %v5862_v13 = vld [vmem:[%s9988_s9 + $0x120] sm:$0xff] }
 0xa81   :  { %5805 = vmatmul.mubr.msk.f32.vlgmr.msra.gmra.mrb[36].mxu1 %vm1195_vm7, %v4248_v15  ;;  %7200 = vmatprep.subr.bf16.mxu1 %v7334_v53  ;;  %v5173_v15 = vld [vmem:[%s9990_s11] sm:$0xff] }
 0xa82   :  { %6356 = vmatprep.mubr.msk.f32.mxu1 %vm7335_vm9, %v7333_v7  ;;  %v7201_v18 = vpack.c.bf16 %v5174_v16, %v5173_v15  ;;  %v5864_v16 = vld [vmem:[%s9988_s9 + $0x130] sm:$0xff] }
 0xa84   :  { %7202 = vmatpush3.bf16.msra.mxu1 %v7201_v18 }
 0xa85   :  { %7203 = vmatprep.subr.bf16.mxu1 %v7334_v53 }
 0xb54   :  { %v4348_v24 = vpop.f32.mrb[36].mxu1 }
 0xb55   :  { %v4350_v25 = vpop.f32.mrb[37].mxu1  ;;  %v7230_v28 = vadd.f32 %v4348_v24, %v3918_v21 }
 0xb56   :  { %v7231_v26 = vadd.f32 %v4350_v25, %v3922_v20  ;;  %v7204_v20 = vpack.c.bf16 %v5176_v19, %v5175_v17  ;;  %v5865_v17 = vld [vmem:[%s9988_s9 + $0x138] sm:$0xff] }
 0xb57   :  { %v7198_v18 = vpack.c.bf16 %v5865_v17, %v5864_v16 }
 0xb58   :  { %5806 = vmatprep.mubr.msk.f32.mxu0 %vm1770_vm8, %v7231_v26  ;;  %7205 = vmatpush3.bf16.msra.mxu1 %v7204_v20  ;;  %v5177_v20 = vld [vmem:[%s9990_s11 + $0x20] sm:$0xff] }
 0xb59   :  { %4443 = vmatmul.mubr.f32.vlgmr.msra.gmra.mrb[40].mxu0 %v7230_v28  ;;  %7206 = vmatprep.subr.bf16.mxu1 %v7334_v53 }
 0xb5a   :  { %7112 = vmatpush1.bf16.msra.mxu0 %v7111_v27  ;;  %5827 = vmatprep.mubr.msk.f32.mxu0 %vm1770_vm8, %v7231_v26 }
 0xb5b   :  { %7113 = vmatprep.subr.bf16.mxu0 %v7334_v53 }
 0xb5e   :  { %7115 = vmatpush1.bf16.msra.mxu0 %v7114_v56 }
 0xb5f   :  { %7116 = vmatprep.subr.bf16.mxu0 %v7334_v53 }
 0xb62   :  { %7118 = vmatpush1.bf16.msra.mxu0 %v7117_v32  ;;  %v5835_v32 = vld [vmem:[%s9988_s9 + $0x58] sm:$0xff] }
 0xb63   :  { %7119 = vmatprep.subr.bf16.mxu0 %v7334_v53  ;;  %v7156_v33 = vpack.c.bf16 %v5835_v32, %v5834_v31 }
 0xb66   :  { %7121 = vmatpush1.bf16.msra.mxu0 %v7120_v35  ;;  %v5837_v35 = vld [vmem:[%s9988_s9 + $0x68] sm:$0xff] }
 0xb67   :  { %7122 = vmatprep.subr.bf16.mxu0 %v7334_v53  ;;  %v7159_v37 = vpack.c.bf16 %v5837_v35, %v5836_v34 }
 0xb6a   :  { %7124 = vmatpush1.bf16.msra.mxu0 %v7123_v38  ;;  %v5838_v38 = vld [vmem:[%s9988_s9 + $0x70] sm:$0xff] }
 0xb6b   :  { %7125 = vmatprep.subr.bf16.mxu0 %v7334_v53  ;;  %v7162_v5 = vpack.c.bf16 %v5839_v39, %v5838_v38 }
 0xb6e   :  { %7127 = vmatpush1.bf16.msra.mxu0 %v7126_v40  ;;  %v5840_v40 = vld [vmem:[%s9988_s9 + $0x80] sm:$0xff] }
 0xb6f   :  { %7128 = vmatprep.subr.bf16.mxu0 %v7334_v53  ;;  %v7165_v42 = vpack.c.bf16 %v5841_v41, %v5840_v40 }
 0xb72   :  { %7130 = vmatpush1.bf16.msra.mxu0 %v7129_v43  ;;  %v5842_v43 = vld [vmem:[%s9988_s9 + $0x90] sm:$0xff] }
 0xb73   :  { %7131 = vmatprep.subr.bf16.mxu0 %v7334_v53  ;;  %v7168_v45 = vpack.c.bf16 %v5843_v44, %v5842_v43 }
 0xb76   :  { %7133 = vmatpush1.bf16.msra.mxu0 %v7132_v46  ;;  %v5845_v46 = vld [vmem:[%s9988_s9 + $0xa0] sm:$0xff] }
 0xb77   :  { %7134 = vmatprep.subr.bf16.mxu0 %v7334_v53  ;;  %v7171_v48 = vpack.c.bf16 %v5846_v47, %v5845_v46 }
 0xb7a   :  { %7136 = vmatpush1.bf16.msra.mxu0 %v7135_v49  ;;  %v5847_v49 = vld [vmem:[%s9988_s9 + $0xb0] sm:$0xff] }
 0xb7b   :  { %7137 = vmatprep.subr.bf16.mxu0 %v7334_v53 }
 0xb7e   :  { %7139 = vmatpush1.bf16.msra.mxu0 %v7138_v52  ;;  %v7174_v52 = vpack.c.bf16 %v5848_v50, %v5847_v49 }
 0xb7f   :  { %6230 = vmatprep.subr.mxu0 %v7333_v7 }
 0xb81   :  { %4533 = vmatmul.mubr.f32.vlgmr.msra.gmra.mrb[42].mxu0 %v7230_v28 }
 0xb82   :  { %6232 = vmatprep.mubr.msk.f32.mxu0 %vm7335_vm9, %v7333_v7 }
 0xc2c   :  { %v4444_v57 = vpop.f32.mrb[40].mxu0 }
 0xc2d   :  { %v4446_v58 = vpop.f32.mrb[41].mxu0  ;;  %6231 = vmatpush3.msra.mxu0 %v4444_v57 }
 0xc2e   :  { %6235 = vmatprep.subr.mxu0 %v7333_v7  ;;  %6233 = vmatmul.mubr.msk.f32.vlgmr.msra.gmra.mrb[44].mxu0 %vm1936_vm10, %v4538_v55 }
 0xc2f   :  { %6236 = vmatpush3.msra.mxu0 %v4444_v57  ;;  %6237 = vmatprep.mubr.msk.f32.mxu0 %vm7335_vm9, %v7333_v7  ;;  %v5850_v57 = vld [vmem:[%s9988_s9 + $0xc8] sm:$0xff] }
 0xc30   :  { %6240 = vmatprep.subr.mxu0 %v7333_v7 }
 0xc32   :  { %6238 = vmatmul.mubr.msk.f32.vlgmr.msra.gmra.mrb[46].mxu0 %vm1936_vm10, %v5829_v59 }
 0xc33   :  { %6242 = vmatprep.mubr.msk.f32.mxu0 %vm7335_vm9, %v7333_v7 }
 0xc54   :  { %v4534_v60 = vpop.f32.mrb[42].mxu0 }
 0xc55   :  { %v4536_v61 = vpop.f32.mrb[43].mxu0  ;;  %6241 = vmatpush3.msra.mxu0 %v4534_v60 }
 0xc56   :  { %6243 = vmatmul.mubr.msk.f32.vlgmr.msra.gmra.mrb[48].mxu0 %vm1936_vm10, %v4538_v55  ;;  %6245 = vmatprep.subr.mxu0 %v7333_v7  ;;  %v5849_v55 = vld [vmem:[%s9988_s9 + $0xc0] sm:$0xff] }
 0xc57   :  { %6246 = vmatpush3.msra.mxu0 %v4534_v60  ;;  %6247 = vmatprep.mubr.msk.f32.mxu0 %vm7335_vm9, %v7333_v7  ;;  %v7177_v58 = vpack.c.bf16 %v5850_v57, %v5849_v55  ;;  %v5852_v60 = vld [vmem:[%s9988_s9 + $0xd8] sm:$0xff] }
 0xc58   :  { %7140 = vmatprep.subr.bf16.mxu0 %v7334_v53 }
 0xc5a   :  { %6248 = vmatmul.mubr.msk.f32.vlgmr.msra.gmra.mrb[50].mxu0 %vm1936_vm10, %v5829_v59  ;;  %v5851_v59 = vld [vmem:[%s9988_s9 + $0xd0] sm:$0xff] }
 0xc5b   :  { %6270 = vmatprep.mubr.msk.f32.mxu0 %vm7335_vm9, %v7333_v7  ;;  %7142 = vmatpush3.bf16.msra.mxu0 %v7141_v0  ;;  %v7180_v61 = vpack.c.bf16 %v5852_v60, %v5851_v59  ;;  %v7183_v0 = vpack.c.bf16 %v5854_v63, %v5853_v62 }
 0xc5c   :  { %7143 = vmatprep.subr.bf16.mxu0 %v7334_v53 }
 0xc5f   :  { %7145 = vmatpush3.bf16.msra.mxu0 %v7144_v3  ;;  %v7186_v3 = vpack.c.bf16 %v5857_v2, %v5856_v1 }
 0xc60   :  { %7146 = vmatprep.subr.bf16.mxu0 %v7334_v53 }
 0xc63   :  { %7148 = vmatpush3.bf16.msra.mxu0 %v7147_v8 }
 0xc64   :  { %7149 = vmatprep.subr.bf16.mxu0 %v7334_v53 }
 0xc67   :  { %7151 = vmatpush3.bf16.msra.mxu0 %v7150_v11  ;;  %v5861_v11 = vld [vmem:[%s9988_s9 + $0x118] sm:$0xff] }
 0xc68   :  { %7152 = vmatprep.subr.bf16.mxu0 %v7334_v53  ;;  %v7192_v12 = vpack.c.bf16 %v5861_v11, %v5860_v10 }
 0xc6b   :  { %7154 = vmatpush3.bf16.msra.mxu0 %v7153_v14  ;;  %v5863_v14 = vld [vmem:[%s9988_s9 + $0x128] sm:$0xff] }
 0xc6c   :  { %7155 = vmatprep.subr.bf16.mxu0 %v7334_v53  ;;  %v7195_v15 = vpack.c.bf16 %v5863_v14, %v5862_v13 }
 0xd01   :  { %v4608_v21 = vpop.f32.mrb[44].mxu0 }
 0xd02   :  { %v6234_v22 = vpop.f32.mrb[45].mxu0 }
 0xd05   :  { %v4682_v23 = vpop.f32.mrb[46].mxu0 }
 0xd06   :  { %v4686_v24 = vmax.f32 %v4608_v21, %v4682_v23  ;;  %v6239_v25 = vpop.f32.mrb[47].mxu0  ;;  %v5178_v21 = vld [vmem:[%s9990_s11 + $0x28] sm:$0xff]  ;;  %v4831_v23 = vld [vmem:[%s9989_s10] sm:$0x1] }
 0xd07   :  { %v7207_v22 = vpack.c.bf16 %v5178_v21, %v5177_v20 }
 0xd09   :  { %7208 = vmatpush3.bf16.msra.mxu1 %v7207_v22 }
 0xd0a   :  { %6354 = vmatprep.subr.mxu1 %v7333_v7 }
 0xd29   :  { %v4753_v26 = vpop.f32.mrb[48].mxu0 }
 0xd2a   :  { %v6244_v27 = vpop.f32.mrb[49].mxu0 }
 0xd2d   :  { %v4823_v28 = vpop.f32.mrb[50].mxu0 }
 0xd2e   :  { %v4827_v29 = vmax.f32 %v4753_v26, %v4823_v28  ;;  %v6249_v54 = vpop.f32.mrb[51].mxu0 }
 0xd30   :  { %v4828_v56 = vmax.f32 %v4686_v24, %v4827_v29 }
 0xd32   :  { %v4829_v30 = vmax.f32 %v4828_v56, 0.0 }
 0xd34   :  { %4830 = vst.msk [vmem:[#allocation3] sm:$0xf] %vm2229_vm11, %v4829_v30 }
 0xd3b   :  { %v4832_v36 = vld [vmem:[#allocation3] sm:$0x1]  ;;  %v4917_v51 = vld [vmem:[#allocation3 + $0x1] sm:$0x1]  ;;  %v5002_v8 = vld [vmem:[#allocation3 + $0x2] sm:$0x1] }
 0xd3c   :  { %6271 = vmatmul.mubr.msk.f32.vlgmr.msra.gmra.mrb[52].mxu0 %vm2243_vm12, %v4832_v36  ;;  %v5087_v19 = vld [vmem:[#allocation3 + $0x3] sm:$0x1] }
 0xd3d   :  { %7157 = vmatpush3.bf16.msra.mxu0 %v7156_v33  ;;  %6293 = vmatprep.mubr.msk.f32.mxu0 %vm7335_vm9, %v7333_v7 }
 0xd3e   :  { %7158 = vmatprep.subr.bf16.mxu0 %v7334_v53 }
 0xd41   :  { %7160 = vmatpush3.bf16.msra.mxu0 %v7159_v37 }
 0xd42   :  { %7161 = vmatprep.subr.bf16.mxu0 %v7334_v53 }
 0xd45   :  { %7163 = vmatpush3.bf16.msra.mxu0 %v7162_v5 }
 0xd46   :  { %7164 = vmatprep.subr.bf16.mxu0 %v7334_v53 }
 0xd49   :  { %7166 = vmatpush3.bf16.msra.mxu0 %v7165_v42 }
 0xd4a   :  { %7167 = vmatprep.subr.bf16.mxu0 %v7334_v53 }
 0xd4d   :  { %7169 = vmatpush3.bf16.msra.mxu0 %v7168_v45 }
 0xd4e   :  { %7170 = vmatprep.subr.bf16.mxu0 %v7334_v53 }
 0xd50   :  { %6294 = vmatmul.mubr.msk.f32.vlgmr.msra.gmra.mrb[52].mxu0 %vm2243_vm12, %v4917_v51 }
 0xd51   :  { %7172 = vmatpush3.bf16.msra.mxu0 %v7171_v48  ;;  %6316 = vmatprep.mubr.msk.f32.mxu0 %vm7335_vm9, %v7333_v7 }
 0xd52   :  { %7173 = vmatprep.subr.bf16.mxu0 %v7334_v53 }
 0xd55   :  { %7175 = vmatpush3.bf16.msra.mxu0 %v7174_v52 }
 0xd56   :  { %7176 = vmatprep.subr.bf16.mxu0 %v7334_v53 }
 0xd59   :  { %7178 = vmatpush3.bf16.msra.mxu0 %v7177_v58 }
 0xd5a   :  { %7179 = vmatprep.subr.bf16.mxu0 %v7334_v53 }
 0xd5d   :  { %7181 = vmatpush3.bf16.msra.mxu0 %v7180_v61 }
 0xd5e   :  { %7182 = vmatprep.subr.bf16.mxu0 %v7334_v53 }
 0xd61   :  { %7184 = vmatpush3.bf16.msra.mxu0 %v7183_v0 }
 0xd62   :  { %7185 = vmatprep.subr.bf16.mxu0 %v7334_v53 }
 0xd64   :  { %6317 = vmatmul.mubr.msk.f32.vlgmr.msra.gmra.mrb[52].mxu0 %vm2243_vm12, %v5002_v8 }
 0xd65   :  { %7187 = vmatpush3.bf16.msra.mxu0 %v7186_v3  ;;  %6339 = vmatprep.mubr.msk.f32.mxu0 %vm7335_vm9, %v7333_v7  ;;  %v5180_v7 = vld [vmem:[%s9991_s12] sm:$0x1] }
 0xd66   :  { %7188 = vmatprep.subr.bf16.mxu0 %v7334_v53 }
 0xd69   :  { %7190 = vmatpush3.bf16.msra.mxu0 %v7189_v9 }
 0xd6a   :  { %7191 = vmatprep.subr.bf16.mxu0 %v7334_v53 }
 0xd6d   :  { %7193 = vmatpush3.bf16.msra.mxu0 %v7192_v12 }
 0xd6e   :  { %7194 = vmatprep.subr.bf16.mxu0 %v7334_v53 }
 0xd71   :  { %7196 = vmatpush3.bf16.msra.mxu0 %v7195_v15 }
 0xd72   :  { %7197 = vmatprep.subr.bf16.mxu0 %v7334_v53  ;;  %v5179_v53 = vld [vmem:[%s9990_s11 + $0x30] sm:$0x3]  ;;  %s7308_s11 = scalar_lea.vmem %s5265_s21, 32 }
 0xd73   :  { %6355 = vmatpush3.msk.msra.mxu1 %vm2589_vm13, %v5179_v53  ;;  %p7309_p0 = scmp.ne.s32.totalorder %s5265_s21, %s7308_s11  ;;  %p7314_p2 = scmp.lt.s32.totalorder %s7308_s11, %s7308_s11 }
 0xd75   :  { %7199 = vmatpush3.bf16.msra.mxu0 %v7198_v18  ;;  %p7315_p3 = por %p7314_p2, %p7313_p1 }
 0xd77   :  { %p7316_p4 = pnand %p7315_p3, %p7309_p0 }
 0xd78   :  { %6340 = vmatmul.mubr.msk.f32.vlgmr.msra.gmra.mrb[52].mxu0 %vm2243_vm12, %v5087_v19 }
 0xe4b   :  { %v5167_v24 = vpop.f32.mrb[52].mxu0 }
 0xe4c   :  { %v7232_v25 = vadd.f32 %v5167_v24, %v4831_v23  ;;  %v6341_v26 = vpop.f32.mrb[53].mxu0 }
 0xe4e   :  { %v5172_v27 = vmax.f32 %v7232_v25, 0.0 }
 0xe50   :  { %6357 = vmatmul.mubr.msk.f32.vlgmr.msra.gmra.mrb[38].mxu1 %vm2585_vm14, %v5172_v27 }
 0xf23   :  { %v5253_v28 = vpop.f32.mrb[38].mxu1 }
 0xf24   :  { %v5254_v29 = vadd.f32 %v5253_v28, %v5180_v7  ;;  %v6358_v54 = vpop.f32.mrb[39].mxu1 }
 0xf26   :  { %5257 = vst.msk [vmem:[#allocation4 + $0x1] sm:$0x1] %vm2663_vm15, %v5254_v29 }
 0xf27   :  { %7319 = shalt.err (!%p7316_p4)
}
 0xf28   :  { %s7320_s23 = scalar_lea.hbm %s9992_s13, 32 }
 0xf29   :  { %p7321_p5 = scmp.ne.s32.totalorder %s9992_s13, %s7320_s23  ;;  %p7324_p6 = scmp.lt.u32.totalorder %s7320_s23, %s9992_s13 }
 0xf2b   :  { %p7326_p7 = pnand %p7324_p6, %p7321_p5 }
 0xf2d   :  { %7329 = shalt.err (!%p7326_p7)
}
 0xf2e   :  { %5267 = dma.vmem_to_hbm [thread:$0]  %s5265_s21, 32, %s9992_s13, [#allocation5]  }
 0xf2f   :  { %7330 = dma.done.wait [#allocation5], 32  }
 0xf30   :  { %7331 = vsyncadd [#allocation5], 4294967264 }
 0xf31   :  { %5271 = vsyncpa [#allocation5], 1 }

</bundles_post_ra>
